<compile_context>
chip_gen: v7x
topology: tpu7x:2x2x1
jax: 0.10.0
libtpu: 0.0.40
codegen_flags: <defaults>
</compile_context>

<pallas_src>
import numpy as np
import jax
import jax.numpy as jnp
from jax import lax
from jax.experimental import pallas as pl
from jax.experimental.pallas import tpu as pltpu

EPS = 1e-5
TM_MAX = 512  # max row tile


def _round_up(x, m):
    return (x + m - 1) // m * m


def _row_tile(m):
    tm = min(TM_MAX, _round_up(m, 8))
    return tm, _round_up(m, tm)


# ---------------- Pallas kernels ----------------

def matmul_stats_kernel(a_ref, b_ref, o_ref, sum_ref, sq_ref):
    # fused: MXU matmul + per-column partial sums / sums-of-squares (BN stats).
    y = jnp.dot(a_ref[...], b_ref[...], preferred_element_type=jnp.float32)
    o_ref[...] = y
    tm, npad = y.shape
    y8 = y.reshape(tm // 8, 8, npad)          # group sublane-blocks, reduce leading dim
    sum_ref[...] = jnp.sum(y8, axis=0)
    sq_ref[...] = jnp.sum(y8 * y8, axis=0)


def matmul_tanh_kernel(a_ref, b_ref, o_ref):
    # fused: MXU matmul + tanh epilogue (EUP) for the final layer.
    y = jnp.dot(a_ref[...], b_ref[...], preferred_element_type=jnp.float32)
    o_ref[...] = jnp.tanh(y)


def bn_relu_kernel(y_ref, scale_ref, shift_ref, o_ref):
    o_ref[...] = jnp.maximum(y_ref[...] * scale_ref[...] + shift_ref[...], 0.0)


# ---------------- Pallas wrappers ----------------

def pallas_matmul_stats(a, b):
    """a:(M,K), b:(K,N) -> (yp:(Mp,Np) f32, col_sum:(Np,), col_sq:(Np,))."""
    M, K = a.shape
    _, N = b.shape
    tm, Mp = _row_tile(M)
    Kp, Np = _round_up(K, 128), _round_up(N, 128)
    ap = jnp.pad(a.astype(jnp.bfloat16), ((0, Mp - M), (0, Kp - K)))
    bp = jnp.pad(b.astype(jnp.bfloat16), ((0, Kp - K), (0, Np - N)))
    grid = Mp // tm
    yp, psum, psq = pl.pallas_call(
        matmul_stats_kernel,
        out_shape=(jax.ShapeDtypeStruct((Mp, Np), jnp.float32),
                   jax.ShapeDtypeStruct((grid * 8, Np), jnp.float32),
                   jax.ShapeDtypeStruct((grid * 8, Np), jnp.float32)),
        grid=(grid,),
        in_specs=[pl.BlockSpec((tm, Kp), lambda i: (i, 0)),
                  pl.BlockSpec((Kp, Np), lambda i: (0, 0))],
        out_specs=(pl.BlockSpec((tm, Np), lambda i: (i, 0)),
                   pl.BlockSpec((8, Np), lambda i: (i, 0)),
                   pl.BlockSpec((8, Np), lambda i: (i, 0))),
        compiler_params=pltpu.CompilerParams(dimension_semantics=("parallel",)),
    )(ap, bp)
    return yp, jnp.sum(psum, axis=0), jnp.sum(psq, axis=0)


def pallas_matmul_tanh(a, b):
    M, K = a.shape
    _, N = b.shape
    tm, Mp = _row_tile(M)
    Kp, Np = _round_up(K, 128), _round_up(N, 128)
    ap = jnp.pad(a.astype(jnp.bfloat16), ((0, Mp - M), (0, Kp - K)))
    bp = jnp.pad(b.astype(jnp.bfloat16), ((0, Kp - K), (0, Np - N)))
    grid = Mp // tm
    return pl.pallas_call(
        matmul_tanh_kernel,
        out_shape=jax.ShapeDtypeStruct((Mp, Np), jnp.float32),
        grid=(grid,),
        in_specs=[pl.BlockSpec((tm, Kp), lambda i: (i, 0)),
                  pl.BlockSpec((Kp, Np), lambda i: (0, 0))],
        out_specs=pl.BlockSpec((tm, Np), lambda i: (i, 0)),
        compiler_params=pltpu.CompilerParams(dimension_semantics=("parallel",)),
    )(ap, bp)


def pallas_bn_relu(yp, scale, shift):
    Mp, Np = yp.shape
    tm = min(TM_MAX, Mp)
    grid = Mp // tm
    return pl.pallas_call(
        bn_relu_kernel,
        out_shape=jax.ShapeDtypeStruct((Mp, Np), jnp.float32),
        grid=(grid,),
        in_specs=[pl.BlockSpec((tm, Np), lambda i: (i, 0)),
                  pl.BlockSpec((1, Np), lambda i: (0, 0)),
                  pl.BlockSpec((1, Np), lambda i: (0, 0))],
        out_specs=pl.BlockSpec((tm, Np), lambda i: (i, 0)),
        compiler_params=pltpu.CompilerParams(dimension_semantics=("parallel",)),
    )(yp, scale, shift)


# ---------------- Generator layers (NHWC) ----------------

def conv_transpose_layer(x, w, stride, pad, gamma=None, beta=None, final=False):
    # x: (N, H, W, Cin) NHWC;  w: (Cin, Cout, k, k)  PyTorch ConvTranspose2d weight.
    N, H, W, Cin = x.shape
    _, Cout, k, _ = w.shape
    wf = jnp.flip(w, axis=(2, 3))                       # direct-conv (flipped) taps

    if stride == 1:
        # ConvTranspose(s=1, p) == direct conv after padding with k-1-p.
        pp = k - 1 - pad
        xp = jnp.pad(x, ((0, 0), (pp, pp), (pp, pp), (0, 0)))
        OH = H + 2 * pp - k + 1
        OW = W + 2 * pp - k + 1
        cols = [xp[:, kh:kh + OH, kw:kw + OW, :]
                for kh in range(k) for kw in range(k)]
        A = jnp.concatenate(cols, axis=-1).reshape(N * OH * OW, k * k * Cin)
        Bm = wf.transpose(2, 3, 0, 1).reshape(k * k * Cin, Cout)
        G = 1
    elif stride == 2 and k == 4 and pad == 1:
        # Sub-pixel decomposition: out[2u+ry, 2v+rx] only needs the 2x2 taps
        # wf[2a+ry, 2b+rx] applied at input windows shifted by (ry+a, rx+b).
        OH, OW = 2 * H, 2 * W
        xp = jnp.pad(x, ((0, 0), (1, 1), (1, 1), (0, 0)))
        cols = [xp[:, dy:dy + H, dx:dx + W, :]
                for dy in range(3) for dx in range(3)]
        A = jnp.concatenate(cols, axis=-1).reshape(N * H * W, 9 * Cin)
        Bm = jnp.zeros((3, 3, Cin, 2, 2, Cout), w.dtype)
        for ry in range(2):
            for rx in range(2):
                for ta in range(2):
                    for tb in range(2):
                        Bm = Bm.at[ry + ta, rx + tb, :, ry, rx, :].set(
                            wf[:, :, 2 * ta + ry, 2 * tb + rx])
        Bm = Bm.reshape(9 * Cin, 4 * Cout)
        G = 4
    else:
        # TODO(synk): generic stride via zero-insertion — not needed for DCGAN.
        raise NotImplementedError("only stride 1 and stride 2 / k=4 / p=1 supported")

    M = A.shape[0]
    GC = G * Cout

    if final:
        yp = pallas_matmul_tanh(A, Bm)
    else:
        yp, csum, csq = pallas_matmul_stats(A, Bm)
        count = M * G                                   # = N*OH*OW elements / channel
        s = csum[:GC].reshape(G, Cout).sum(axis=0)
        sq = csq[:GC].reshape(G, Cout).sum(axis=0)
        mean = s / count
        var = sq / count - mean * mean                  # biased var (training-mode BN)
        inv = gamma / jnp.sqrt(var + EPS)
        Np = yp.shape[1]
        scale = jnp.pad(jnp.tile(inv, G), (0, Np - GC)).reshape(1, Np)
        shift = jnp.pad(jnp.tile(beta - mean * inv, G), (0, Np - GC)).reshape(1, Np)
        yp = pallas_bn_relu(yp, scale, shift)

    y = yp[:M, :GC]
    if G == 1:
        return y.reshape(N, OH, OW, Cout)
    # pixel-shuffle the four residues back into the full-resolution NHWC map
    return (y.reshape(N, H, W, 2, 2, Cout)
             .transpose(0, 1, 3, 2, 4, 5)
             .reshape(N, OH, OW, Cout))


def generator_forward(z, params):
    strides = (1, 2, 2, 2, 2)
    pads = (0, 1, 1, 1, 1)
    x = z.transpose(0, 2, 3, 1)                         # NCHW -> NHWC (once)
    n_layers = len(params)
    for i, (w, gamma, beta) in enumerate(params):
        x = conv_transpose_layer(x, w, strides[i], pads[i],
                                 gamma=gamma, beta=beta, final=(i == n_layers - 1))
    return x.transpose(0, 3, 1, 2)                      # NHWC -> NCHW (once)


# ---------------- pure-JAX reference (correctness check) ----------------

def reference_forward(z, params):
    strides = (1, 2, 2, 2, 2)
    pads = (0, 1, 1, 1, 1)
    x = z
    n_layers = len(params)
    for i, (w, gamma, beta) in enumerate(params):
        k = w.shape[2]
        w_conv = jnp.flip(w, axis=(2, 3)).transpose(1, 0, 2, 3)     # (Cout, Cin, k, k)
        pp = k - 1 - pads[i]
        y = lax.conv_general_dilated(
            x, w_conv, window_strides=(1, 1), padding=[(pp, pp), (pp, pp)],
            lhs_dilation=(strides[i], strides[i]),
            dimension_numbers=("NCHW", "OIHW", "NCHW"),
            precision=lax.Precision.HIGHEST)
        if i < n_layers - 1:
            mean = y.mean(axis=(0, 2, 3), keepdims=True)
            var = ((y - mean) ** 2).mean(axis=(0, 2, 3), keepdims=True)
            y = (y - mean) / jnp.sqrt(var + EPS)
            y = y * gamma.reshape(1, -1, 1, 1) + beta.reshape(1, -1, 1, 1)
            y = jnp.maximum(y, 0.0)
        else:
            y = jnp.tanh(y)
        x = y
    return x


# ---------------- main ----------------

if __name__ == "__main__":
    # small config: nz=16, ngf=8, nc=3, batch=2  -> output (2, 3, 64, 64)
    nz, ngf, nc, batch = 16, 8, 3, 2
    key = jax.random.PRNGKey(0)
    keys = jax.random.split(key, 7)

    def conv_w(k, cin, cout):
        return 0.02 * jax.random.normal(k, (cin, cout, 4, 4), dtype=jnp.float32)

    chans = [nz, ngf * 8, ngf * 4, ngf * 2, ngf, nc]
    params = []
    for i in range(5):
        w = conv_w(keys[i], chans[i], chans[i + 1])
        if i < 4:
            gamma = jnp.ones((chans[i + 1],), jnp.float32)   # BatchNorm2d default init
            beta = jnp.zeros((chans[i + 1],), jnp.float32)
        else:
            gamma = beta = None
        params.append((w, gamma, beta))

    z = jax.random.normal(keys[5], (batch, nz, 1, 1), dtype=jnp.float32)

    out = jax.jit(generator_forward)(z, params)
    out = jax.block_until_ready(out)

    ref = jax.block_until_ready(reference_forward(z, params))

    assert out.shape == (batch, nc, 64, 64), out.shape
    if not np.allclose(np.asarray(out), np.asarray(ref), rtol=2e-2, atol=2e-2):
        raise AssertionError("Pallas generator output mismatch vs JAX reference")

    print("KERNEL_OK")
</pallas_src>

<mosaic_0001>
module attributes {stable_mosaic.version = 11 : i64} {
  func.func @bn_relu_kernel(%arg0: i32, %arg1: memref<32x128xf32, #tpu.memory_space<vmem>>, %arg2: memref<1x128xf32, #tpu.memory_space<vmem>>, %arg3: memref<1x128xf32, #tpu.memory_space<vmem>>, %arg4: memref<32x128xf32, #tpu.memory_space<vmem>>) attributes {dimension_semantics = [#tpu.dimension_semantics<parallel>], iteration_bounds = array<i64: 1>, scalar_prefetch = 0 : i64, scratch_operands = 0 : i64, tpu.core_type = #tpu.core_type<tc>, window_params = [{transform_indices = @transform_0, window_bounds = array<i64: 32, 128>}, {pipeline_mode = #tpu.pipeline_mode<synchronous>, transform_indices = @transform_1, window_bounds = array<i64: 1, 128>}, {pipeline_mode = #tpu.pipeline_mode<synchronous>, transform_indices = @transform_2, window_bounds = array<i64: 1, 128>}, {transform_indices = @transform_3, window_bounds = array<i64: 32, 128>}]} {
    %c0 = arith.constant 0 : index
    %c0_0 = arith.constant 0 : index
    %0 = vector.load %arg1[%c0, %c0_0] : memref<32x128xf32, #tpu.memory_space<vmem>>, vector<32x128xf32>
    %c0_1 = arith.constant 0 : index
    %c0_2 = arith.constant 0 : index
    %1 = vector.load %arg2[%c0_1, %c0_2] : memref<1x128xf32, #tpu.memory_space<vmem>>, vector<1x128xf32>
    %2 = vector.broadcast %1 : vector<1x128xf32> to vector<32x128xf32>
    %3 = arith.mulf %0, %2 : vector<32x128xf32>
    %c0_3 = arith.constant 0 : index
    %c0_4 = arith.constant 0 : index
    %4 = vector.load %arg3[%c0_3, %c0_4] : memref<1x128xf32, #tpu.memory_space<vmem>>, vector<1x128xf32>
    %5 = vector.broadcast %4 : vector<1x128xf32> to vector<32x128xf32>
    %6 = arith.addf %3, %5 : vector<32x128xf32>
    %cst = arith.constant 0.000000e+00 : f32
    %7 = vector.broadcast %cst : f32 to vector<32x128xf32>
    %8 = arith.maximumf %6, %7 : vector<32x128xf32>
    %c0_5 = arith.constant 0 : index
    %c0_6 = arith.constant 0 : index
    %9 = vector.load %arg4[%c0_5, %c0_6] : memref<32x128xf32, #tpu.memory_space<vmem>>, vector<32x128xf32>
    tpu.vector_store %arg4[%c0_5, %c0_6], %8 {strides = array<i32>} : memref<32x128xf32, #tpu.memory_space<vmem>>, vector<32x128xf32>,
    return
  }
  func.func @transform_0(%arg0: i32) -> (i32, i32) {
    %c0_i32 = arith.constant 0 : i32
    %c0_i32_0 = arith.constant 0 : i32
    return %arg0, %c0_i32 : i32, i32
  }
  func.func @transform_1(%arg0: i32) -> (i32, i32) {
    %c0_i32 = arith.constant 0 : i32
    %c0_i32_0 = arith.constant 0 : i32
    %c0_i32_1 = arith.constant 0 : i32
    return %c0_i32, %c0_i32_0 : i32, i32
  }
  func.func @transform_2(%arg0: i32) -> (i32, i32) {
    %c0_i32 = arith.constant 0 : i32
    %c0_i32_0 = arith.constant 0 : i32
    %c0_i32_1 = arith.constant 0 : i32
    return %c0_i32, %c0_i32_0 : i32, i32
  }
  func.func @transform_3(%arg0: i32) -> (i32, i32) {
    %c0_i32 = arith.constant 0 : i32
    %c0_i32_0 = arith.constant 0 : i32
    return %arg0, %c0_i32 : i32, i32
  }
}

module attributes {stable_mosaic.version = 11 : i64} {
  func.func @matmul_stats_kernel(%arg0: i32, %arg1: memref<32x256xbf16, #tpu.memory_space<vmem>>, %arg2: memref<256x128xbf16, #tpu.memory_space<vmem>>, %arg3: memref<32x128xf32, #tpu.memory_space<vmem>>, %arg4: memref<8x128xf32, #tpu.memory_space<vmem>>, %arg5: memref<8x128xf32, #tpu.memory_space<vmem>>) attributes {dimension_semantics = [#tpu.dimension_semantics<parallel>], iteration_bounds = array<i64: 1>, scalar_prefetch = 0 : i64, scratch_operands = 0 : i64, tpu.core_type = #tpu.core_type<tc>, window_params = [{transform_indices = @transform_0, window_bounds = array<i64: 32, 256>}, {pipeline_mode = #tpu.pipeline_mode<synchronous>, transform_indices = @transform_1, window_bounds = array<i64: 256, 128>}, {transform_indices = @transform_2, window_bounds = array<i64: 32, 128>}, {transform_indices = @transform_3, window_bounds = array<i64: 8, 128>}, {transform_indices = @transform_4, window_bounds = array<i64: 8, 128>}]} {
    %c0 = arith.constant 0 : index
    %c0_0 = arith.constant 0 : index
    %0 = vector.load %arg1[%c0, %c0_0] : memref<32x256xbf16, #tpu.memory_space<vmem>>, vector<32x256xbf16>
    %c0_1 = arith.constant 0 : index
    %c0_2 = arith.constant 0 : index
    %1 = vector.load %arg2[%c0_1, %c0_2] : memref<256x128xbf16, #tpu.memory_space<vmem>>, vector<256x128xbf16>
    %cst = arith.constant dense<0.000000e+00> : vector<32x128xf32>
    %2 = tpu.matmul %0, %1, %cst {dimension_numbers = #tpu.dot_dimension_numbers<[1], [0], [0], [1], [0, 0, 1, 1], [], []>} : vector<32x256xbf16>, vector<256x128xbf16>, vector<32x128xf32> -> vector<32x128xf32>
    %c0_3 = arith.constant 0 : index
    %c0_4 = arith.constant 0 : index
    %3 = vector.load %arg3[%c0_3, %c0_4] : memref<32x128xf32, #tpu.memory_space<vmem>>, vector<32x128xf32>
    tpu.vector_store %arg3[%c0_3, %c0_4], %2 {strides = array<i32>} : memref<32x128xf32, #tpu.memory_space<vmem>>, vector<32x128xf32>,
    %4 = vector.shape_cast %2 : vector<32x128xf32> to vector<4x8x128xf32>
    %cst_5 = arith.constant dense<0.000000e+00> : vector<8x128xf32>
    %5 = vector.multi_reduction <add>, %4, %cst_5 [0] : vector<4x8x128xf32> to vector<8x128xf32>
    %c0_6 = arith.constant 0 : index
    %c0_7 = arith.constant 0 : index
    %6 = vector.load %arg4[%c0_6, %c0_7] : memref<8x128xf32, #tpu.memory_space<vmem>>, vector<8x128xf32>
    tpu.vector_store %arg4[%c0_6, %c0_7], %5 {strides = array<i32>} : memref<8x128xf32, #tpu.memory_space<vmem>>, vector<8x128xf32>,
    %7 = arith.mulf %4, %4 : vector<4x8x128xf32>
    %cst_8 = arith.constant dense<0.000000e+00> : vector<8x128xf32>
    %8 = vector.multi_reduction <add>, %7, %cst_8 [0] : vector<4x8x128xf32> to vector<8x128xf32>
    %c0_9 = arith.constant 0 : index
    %c0_10 = arith.constant 0 : index
    %9 = vector.load %arg5[%c0_9, %c0_10] : memref<8x128xf32, #tpu.memory_space<vmem>>, vector<8x128xf32>
    tpu.vector_store %arg5[%c0_9, %c0_10], %8 {strides = array<i32>} : memref<8x128xf32, #tpu.memory_space<vmem>>, vector<8x128xf32>,
    return
  }
  func.func @transform_0(%arg0: i32) -> (i32, i32) {
    %c0_i32 = arith.constant 0 : i32
    %c0_i32_0 = arith.constant 0 : i32
    return %arg0, %c0_i32 : i32, i32
  }
  func.func @transform_1(%arg0: i32) -> (i32, i32) {
    %c0_i32 = arith.constant 0 : i32
    %c0_i32_0 = arith.constant 0 : i32
    %c0_i32_1 = arith.constant 0 : i32
    return %c0_i32, %c0_i32_0 : i32, i32
  }
  func.func @transform_2(%arg0: i32) -> (i32, i32) {
    %c0_i32 = arith.constant 0 : i32
    %c0_i32_0 = arith.constant 0 : i32
    return %arg0, %c0_i32 : i32, i32
  }
  func.func @transform_3(%arg0: i32) -> (i32, i32) {
    %c0_i32 = arith.constant 0 : i32
    %c0_i32_0 = arith.constant 0 : i32
    return %arg0, %c0_i32 : i32, i32
  }
  func.func @transform_4(%arg0: i32) -> (i32, i32) {
    %c0_i32 = arith.constant 0 : i32
    %c0_i32_0 = arith.constant 0 : i32
    return %arg0, %c0_i32 : i32, i32
  }
}

module attributes {stable_mosaic.version = 11 : i64} {
  func.func @matmul_stats_kernel(%arg0: i32, %arg1: memref<32x640xbf16, #tpu.memory_space<vmem>>, %arg2: memref<640x128xbf16, #tpu.memory_space<vmem>>, %arg3: memref<32x128xf32, #tpu.memory_space<vmem>>, %arg4: memref<8x128xf32, #tpu.memory_space<vmem>>, %arg5: memref<8x128xf32, #tpu.memory_space<vmem>>) attributes {dimension_semantics = [#tpu.dimension_semantics<parallel>], iteration_bounds = array<i64: 1>, scalar_prefetch = 0 : i64, scratch_operands = 0 : i64, tpu.core_type = #tpu.core_type<tc>, window_params = [{transform_indices = @transform_0, window_bounds = array<i64: 32, 640>}, {pipeline_mode = #tpu.pipeline_mode<synchronous>, transform_indices = @transform_1, window_bounds = array<i64: 640, 128>}, {transform_indices = @transform_2, window_bounds = array<i64: 32, 128>}, {transform_indices = @transform_3, window_bounds = array<i64: 8, 128>}, {transform_indices = @transform_4, window_bounds = array<i64: 8, 128>}]} {
    %c0 = arith.constant 0 : index
    %c0_0 = arith.constant 0 : index
    %0 = vector.load %arg1[%c0, %c0_0] : memref<32x640xbf16, #tpu.memory_space<vmem>>, vector<32x640xbf16>
    %c0_1 = arith.constant 0 : index
    %c0_2 = arith.constant 0 : index
    %1 = vector.load %arg2[%c0_1, %c0_2] : memref<640x128xbf16, #tpu.memory_space<vmem>>, vector<640x128xbf16>
    %cst = arith.constant dense<0.000000e+00> : vector<32x128xf32>
    %2 = tpu.matmul %0, %1, %cst {dimension_numbers = #tpu.dot_dimension_numbers<[1], [0], [0], [1], [0, 0, 1, 1], [], []>} : vector<32x640xbf16>, vector<640x128xbf16>, vector<32x128xf32> -> vector<32x128xf32>
    %c0_3 = arith.constant 0 : index
    %c0_4 = arith.constant 0 : index
    %3 = vector.load %arg3[%c0_3, %c0_4] : memref<32x128xf32, #tpu.memory_space<vmem>>, vector<32x128xf32>
    tpu.vector_store %arg3[%c0_3, %c0_4], %2 {strides = array<i32>} : memref<32x128xf32, #tpu.memory_space<vmem>>, vector<32x128xf32>,
    %4 = vector.shape_cast %2 : vector<32x128xf32> to vector<4x8x128xf32>
    %cst_5 = arith.constant dense<0.000000e+00> : vector<8x128xf32>
    %5 = vector.multi_reduction <add>, %4, %cst_5 [0] : vector<4x8x128xf32> to vector<8x128xf32>
    %c0_6 = arith.constant 0 : index
    %c0_7 = arith.constant 0 : index
    %6 = vector.load %arg4[%c0_6, %c0_7] : memref<8x128xf32, #tpu.memory_space<vmem>>, vector<8x128xf32>
    tpu.vector_store %arg4[%c0_6, %c0_7], %5 {strides = array<i32>} : memref<8x128xf32, #tpu.memory_space<vmem>>, vector<8x128xf32>,
    %7 = arith.mulf %4, %4 : vector<4x8x128xf32>
    %cst_8 = arith.constant dense<0.000000e+00> : vector<8x128xf32>
    %8 = vector.multi_reduction <add>, %7, %cst_8 [0] : vector<4x8x128xf32> to vector<8x128xf32>
    %c0_9 = arith.constant 0 : index
    %c0_10 = arith.constant 0 : index
    %9 = vector.load %arg5[%c0_9, %c0_10] : memref<8x128xf32, #tpu.memory_space<vmem>>, vector<8x128xf32>
    tpu.vector_store %arg5[%c0_9, %c0_10], %8 {strides = array<i32>} : memref<8x128xf32, #tpu.memory_space<vmem>>, vector<8x128xf32>,
    return
  }
  func.func @transform_0(%arg0: i32) -> (i32, i32) {
    %c0_i32 = arith.constant 0 : i32
    %c0_i32_0 = arith.constant 0 : i32
    return %arg0, %c0_i32 : i32, i32
  }
  func.func @transform_1(%arg0: i32) -> (i32, i32) {
    %c0_i32 = arith.constant 0 : i32
    %c0_i32_0 = arith.constant 0 : i32
    %c0_i32_1 = arith.constant 0 : i32
    return %c0_i32, %c0_i32_0 : i32, i32
  }
  func.func @transform_2(%arg0: i32) -> (i32, i32) {
    %c0_i32 = arith.constant 0 : i32
    %c0_i32_0 = arith.constant 0 : i32
    return %arg0, %c0_i32 : i32, i32
  }
  func.func @transform_3(%arg0: i32) -> (i32, i32) {
    %c0_i32 = arith.constant 0 : i32
    %c0_i32_0 = arith.constant 0 : i32
    return %arg0, %c0_i32 : i32, i32
  }
  func.func @transform_4(%arg0: i32) -> (i32, i32) {
    %c0_i32 = arith.constant 0 : i32
    %c0_i32_0 = arith.constant 0 : i32
    return %arg0, %c0_i32 : i32, i32
  }
}

module attributes {stable_mosaic.version = 11 : i64} {
  func.func @matmul_stats_kernel(%arg0: i32, %arg1: memref<128x384xbf16, #tpu.memory_space<vmem>>, %arg2: memref<384x128xbf16, #tpu.memory_space<vmem>>, %arg3: memref<128x128xf32, #tpu.memory_space<vmem>>, %arg4: memref<8x128xf32, #tpu.memory_space<vmem>>, %arg5: memref<8x128xf32, #tpu.memory_space<vmem>>) attributes {dimension_semantics = [#tpu.dimension_semantics<parallel>], iteration_bounds = array<i64: 1>, scalar_prefetch = 0 : i64, scratch_operands = 0 : i64, tpu.core_type = #tpu.core_type<tc>, window_params = [{transform_indices = @transform_0, window_bounds = array<i64: 128, 384>}, {pipeline_mode = #tpu.pipeline_mode<synchronous>, transform_indices = @transform_1, window_bounds = array<i64: 384, 128>}, {transform_indices = @transform_2, window_bounds = array<i64: 128, 128>}, {transform_indices = @transform_3, window_bounds = array<i64: 8, 128>}, {transform_indices = @transform_4, window_bounds = array<i64: 8, 128>}]} {
    %c0 = arith.constant 0 : index
    %c0_0 = arith.constant 0 : index
    %0 = vector.load %arg1[%c0, %c0_0] : memref<128x384xbf16, #tpu.memory_space<vmem>>, vector<128x384xbf16>
    %c0_1 = arith.constant 0 : index
    %c0_2 = arith.constant 0 : index
    %1 = vector.load %arg2[%c0_1, %c0_2] : memref<384x128xbf16, #tpu.memory_space<vmem>>, vector<384x128xbf16>
    %cst = arith.constant dense<0.000000e+00> : vector<128x128xf32>
    %2 = tpu.matmul %0, %1, %cst {dimension_numbers = #tpu.dot_dimension_numbers<[1], [0], [0], [1], [0, 0, 1, 1], [], []>} : vector<128x384xbf16>, vector<384x128xbf16>, vector<128x128xf32> -> vector<128x128xf32>
    %c0_3 = arith.constant 0 : index
    %c0_4 = arith.constant 0 : index
    %3 = vector.load %arg3[%c0_3, %c0_4] : memref<128x128xf32, #tpu.memory_space<vmem>>, vector<128x128xf32>
    tpu.vector_store %arg3[%c0_3, %c0_4], %2 {strides = array<i32>} : memref<128x128xf32, #tpu.memory_space<vmem>>, vector<128x128xf32>,
    %4 = vector.shape_cast %2 : vector<128x128xf32> to vector<16x8x128xf32>
    %cst_5 = arith.constant dense<0.000000e+00> : vector<8x128xf32>
    %5 = vector.multi_reduction <add>, %4, %cst_5 [0] : vector<16x8x128xf32> to vector<8x128xf32>
    %c0_6 = arith.constant 0 : index
    %c0_7 = arith.constant 0 : index
    %6 = vector.load %arg4[%c0_6, %c0_7] : memref<8x128xf32, #tpu.memory_space<vmem>>, vector<8x128xf32>
    tpu.vector_store %arg4[%c0_6, %c0_7], %5 {strides = array<i32>} : memref<8x128xf32, #tpu.memory_space<vmem>>, vector<8x128xf32>,
    %7 = arith.mulf %4, %4 : vector<16x8x128xf32>
    %cst_8 = arith.constant dense<0.000000e+00> : vector<8x128xf32>
    %8 = vector.multi_reduction <add>, %7, %cst_8 [0] : vector<16x8x128xf32> to vector<8x128xf32>
    %c0_9 = arith.constant 0 : index
    %c0_10 = arith.constant 0 : index
    %9 = vector.load %arg5[%c0_9, %c0_10] : memref<8x128xf32, #tpu.memory_space<vmem>>, vector<8x128xf32>
    tpu.vector_store %arg5[%c0_9, %c0_10], %8 {strides = array<i32>} : memref<8x128xf32, #tpu.memory_space<vmem>>, vector<8x128xf32>,
    return
  }
  func.func @transform_0(%arg0: i32) -> (i32, i32) {
    %c0_i32 = arith.constant 0 : i32
    %c0_i32_0 = arith.constant 0 : i32
    return %arg0, %c0_i32 : i32, i32
  }
  func.func @transform_1(%arg0: i32) -> (i32, i32) {
    %c0_i32 = arith.constant 0 : i32
    %c0_i32_0 = arith.constant 0 : i32
    %c0_i32_1 = arith.constant 0 : i32
    return %c0_i32, %c0_i32_0 : i32, i32
  }
  func.func @transform_2(%arg0: i32) -> (i32, i32) {
    %c0_i32 = arith.constant 0 : i32
    %c0_i32_0 = arith.constant 0 : i32
    return %arg0, %c0_i32 : i32, i32
  }
  func.func @transform_3(%arg0: i32) -> (i32, i32) {
    %c0_i32 = arith.constant 0 : i32
    %c0_i32_0 = arith.constant 0 : i32
    return %arg0, %c0_i32 : i32, i32
  }
  func.func @transform_4(%arg0: i32) -> (i32, i32) {
    %c0_i32 = arith.constant 0 : i32
    %c0_i32_0 = arith.constant 0 : i32
    return %arg0, %c0_i32 : i32, i32
  }
}

module attributes {stable_mosaic.version = 11 : i64} {
  func.func @bn_relu_kernel(%arg0: i32, %arg1: memref<128x128xf32, #tpu.memory_space<vmem>>, %arg2: memref<1x128xf32, #tpu.memory_space<vmem>>, %arg3: memref<1x128xf32, #tpu.memory_space<vmem>>, %arg4: memref<128x128xf32, #tpu.memory_space<vmem>>) attributes {dimension_semantics = [#tpu.dimension_semantics<parallel>], iteration_bounds = array<i64: 1>, scalar_prefetch = 0 : i64, scratch_operands = 0 : i64, tpu.core_type = #tpu.core_type<tc>, window_params = [{transform_indices = @transform_0, window_bounds = array<i64: 128, 128>}, {pipeline_mode = #tpu.pipeline_mode<synchronous>, transform_indices = @transform_1, window_bounds = array<i64: 1, 128>}, {pipeline_mode = #tpu.pipeline_mode<synchronous>, transform_indices = @transform_2, window_bounds = array<i64: 1, 128>}, {transform_indices = @transform_3, window_bounds = array<i64: 128, 128>}]} {
    %c0 = arith.constant 0 : index
    %c0_0 = arith.constant 0 : index
    %0 = vector.load %arg1[%c0, %c0_0] : memref<128x128xf32, #tpu.memory_space<vmem>>, vector<128x128xf32>
    %c0_1 = arith.constant 0 : index
    %c0_2 = arith.constant 0 : index
    %1 = vector.load %arg2[%c0_1, %c0_2] : memref<1x128xf32, #tpu.memory_space<vmem>>, vector<1x128xf32>
    %2 = vector.broadcast %1 : vector<1x128xf32> to vector<128x128xf32>
    %3 = arith.mulf %0, %2 : vector<128x128xf32>
    %c0_3 = arith.constant 0 : index
    %c0_4 = arith.constant 0 : index
    %4 = vector.load %arg3[%c0_3, %c0_4] : memref<1x128xf32, #tpu.memory_space<vmem>>, vector<1x128xf32>
    %5 = vector.broadcast %4 : vector<1x128xf32> to vector<128x128xf32>
    %6 = arith.addf %3, %5 : vector<128x128xf32>
    %cst = arith.constant 0.000000e+00 : f32
    %7 = vector.broadcast %cst : f32 to vector<128x128xf32>
    %8 = arith.maximumf %6, %7 : vector<128x128xf32>
    %c0_5 = arith.constant 0 : index
    %c0_6 = arith.constant 0 : index
    %9 = vector.load %arg4[%c0_5, %c0_6] : memref<128x128xf32, #tpu.memory_space<vmem>>, vector<128x128xf32>
    tpu.vector_store %arg4[%c0_5, %c0_6], %8 {strides = array<i32>} : memref<128x128xf32, #tpu.memory_space<vmem>>, vector<128x128xf32>,
    return
  }
  func.func @transform_0(%arg0: i32) -> (i32, i32) {
    %c0_i32 = arith.constant 0 : i32
    %c0_i32_0 = arith.constant 0 : i32
    return %arg0, %c0_i32 : i32, i32
  }
  func.func @transform_1(%arg0: i32) -> (i32, i32) {
    %c0_i32 = arith.constant 0 : i32
    %c0_i32_0 = arith.constant 0 : i32
    %c0_i32_1 = arith.constant 0 : i32
    return %c0_i32, %c0_i32_0 : i32, i32
  }
  func.func @transform_2(%arg0: i32) -> (i32, i32) {
    %c0_i32 = arith.constant 0 : i32
    %c0_i32_0 = arith.constant 0 : i32
    %c0_i32_1 = arith.constant 0 : i32
    return %c0_i32, %c0_i32_0 : i32, i32
  }
  func.func @transform_3(%arg0: i32) -> (i32, i32) {
    %c0_i32 = arith.constant 0 : i32
    %c0_i32_0 = arith.constant 0 : i32
    return %arg0, %c0_i32 : i32, i32
  }
}

module attributes {stable_mosaic.version = 11 : i64} {
  func.func @matmul_stats_kernel(%arg0: i32, %arg1: memref<512x256xbf16, #tpu.memory_space<vmem>>, %arg2: memref<256x128xbf16, #tpu.memory_space<vmem>>, %arg3: memref<512x128xf32, #tpu.memory_space<vmem>>, %arg4: memref<8x128xf32, #tpu.memory_space<vmem>>, %arg5: memref<8x128xf32, #tpu.memory_space<vmem>>) attributes {dimension_semantics = [#tpu.dimension_semantics<parallel>], iteration_bounds = array<i64: 1>, scalar_prefetch = 0 : i64, scratch_operands = 0 : i64, tpu.core_type = #tpu.core_type<tc>, window_params = [{transform_indices = @transform_0, window_bounds = array<i64: 512, 256>}, {pipeline_mode = #tpu.pipeline_mode<synchronous>, transform_indices = @transform_1, window_bounds = array<i64: 256, 128>}, {transform_indices = @transform_2, window_bounds = array<i64: 512, 128>}, {transform_indices = @transform_3, window_bounds = array<i64: 8, 128>}, {transform_indices = @transform_4, window_bounds = array<i64: 8, 128>}]} {
    %c0 = arith.constant 0 : index
    %c0_0 = arith.constant 0 : index
    %0 = vector.load %arg1[%c0, %c0_0] : memref<512x256xbf16, #tpu.memory_space<vmem>>, vector<512x256xbf16>
    %c0_1 = arith.constant 0 : index
    %c0_2 = arith.constant 0 : index
    %1 = vector.load %arg2[%c0_1, %c0_2] : memref<256x128xbf16, #tpu.memory_space<vmem>>, vector<256x128xbf16>
    %cst = arith.constant dense<0.000000e+00> : vector<512x128xf32>
    %2 = tpu.matmul %0, %1, %cst {dimension_numbers = #tpu.dot_dimension_numbers<[1], [0], [0], [1], [0, 0, 1, 1], [], []>} : vector<512x256xbf16>, vector<256x128xbf16>, vector<512x128xf32> -> vector<512x128xf32>
    %c0_3 = arith.constant 0 : index
    %c0_4 = arith.constant 0 : index
    %3 = vector.load %arg3[%c0_3, %c0_4] : memref<512x128xf32, #tpu.memory_space<vmem>>, vector<512x128xf32>
    tpu.vector_store %arg3[%c0_3, %c0_4], %2 {strides = array<i32>} : memref<512x128xf32, #tpu.memory_space<vmem>>, vector<512x128xf32>,
    %4 = vector.shape_cast %2 : vector<512x128xf32> to vector<64x8x128xf32>
    %cst_5 = arith.constant dense<0.000000e+00> : vector<8x128xf32>
    %5 = vector.multi_reduction <add>, %4, %cst_5 [0] : vector<64x8x128xf32> to vector<8x128xf32>
    %c0_6 = arith.constant 0 : index
    %c0_7 = arith.constant 0 : index
    %6 = vector.load %arg4[%c0_6, %c0_7] : memref<8x128xf32, #tpu.memory_space<vmem>>, vector<8x128xf32>
    tpu.vector_store %arg4[%c0_6, %c0_7], %5 {strides = array<i32>} : memref<8x128xf32, #tpu.memory_space<vmem>>, vector<8x128xf32>,
    %7 = arith.mulf %4, %4 : vector<64x8x128xf32>
    %cst_8 = arith.constant dense<0.000000e+00> : vector<8x128xf32>
    %8 = vector.multi_reduction <add>, %7, %cst_8 [0] : vector<64x8x128xf32> to vector<8x128xf32>
    %c0_9 = arith.constant 0 : index
    %c0_10 = arith.constant 0 : index
    %9 = vector.load %arg5[%c0_9, %c0_10] : memref<8x128xf32, #tpu.memory_space<vmem>>, vector<8x128xf32>
    tpu.vector_store %arg5[%c0_9, %c0_10], %8 {strides = array<i32>} : memref<8x128xf32, #tpu.memory_space<vmem>>, vector<8x128xf32>,
    return
  }
  func.func @transform_0(%arg0: i32) -> (i32, i32) {
    %c0_i32 = arith.constant 0 : i32
    %c0_i32_0 = arith.constant 0 : i32
    return %arg0, %c0_i32 : i32, i32
  }
  func.func @transform_1(%arg0: i32) -> (i32, i32) {
    %c0_i32 = arith.constant 0 : i32
    %c0_i32_0 = arith.constant 0 : i32
    %c0_i32_1 = arith.constant 0 : i32
    return %c0_i32, %c0_i32_0 : i32, i32
  }
  func.func @transform_2(%arg0: i32) -> (i32, i32) {
    %c0_i32 = arith.constant 0 : i32
    %c0_i32_0 = arith.constant 0 : i32
    return %arg0, %c0_i32 : i32, i32
  }
  func.func @transform_3(%arg0: i32) -> (i32, i32) {
    %c0_i32 = arith.constant 0 : i32
    %c0_i32_0 = arith.constant 0 : i32
    return %arg0, %c0_i32 : i32, i32
  }
  func.func @transform_4(%arg0: i32) -> (i32, i32) {
    %c0_i32 = arith.constant 0 : i32
    %c0_i32_0 = arith.constant 0 : i32
    return %arg0, %c0_i32 : i32, i32
  }
}

module attributes {stable_mosaic.version = 11 : i64} {
  func.func @bn_relu_kernel(%arg0: i32, %arg1: memref<512x128xf32, #tpu.memory_space<vmem>>, %arg2: memref<1x128xf32, #tpu.memory_space<vmem>>, %arg3: memref<1x128xf32, #tpu.memory_space<vmem>>, %arg4: memref<512x128xf32, #tpu.memory_space<vmem>>) attributes {dimension_semantics = [#tpu.dimension_semantics<parallel>], iteration_bounds = array<i64: 1>, scalar_prefetch = 0 : i64, scratch_operands = 0 : i64, tpu.core_type = #tpu.core_type<tc>, window_params = [{transform_indices = @transform_0, window_bounds = array<i64: 512, 128>}, {pipeline_mode = #tpu.pipeline_mode<synchronous>, transform_indices = @transform_1, window_bounds = array<i64: 1, 128>}, {pipeline_mode = #tpu.pipeline_mode<synchronous>, transform_indices = @transform_2, window_bounds = array<i64: 1, 128>}, {transform_indices = @transform_3, window_bounds = array<i64: 512, 128>}]} {
    %c0 = arith.constant 0 : index
    %c0_0 = arith.constant 0 : index
    %0 = vector.load %arg1[%c0, %c0_0] : memref<512x128xf32, #tpu.memory_space<vmem>>, vector<512x128xf32>
    %c0_1 = arith.constant 0 : index
    %c0_2 = arith.constant 0 : index
    %1 = vector.load %arg2[%c0_1, %c0_2] : memref<1x128xf32, #tpu.memory_space<vmem>>, vector<1x128xf32>
    %2 = vector.broadcast %1 : vector<1x128xf32> to vector<512x128xf32>
    %3 = arith.mulf %0, %2 : vector<512x128xf32>
    %c0_3 = arith.constant 0 : index
    %c0_4 = arith.constant 0 : index
    %4 = vector.load %arg3[%c0_3, %c0_4] : memref<1x128xf32, #tpu.memory_space<vmem>>, vector<1x128xf32>
    %5 = vector.broadcast %4 : vector<1x128xf32> to vector<512x128xf32>
    %6 = arith.addf %3, %5 : vector<512x128xf32>
    %cst = arith.constant 0.000000e+00 : f32
    %7 = vector.broadcast %cst : f32 to vector<512x128xf32>
    %8 = arith.maximumf %6, %7 : vector<512x128xf32>
    %c0_5 = arith.constant 0 : index
    %c0_6 = arith.constant 0 : index
    %9 = vector.load %arg4[%c0_5, %c0_6] : memref<512x128xf32, #tpu.memory_space<vmem>>, vector<512x128xf32>
    tpu.vector_store %arg4[%c0_5, %c0_6], %8 {strides = array<i32>} : memref<512x128xf32, #tpu.memory_space<vmem>>, vector<512x128xf32>,
    return
  }
  func.func @transform_0(%arg0: i32) -> (i32, i32) {
    %c0_i32 = arith.constant 0 : i32
    %c0_i32_0 = arith.constant 0 : i32
    return %arg0, %c0_i32 : i32, i32
  }
  func.func @transform_1(%arg0: i32) -> (i32, i32) {
    %c0_i32 = arith.constant 0 : i32
    %c0_i32_0 = arith.constant 0 : i32
    %c0_i32_1 = arith.constant 0 : i32
    return %c0_i32, %c0_i32_0 : i32, i32
  }
  func.func @transform_2(%arg0: i32) -> (i32, i32) {
    %c0_i32 = arith.constant 0 : i32
    %c0_i32_0 = arith.constant 0 : i32
    %c0_i32_1 = arith.constant 0 : i32
    return %c0_i32, %c0_i32_0 : i32, i32
  }
  func.func @transform_3(%arg0: i32) -> (i32, i32) {
    %c0_i32 = arith.constant 0 : i32
    %c0_i32_0 = arith.constant 0 : i32
    return %arg0, %c0_i32 : i32, i32
  }
}

module attributes {stable_mosaic.version = 11 : i64} {
  func.func @matmul_tanh_kernel(%arg0: i32, %arg1: memref<512x128xbf16, #tpu.memory_space<vmem>>, %arg2: memref<128x128xbf16, #tpu.memory_space<vmem>>, %arg3: memref<512x128xf32, #tpu.memory_space<vmem>>) attributes {dimension_semantics = [#tpu.dimension_semantics<parallel>], iteration_bounds = array<i64: 4>, scalar_prefetch = 0 : i64, scratch_operands = 0 : i64, tpu.core_type = #tpu.core_type<tc>, window_params = [{transform_indices = @transform_0, window_bounds = array<i64: 512, 128>}, {pipeline_mode = #tpu.pipeline_mode<synchronous>, transform_indices = @transform_1, window_bounds = array<i64: 128, 128>}, {transform_indices = @transform_2, window_bounds = array<i64: 512, 128>}]} {
    %c0 = arith.constant 0 : index
    %c0_0 = arith.constant 0 : index
    %0 = vector.load %arg1[%c0, %c0_0] : memref<512x128xbf16, #tpu.memory_space<vmem>>, vector<512x128xbf16>
    %c0_1 = arith.constant 0 : index
    %c0_2 = arith.constant 0 : index
    %1 = vector.load %arg2[%c0_1, %c0_2] : memref<128x128xbf16, #tpu.memory_space<vmem>>, vector<128x128xbf16>
    %cst = arith.constant dense<0.000000e+00> : vector<512x128xf32>
    %2 = tpu.matmul %0, %1, %cst {dimension_numbers = #tpu.dot_dimension_numbers<[1], [0], [0], [1], [0, 0, 1, 1], [], []>} : vector<512x128xbf16>, vector<128x128xbf16>, vector<512x128xf32> -> vector<512x128xf32>
    %3 = math.tanh %2 : vector<512x128xf32>
    %c0_3 = arith.constant 0 : index
    %c0_4 = arith.constant 0 : index
    %4 = vector.load %arg3[%c0_3, %c0_4] : memref<512x128xf32, #tpu.memory_space<vmem>>, vector<512x128xf32>
    tpu.vector_store %arg3[%c0_3, %c0_4], %3 {strides = array<i32>} : memref<512x128xf32, #tpu.memory_space<vmem>>, vector<512x128xf32>,
    return
  }
  func.func @transform_0(%arg0: i32) -> (i32, i32) {
    %c0_i32 = arith.constant 0 : i32
    %c0_i32_0 = arith.constant 0 : i32
    return %arg0, %c0_i32 : i32, i32
  }
  func.func @transform_1(%arg0: i32) -> (i32, i32) {
    %c0_i32 = arith.constant 0 : i32
    %c0_i32_0 = arith.constant 0 : i32
    %c0_i32_1 = arith.constant 0 : i32
    return %c0_i32, %c0_i32_0 : i32, i32
  }
  func.func @transform_2(%arg0: i32) -> (i32, i32) {
    %c0_i32 = arith.constant 0 : i32
    %c0_i32_0 = arith.constant 0 : i32
    return %arg0, %c0_i32 : i32, i32
  }
}

</mosaic_0001>

<bundles_post_ra>
// kernel: generator_forward.10
= control target key start
LH: loop header
LB: loop body
LE: loop exit
PB: predicated region body
PF: predicated region fallthrough
CT: control target
= control target key end

     0   :  { %s104_s0 = inlined_call_operand.vmem [shape: f32[32,128], index: 0, kind: input, shape index: {}]   ;;  %s105_s1 = inlined_call_operand.vmem [shape: f32[1,128], index: 1, kind: input, shape index: {}]   ;;  %s106_s2 = inlined_call_operand.vmem [shape: f32[1,128], index: 2, kind: input, shape index: {}]   ;;  %s107_s3 = inlined_call_operand.vmem [shape: f32[32,128], index: 3, kind: output, shape index: {}]  }
   0x1   :  { %v14_v0 = vld [vmem:[%s104_s0] sm:$0xff]  ;;  %v15_v4 = vld [vmem:[%s104_s0 + $0x8] sm:$0xff]  ;;  %v16_v5 = vld [vmem:[%s104_s0 + $0x10] sm:$0xff] }
   0x2   :  { %v52_v1 = vld [vmem:[%s105_s1] ss:$0 sm:$0xff]  ;;  %v17_v6 = vld [vmem:[%s104_s0 + $0x18] sm:$0xff] }
   0x3   :  { %v53_v2 = vld [vmem:[%s106_s2] ss:$0 sm:$0xff]  ;;  %v25_v3 = vmul.f32 %v52_v1, %v14_v0  ;;  %v26_v7 = vmul.f32 %v52_v1, %v15_v4  ;;  %v27_v8 = vmul.f32 %v52_v1, %v16_v5  ;;  %v28_v9 = vmul.f32 %v52_v1, %v17_v6 }
   0x5   :  { %v36_v10 = vadd.f32 %v53_v2, %v25_v3  ;;  %v37_v11 = vadd.f32 %v53_v2, %v26_v7  ;;  %v38_v12 = vadd.f32 %v53_v2, %v27_v8  ;;  %v39_v13 = vadd.f32 %v53_v2, %v28_v9 }
   0x7   :  { %v40_v14 = vmax.f32 %v36_v10, 0.0  ;;  %v41_v15 = vmax.f32 %v37_v11, 0.0  ;;  %v42_v16 = vmax.f32 %v38_v12, 0.0  ;;  %v43_v17 = vmax.f32 %v39_v13, 0.0 }
   0x9   :  { %44 = vst [vmem:[%s107_s3] sm:$0xff] %v40_v14  ;;  %45 = vst [vmem:[%s107_s3 + $0x8] sm:$0xff] %v41_v15 }
   0xa   :  { %46 = vst [vmem:[%s107_s3 + $0x10] sm:$0xff] %v42_v16  ;;  %47 = vst [vmem:[%s107_s3 + $0x18] sm:$0xff] %v43_v17 }

// kernel: generator_forward.9
= control target key start
LH: loop header
LB: loop body
LE: loop exit
PB: predicated region body
PF: predicated region fallthrough
CT: control target
= control target key end

     0   :  { %s433_s1 = inlined_call_operand.vmem [shape: bf16[256,128], index: 1, kind: input, shape index: {}]   ;;  %s434_s0 = inlined_call_operand.vmem [shape: bf16[32,256], index: 0, kind: input, shape index: {}]   ;;  %s435_s2 = inlined_call_operand.vmem [shape: f32[32,128], index: 2, kind: output, shape index: {0}]   ;;  %s436_s3 = inlined_call_operand.vmem [shape: f32[8,128], index: 3, kind: output, shape index: {1}]   ;;  %s437_s4 = inlined_call_operand.vmem [shape: f32[8,128], index: 4, kind: output, shape index: {2}]  }
   0x1   :  { %v308_v0 = vld [vmem:[%s433_s1 + $0x40] sm:$0xff]   ;;  %v310_v2 = vld [vmem:[%s433_s1 + $0x48] sm:$0xff]   ;;  %v312_v4 = vld [vmem:[%s433_s1 + $0x50] sm:$0xff]  }
   0x2   :  { %v309_v1 = vld [vmem:[%s433_s1] sm:$0xff]   ;;  %264 = vmatprep.subr.bf16.mxu0 %v308_v0  ;;  %292 = vmatprep.subr.bf16.mxu1 %v308_v0  ;;  %v311_v3 = vld [vmem:[%s433_s1 + $0x8] sm:$0xff]   ;;  %v313_v5 = vld [vmem:[%s433_s1 + $0x10] sm:$0xff]  }
   0x3   :  { %265 = vmatpush3.bf16.msra.mxu0 %v309_v1  ;;  %300 = vmatpush3.bf16.msra.mxu1 %v309_v1  ;;  %v314_v6 = vld [vmem:[%s433_s1 + $0x58] sm:$0xff]   ;;  %v316_v8 = vld [vmem:[%s433_s1 + $0x60] sm:$0xff]   ;;  %v318_v10 = vld [vmem:[%s433_s1 + $0x68] sm:$0xff]  }
   0x4   :  { %266 = vmatprep.subr.bf16.mxu0 %v310_v2  ;;  %293 = vmatprep.subr.bf16.mxu1 %v310_v2  ;;  %v315_v7 = vld [vmem:[%s433_s1 + $0x18] sm:$0xff]   ;;  %v317_v9 = vld [vmem:[%s433_s1 + $0x20] sm:$0xff]   ;;  %v319_v13 = vld [vmem:[%s433_s1 + $0x28] sm:$0xff]  }
   0x5   :  { %v326_v11 = vld [vmem:[%s434_s0 + $0x4] ss:$8 sps:$4 sm:$0xff]   ;;  %v329_v12 = vld [vmem:[%s434_s0 + $0x14] ss:$8 sps:$4 sm:$0xff]   ;;  %v324_v18 = vld [vmem:[%s434_s0] ss:$8 sps:$4 sm:$0xff]  }
   0x6   :  { %v320_v14 = vld [vmem:[%s433_s1 + $0x70] sm:$0xff]   ;;  %199 = vmatprep.mubr.bf16.mxu0 %v326_v11  ;;  %207 = vmatprep.mubr.bf16.mxu1 %v329_v12  ;;  %v322_v16 = vld [vmem:[%s433_s1 + $0x78] sm:$0xff]  }
   0x7   :  { %267 = vmatpush3.bf16.msra.mxu0 %v311_v3  ;;  %301 = vmatpush3.bf16.msra.mxu1 %v311_v3  ;;  %v321_v15 = vld [vmem:[%s433_s1 + $0x30] sm:$0xff]   ;;  %v323_v17 = vld [vmem:[%s433_s1 + $0x38] sm:$0xff]  }
   0x8   :  { %268 = vmatprep.subr.bf16.mxu0 %v312_v4  ;;  %294 = vmatprep.subr.bf16.mxu1 %v312_v4  ;;  %v327_v19 = vld [vmem:[%s434_s0 + $0x10] ss:$8 sps:$4 sm:$0xff]  }
   0xb   :  { %269 = vmatpush3.bf16.msra.mxu0 %v313_v5  ;;  %302 = vmatpush3.bf16.msra.mxu1 %v313_v5 }
   0xc   :  { %270 = vmatprep.subr.bf16.mxu0 %v314_v6  ;;  %295 = vmatprep.subr.bf16.mxu1 %v314_v6 }
   0xf   :  { %271 = vmatpush3.bf16.msra.mxu0 %v315_v7  ;;  %303 = vmatpush3.bf16.msra.mxu1 %v315_v7 }
  0x10   :  { %272 = vmatprep.subr.bf16.mxu0 %v316_v8  ;;  %296 = vmatprep.subr.bf16.mxu1 %v316_v8 }
  0x13   :  { %273 = vmatpush3.bf16.msra.mxu0 %v317_v9  ;;  %304 = vmatpush3.bf16.msra.mxu1 %v317_v9 }
  0x14   :  { %274 = vmatprep.subr.bf16.mxu0 %v318_v10  ;;  %297 = vmatprep.subr.bf16.mxu1 %v318_v10 }
  0x17   :  { %275 = vmatpush3.bf16.msra.mxu0 %v319_v13  ;;  %305 = vmatpush3.bf16.msra.mxu1 %v319_v13 }
  0x18   :  { %276 = vmatprep.subr.bf16.mxu0 %v320_v14  ;;  %298 = vmatprep.subr.bf16.mxu1 %v320_v14 }
  0x1b   :  { %277 = vmatpush3.bf16.msra.mxu0 %v321_v15  ;;  %306 = vmatpush3.bf16.msra.mxu1 %v321_v15 }
  0x1c   :  { %278 = vmatprep.subr.bf16.mxu0 %v322_v16  ;;  %299 = vmatprep.subr.bf16.mxu1 %v322_v16 }
  0x1f   :  { %279 = vmatpush3.bf16.msra.mxu0 %v323_v17  ;;  %307 = vmatpush3.bf16.msra.mxu1 %v323_v17 }
  0x22   :  { %200 = vmatmul.mubr.bf16.vlgmr.msra.gmra.mrb[0].mxu0 %v324_v18  ;;  %208 = vmatmul.mubr.bf16.vlgmr.msra.gmra.mrb[0].mxu1 %v327_v19 }
  0xf5   :  { %v280_v20 = vpop.f32.mrb[0].mxu0  ;;  %v286_v21 = vpop.f32.mrb[0].mxu1 }
  0xf6   :  { %v281_v22 = vpop.f32.mrb[1].mxu0  ;;  %v287_v23 = vpop.f32.mrb[1].mxu1 }
  0xf7   :  { %v282_v24 = vadd.f32 %v281_v22, %v280_v20  ;;  %v283_v25 = vpop.f32.mrb[2].mxu0  ;;  %v288_v26 = vadd.f32 %v287_v23, %v286_v21  ;;  %v289_v27 = vpop.f32.mrb[2].mxu1 }
  0xf8   :  { %v284_v28 = vpop.f32.mrb[3].mxu0  ;;  %v290_v29 = vpop.f32.mrb[3].mxu1 }
  0xf9   :  { %216 = vst [vmem:[%s435_s2] sm:$0xff] %v282_v24  ;;  %218 = vst [vmem:[%s435_s2 + $0x10] sm:$0xff] %v288_v26  ;;  %v285_v30 = vadd.f32 %v284_v28, %v283_v25  ;;  %v291_v31 = vadd.f32 %v290_v29, %v289_v27  ;;  %v224_v32 = vmul.f32 %v282_v24, %v282_v24 }
  0xfa   :  { %v226_v33 = vmul.f32 %v288_v26, %v288_v26 }
  0xfb   :  { %217 = vst [vmem:[%s435_s2 + $0x8] sm:$0xff] %v285_v30  ;;  %v220_v34 = vadd.f32 %v285_v30, %v282_v24  ;;  %v225_v35 = vmul.f32 %v285_v30, %v285_v30  ;;  %219 = vst [vmem:[%s435_s2 + $0x18] sm:$0xff] %v291_v31  ;;  %v227_v39 = vmul.f32 %v291_v31, %v291_v31 }
  0xfd   :  { %v228_v36 = vadd.f32 %v225_v35, %v224_v32  ;;  %v221_v37 = vadd.f32 %v288_v26, %v220_v34 }
  0xff   :  { %v222_v38 = vadd.f32 %v291_v31, %v221_v37  ;;  %v229_v40 = vadd.f32 %v228_v36, %v226_v33 }
 0x101   :  { %223 = vst [vmem:[%s436_s3] sm:$0xff] %v222_v38  ;;  %v230_v41 = vadd.f32 %v229_v40, %v227_v39 }
 0x103   :  { %231 = vst [vmem:[%s437_s4] sm:$0xff] %v230_v41 }

// kernel: tile.38
= control target key start
LH: loop header
LB: loop body
LE: loop exit
PB: predicated region body
PF: predicated region fallthrough
CT: control target
= control target key end

     0   :  { %s22_s0 = inlined_call_operand.vmem [shape: f32[32], index: 0, kind: input, shape index: {}]   ;;  %s23_s1 = inlined_call_operand.vmem [shape: f32[4,32], index: 1, kind: output, shape index: {}]  }
   0x1   :  { %v4_v0 = vld [vmem:[%s22_s0] ss:$0 sm:$0xff] }
   0x2   :  { %5 = vst [vmem:[%s23_s1] sm:$0xf] %v4_v0 }

// kernel: generator_forward.11
= control target key start
LH: loop header
LB: loop body
LE: loop exit
PB: predicated region body
PF: predicated region fallthrough
CT: control target
= control target key end

     0   :  { %s957_s1 = inlined_call_operand.vmem [shape: bf16[640,128], index: 1, kind: input, shape index: {}]   ;;  %s958_s0 = inlined_call_operand.vmem [shape: bf16[32,640], index: 0, kind: input, shape index: {}]   ;;  %s959_s2 = inlined_call_operand.vmem [shape: f32[32,128], index: 2, kind: output, shape index: {0}]   ;;  %s960_s3 = inlined_call_operand.vmem [shape: f32[8,128], index: 3, kind: output, shape index: {1}]   ;;  %s961_s4 = inlined_call_operand.vmem [shape: f32[8,128], index: 4, kind: output, shape index: {2}]  }
   0x1   :  { %v710_v0 = vld [vmem:[%s957_s1 + $0x40] sm:$0xff]   ;;  %v714_v4 = vld [vmem:[%s957_s1 + $0x48] sm:$0xff]   ;;  %v718_v8 = vld [vmem:[%s957_s1 + $0x50] sm:$0xff]  }
   0x2   :  { %v711_v1 = vld [vmem:[%s957_s1 + $0xc0] sm:$0xff]   ;;  %624 = vmatprep.subr.bf16.mxu0 %v710_v0  ;;  %v715_v5 = vld [vmem:[%s957_s1 + $0xc8] sm:$0xff]   ;;  %v719_v9 = vld [vmem:[%s957_s1 + $0xd0] sm:$0xff]  }
   0x3   :  { %v712_v2 = vld [vmem:[%s957_s1] sm:$0xff]   ;;  %652 = vmatprep.subr.bf16.mxu1 %v711_v1  ;;  %v716_v6 = vld [vmem:[%s957_s1 + $0x8] sm:$0xff]   ;;  %v720_v10 = vld [vmem:[%s957_s1 + $0x10] sm:$0xff]  }
   0x4   :  { %v713_v3 = vld [vmem:[%s957_s1 + $0x80] sm:$0xff]   ;;  %625 = vmatpush3.bf16.msra.mxu0 %v712_v2  ;;  %v717_v7 = vld [vmem:[%s957_s1 + $0x88] sm:$0xff]   ;;  %v721_v11 = vld [vmem:[%s957_s1 + $0x90] sm:$0xff]  }
   0x5   :  { %653 = vmatpush3.bf16.msra.mxu1 %v713_v3  ;;  %626 = vmatprep.subr.bf16.mxu0 %v714_v4  ;;  %v722_v12 = vld [vmem:[%s957_s1 + $0x58] sm:$0xff]   ;;  %v726_v16 = vld [vmem:[%s957_s1 + $0x60] sm:$0xff]   ;;  %v730_v20 = vld [vmem:[%s957_s1 + $0x68] sm:$0xff]  }
   0x6   :  { %654 = vmatprep.subr.bf16.mxu1 %v715_v5  ;;  %v723_v13 = vld [vmem:[%s957_s1 + $0xd8] sm:$0xff]   ;;  %v727_v17 = vld [vmem:[%s957_s1 + $0xe0] sm:$0xff]   ;;  %v731_v21 = vld [vmem:[%s957_s1 + $0xe8] sm:$0xff]  }
   0x7   :  { %v724_v14 = vld [vmem:[%s957_s1 + $0x18] sm:$0xff]   ;;  %v728_v18 = vld [vmem:[%s957_s1 + $0x20] sm:$0xff]   ;;  %v732_v22 = vld [vmem:[%s957_s1 + $0x28] sm:$0xff]  }
   0x8   :  { %627 = vmatpush3.bf16.msra.mxu0 %v716_v6  ;;  %v725_v15 = vld [vmem:[%s957_s1 + $0x98] sm:$0xff]   ;;  %v729_v19 = vld [vmem:[%s957_s1 + $0xa0] sm:$0xff]   ;;  %v733_v23 = vld [vmem:[%s957_s1 + $0xa8] sm:$0xff]  }
   0x9   :  { %655 = vmatpush3.bf16.msra.mxu1 %v717_v7  ;;  %628 = vmatprep.subr.bf16.mxu0 %v718_v8  ;;  %v734_v24 = vld [vmem:[%s957_s1 + $0x70] sm:$0xff]   ;;  %v738_v28 = vld [vmem:[%s957_s1 + $0x78] sm:$0xff]   ;;  %v747_v35 = vld [vmem:[%s958_s0 + $0xc] ss:$20 sps:$4 sm:$0xff]  }
   0xa   :  { %656 = vmatprep.subr.bf16.mxu1 %v719_v9  ;;  %v735_v25 = vld [vmem:[%s957_s1 + $0xf0] sm:$0xff]   ;;  %v739_v29 = vld [vmem:[%s957_s1 + $0xf8] sm:$0xff]   ;;  %v748_v36 = vld [vmem:[%s957_s1 + $0x100] sm:$0xff]   ;;  %480 = vmatprep.mubr.bf16.mxu1 %v747_v35 }
   0xb   :  { %v736_v26 = vld [vmem:[%s957_s1 + $0x30] sm:$0xff]   ;;  %v740_v30 = vld [vmem:[%s957_s1 + $0x38] sm:$0xff]   ;;  %v749_v37 = vld [vmem:[%s957_s1 + $0x108] sm:$0xff]  }
   0xc   :  { %629 = vmatpush3.bf16.msra.mxu0 %v720_v10  ;;  %v737_v27 = vld [vmem:[%s957_s1 + $0xb0] sm:$0xff]   ;;  %v741_v31 = vld [vmem:[%s957_s1 + $0xb8] sm:$0xff]   ;;  %v753_v39 = vld [vmem:[%s958_s0 + $0x2c] ss:$20 sps:$4 sm:$0xff]  }
   0xd   :  { %657 = vmatpush3.bf16.msra.mxu1 %v721_v11  ;;  %630 = vmatprep.subr.bf16.mxu0 %v722_v12  ;;  %v742_v32 = vld [vmem:[%s958_s0] ss:$20 sps:$4 sm:$0xff]   ;;  %v744_v33 = vld [vmem:[%s958_s0 + $0x4] ss:$20 sps:$4 sm:$0xff]   ;;  %v745_v34 = vld [vmem:[%s958_s0 + $0x8] ss:$20 sps:$4 sm:$0xff]  }
   0xe   :  { %658 = vmatprep.subr.bf16.mxu1 %v723_v13  ;;  %431 = vmatprep.mubr.bf16.mxu0 %v744_v33  ;;  %v750_v38 = vld [vmem:[%s957_s1 + $0x110] sm:$0xff]   ;;  %v751_v41 = vld [vmem:[%s957_s1 + $0x118] sm:$0xff]   ;;  %v752_v45 = vld [vmem:[%s957_s1 + $0x120] sm:$0xff]  }
   0xf   :  { %v755_v40 = vld [vmem:[%s958_s0 + $0x34] ss:$20 sps:$4 sm:$0xff]   ;;  %v759_v43 = vld [vmem:[%s958_s0 + $0x30] ss:$20 sps:$4 sm:$0xff]   ;;  %v761_v48 = vld [vmem:[%s957_s1 + $0x138] sm:$0xff]  }
  0x10   :  { %631 = vmatpush3.bf16.msra.mxu0 %v724_v14  ;;  %v758_v42 = vld [vmem:[%s958_s0 + $0x28] ss:$20 sps:$4 sm:$0xff]   ;;  %v762_v44 = vld [vmem:[%s958_s0 + $0x10] ss:$20 sps:$4 sm:$0xff]   ;;  %v763_v49 = vld [vmem:[%s958_s0 + $0x38] ss:$20 sps:$4 sm:$0xff]  }
  0x11   :  { %659 = vmatpush3.bf16.msra.mxu1 %v725_v15  ;;  %632 = vmatprep.subr.bf16.mxu0 %v726_v16  ;;  %v757_v46 = vld [vmem:[%s957_s1 + $0x128] sm:$0xff]   ;;  %v760_v47 = vld [vmem:[%s957_s1 + $0x130] sm:$0xff]  }
  0x12   :  { %660 = vmatprep.subr.bf16.mxu1 %v727_v17 }
  0x14   :  { %633 = vmatpush3.bf16.msra.mxu0 %v728_v18 }
  0x15   :  { %661 = vmatpush3.bf16.msra.mxu1 %v729_v19  ;;  %634 = vmatprep.subr.bf16.mxu0 %v730_v20 }
  0x16   :  { %662 = vmatprep.subr.bf16.mxu1 %v731_v21 }
  0x18   :  { %635 = vmatpush3.bf16.msra.mxu0 %v732_v22 }
  0x19   :  { %663 = vmatpush3.bf16.msra.mxu1 %v733_v23  ;;  %636 = vmatprep.subr.bf16.mxu0 %v734_v24 }
  0x1a   :  { %664 = vmatprep.subr.bf16.mxu1 %v735_v25 }
  0x1c   :  { %637 = vmatpush3.bf16.msra.mxu0 %v736_v26 }
  0x1d   :  { %665 = vmatpush3.bf16.msra.mxu1 %v737_v27  ;;  %638 = vmatprep.subr.bf16.mxu0 %v738_v28 }
  0x1e   :  { %666 = vmatprep.subr.bf16.mxu1 %v739_v29 }
  0x20   :  { %639 = vmatpush3.bf16.msra.mxu0 %v740_v30 }
  0x21   :  { %667 = vmatpush3.bf16.msra.mxu1 %v741_v31  ;;  %690 = vmatprep.subr.bf16.mxu0 %v748_v36 }
  0x23   :  { %432 = vmatmul.mubr.bf16.vlgmr.msra.gmra.mrb[0].mxu0 %v742_v32 }
  0x24   :  { %481 = vmatmul.mubr.bf16.vlgmr.msra.gmra.mrb[0].mxu1 %v745_v34  ;;  %691 = vmatpush3.bf16.msra.mxu0 %v748_v36 }
  0x25   :  { %692 = vmatprep.subr.bf16.mxu0 %v749_v37  ;;  %439 = vmatprep.mubr.bf16.mxu0 %v753_v39 }
  0x26   :  { %488 = vmatprep.mubr.bf16.mxu1 %v755_v40 }
  0x28   :  { %693 = vmatpush3.bf16.msra.mxu0 %v749_v37 }
  0x29   :  { %694 = vmatprep.subr.bf16.mxu0 %v750_v38 }
  0x2b   :  { %440 = vmatmul.mubr.bf16.gmra.mrb[4].mxu0 %v758_v42 }
  0x2c   :  { %489 = vmatmul.mubr.bf16.gmra.mrb[4].mxu1 %v759_v43  ;;  %695 = vmatpush3.bf16.msra.mxu0 %v750_v38 }
  0x2d   :  { %696 = vmatprep.subr.bf16.mxu0 %v751_v41  ;;  %706 = vmatprep.mubr.bf16.mxu0 %v762_v44 }
  0x30   :  { %697 = vmatpush3.bf16.msra.mxu0 %v751_v41 }
  0x31   :  { %698 = vmatprep.subr.bf16.mxu0 %v752_v45 }
  0x34   :  { %699 = vmatpush3.bf16.msra.mxu0 %v752_v45 }
  0x35   :  { %700 = vmatprep.subr.bf16.mxu0 %v757_v46 }
  0x38   :  { %701 = vmatpush3.bf16.msra.mxu0 %v757_v46 }
  0x39   :  { %702 = vmatprep.subr.bf16.mxu0 %v760_v47 }
  0x3c   :  { %703 = vmatpush3.bf16.msra.mxu0 %v760_v47 }
  0x3d   :  { %704 = vmatprep.subr.bf16.mxu0 %v761_v48 }
  0x40   :  { %705 = vmatpush3.bf16.msra.mxu0 %v761_v48 }
  0x43   :  { %707 = vmatmul.mubr.bf16.vlgmr.msra.gmra.mrb[8].mxu0 %v763_v49 }
  0xf6   :  { %v640_v50 = vpop.f32.mrb[0].mxu0 }
  0xf7   :  { %v668_v51 = vpop.f32.mrb[0].mxu1  ;;  %v641_v52 = vpop.f32.mrb[1].mxu0 }
  0xf8   :  { %v642_v53 = vadd.f32 %v641_v52, %v640_v50  ;;  %v669_v54 = vpop.f32.mrb[1].mxu1  ;;  %v643_v55 = vpop.f32.mrb[2].mxu0 }
  0xf9   :  { %v670_v56 = vadd.f32 %v669_v54, %v668_v51  ;;  %v671_v57 = vpop.f32.mrb[2].mxu1  ;;  %v644_v58 = vpop.f32.mrb[3].mxu0 }
  0xfa   :  { %v645_v59 = vadd.f32 %v644_v58, %v643_v55  ;;  %v672_v60 = vpop.f32.mrb[3].mxu1 }
  0xfb   :  { %v673_v61 = vadd.f32 %v672_v60, %v671_v57  ;;  %v483_v62 = vadd.f32 %v670_v56, %v642_v53 }
  0xfd   :  { %v486_v63 = vadd.f32 %v673_v61, %v645_v59 }
  0xfe   :  { %v646_v0 = vpop.f32.mrb[4].mxu0 }
  0xff   :  { %v674_v1 = vpop.f32.mrb[4].mxu1  ;;  %v647_v2 = vpop.f32.mrb[5].mxu0 }
 0x100   :  { %v648_v3 = vadd.f32 %v647_v2, %v646_v0  ;;  %v675_v4 = vpop.f32.mrb[5].mxu1  ;;  %v649_v5 = vpop.f32.mrb[6].mxu0 }
 0x101   :  { %v676_v6 = vadd.f32 %v675_v4, %v674_v1  ;;  %v677_v7 = vpop.f32.mrb[6].mxu1  ;;  %v650_v8 = vpop.f32.mrb[7].mxu0 }
 0x102   :  { %v651_v9 = vadd.f32 %v650_v8, %v649_v5  ;;  %v678_v10 = vpop.f32.mrb[7].mxu1 }
 0x103   :  { %v679_v11 = vadd.f32 %v678_v10, %v677_v7  ;;  %v491_v12 = vadd.f32 %v676_v6, %v648_v3 }
 0x105   :  { %v494_v13 = vadd.f32 %v679_v11, %v651_v9 }
 0x116   :  { %v708_v14 = vpop.f32.mrb[8].mxu0 }
 0x117   :  { %v540_v15 = vadd.f32 %v708_v14, %v491_v12  ;;  %v531_v16 = vpop.f32.mrb[9].mxu0 }
 0x118   :  { %v532_v17 = vadd.f32 %v531_v16, %v483_v62  ;;  %v709_v18 = vpop.f32.mrb[10].mxu0 }
 0x119   :  { %548 = vst [vmem:[%s959_s2 + $0x10] sm:$0xff] %v540_v15  ;;  %v543_v19 = vadd.f32 %v709_v18, %v494_v13  ;;  %v534_v20 = vpop.f32.mrb[11].mxu0  ;;  %v556_v25 = vmul.f32 %v540_v15, %v540_v15 }
 0x11a   :  { %546 = vst [vmem:[%s959_s2] sm:$0xff] %v532_v17  ;;  %v535_v21 = vadd.f32 %v534_v20, %v486_v63  ;;  %v554_v22 = vmul.f32 %v532_v17, %v532_v17 }
 0x11b   :  { %549 = vst [vmem:[%s959_s2 + $0x18] sm:$0xff] %v543_v19  ;;  %v557_v28 = vmul.f32 %v543_v19, %v543_v19 }
 0x11c   :  { %547 = vst [vmem:[%s959_s2 + $0x8] sm:$0xff] %v535_v21  ;;  %v550_v23 = vadd.f32 %v535_v21, %v532_v17  ;;  %v555_v24 = vmul.f32 %v535_v21, %v535_v21 }
 0x11e   :  { %v551_v26 = vadd.f32 %v550_v23, %v540_v15  ;;  %v558_v27 = vadd.f32 %v555_v24, %v554_v22 }
 0x120   :  { %v552_v29 = vadd.f32 %v551_v26, %v543_v19  ;;  %v559_v30 = vadd.f32 %v558_v27, %v556_v25 }
 0x122   :  { %553 = vst [vmem:[%s960_s3] sm:$0xff] %v552_v29  ;;  %v560_v31 = vadd.f32 %v559_v30, %v557_v28 }
 0x124   :  { %561 = vst [vmem:[%s961_s4] sm:$0xff] %v560_v31 }

// kernel: tile.48
= control target key start
LH: loop header
LB: loop body
LE: loop exit
PB: predicated region body
PF: predicated region fallthrough
CT: control target
= control target key end

     0   :  { %s22_s0 = inlined_call_operand.vmem [shape: f32[16], index: 0, kind: input, shape index: {}]   ;;  %s23_s1 = inlined_call_operand.vmem [shape: f32[4,16], index: 1, kind: output, shape index: {}]  }
   0x1   :  { %v4_v0 = vld [vmem:[%s22_s0] ss:$0 sm:$0xff] }
   0x2   :  { %5 = vst [vmem:[%s23_s1] sm:$0xf] %v4_v0 }

// kernel: generator_forward.13
= control target key start
LH: loop header
LB: loop body
LE: loop exit
PB: predicated region body
PF: predicated region fallthrough
CT: control target
= control target key end

     0   :  { %s1082_s1 = inlined_call_operand.vmem [shape: bf16[384,128], index: 1, kind: input, shape index: {}]   ;;  %s1083_s0 = inlined_call_operand.vmem [shape: bf16[128,384], index: 0, kind: input, shape index: {}]   ;;  %s1084_s2 = inlined_call_operand.vmem [shape: f32[128,128], index: 2, kind: output, shape index: {0}]   ;;  %s1085_s3 = inlined_call_operand.vmem [shape: f32[8,128], index: 3, kind: output, shape index: {1}]   ;;  %s1086_s4 = inlined_call_operand.vmem [shape: f32[8,128], index: 4, kind: output, shape index: {2}]  }
   0x1   :  { %v797_v0 = vld [vmem:[%s1082_s1 + $0x40] sm:$0xff]   ;;  %v800_v3 = vld [vmem:[%s1082_s1 + $0x48] sm:$0xff]   ;;  %v803_v6 = vld [vmem:[%s1082_s1 + $0x50] sm:$0xff]  }
   0x2   :  { %v798_v1 = vld [vmem:[%s1082_s1] sm:$0xff]   ;;  %685 = vmatprep.subr.bf16.mxu0 %v797_v0  ;;  %v801_v4 = vld [vmem:[%s1082_s1 + $0x8] sm:$0xff]   ;;  %v804_v7 = vld [vmem:[%s1082_s1 + $0x10] sm:$0xff]  }
   0x3   :  { %v799_v2 = vld [vmem:[%s1082_s1 + $0x80] sm:$0xff]   ;;  %686 = vmatpush3.bf16.msra.mxu0 %v798_v1  ;;  %v802_v5 = vld [vmem:[%s1082_s1 + $0x88] sm:$0xff]   ;;  %v805_v8 = vld [vmem:[%s1082_s1 + $0x90] sm:$0xff]  }
   0x4   :  { %765 = vmatprep.subr.bf16.mxu1 %v799_v2  ;;  %687 = vmatprep.subr.bf16.mxu0 %v800_v3  ;;  %v806_v9 = vld [vmem:[%s1082_s1 + $0x58] sm:$0xff]   ;;  %v809_v12 = vld [vmem:[%s1082_s1 + $0x60] sm:$0xff]   ;;  %v812_v15 = vld [vmem:[%s1082_s1 + $0x68] sm:$0xff]  }
   0x5   :  { %766 = vmatpush3.bf16.msra.mxu1 %v799_v2  ;;  %v807_v10 = vld [vmem:[%s1082_s1 + $0x18] sm:$0xff]   ;;  %v811_v13 = vld [vmem:[%s1082_s1 + $0xa0] sm:$0xff]   ;;  %v814_v16 = vld [vmem:[%s1082_s1 + $0xa8] sm:$0xff]  }
   0x6   :  { %767 = vmatprep.subr.bf16.mxu1 %v802_v5  ;;  %v808_v11 = vld [vmem:[%s1082_s1 + $0x98] sm:$0xff]   ;;  %v810_v14 = vld [vmem:[%s1082_s1 + $0x20] sm:$0xff]   ;;  %v813_v17 = vld [vmem:[%s1082_s1 + $0x28] sm:$0xff]  }
   0x7   :  { %688 = vmatpush3.bf16.msra.mxu0 %v801_v4  ;;  %v815_v18 = vld [vmem:[%s1082_s1 + $0x70] sm:$0xff]   ;;  %v818_v21 = vld [vmem:[%s1082_s1 + $0x78] sm:$0xff]   ;;  %v821_v26 = vld [vmem:[%s1083_s0] ss:$12 sps:$4 sm:$0xff]  }
   0x8   :  { %689 = vmatprep.subr.bf16.mxu0 %v803_v6  ;;  %v816_v19 = vld [vmem:[%s1082_s1 + $0x30] sm:$0xff]   ;;  %v820_v22 = vld [vmem:[%s1082_s1 + $0xb8] sm:$0xff]   ;;  %v825_v28 = vld [vmem:[%s1083_s0 + $0x20] ss:$12 sps:$4 sm:$0xff]  }
   0x9   :  { %768 = vmatpush3.bf16.msra.mxu1 %v802_v5  ;;  %v817_v20 = vld [vmem:[%s1082_s1 + $0xb0] sm:$0xff]   ;;  %v819_v25 = vld [vmem:[%s1082_s1 + $0x38] sm:$0xff]   ;;  %v841_v36 = vld [vmem:[%s1083_s0 + $0x80] ss:$12 sps:$4 sm:$0xff]  }
   0xa   :  { %769 = vmatprep.subr.bf16.mxu1 %v805_v8  ;;  %v823_v23 = vld [vmem:[%s1083_s0 + $0x4] ss:$12 sps:$4 sm:$0xff]   ;;  %v824_v24 = vld [vmem:[%s1083_s0 + $0x8] ss:$12 sps:$4 sm:$0xff]   ;;  %v834_v35 = vld [vmem:[%s1083_s0 + $0x4c] ss:$12 sps:$4 sm:$0xff]  }
   0xb   :  { %690 = vmatpush3.bf16.msra.mxu0 %v804_v7  ;;  %399 = vmatprep.mubr.bf16.mxu0 %v823_v23  ;;  %v826_v27 = vld [vmem:[%s1083_s0 + $0x1c] ss:$12 sps:$4 sm:$0xff]   ;;  %v832_v29 = vld [vmem:[%s1083_s0 + $0x38] ss:$12 sps:$4 sm:$0xff]   ;;  %v829_v31 = vld [vmem:[%s1083_s0 + $0x34] ss:$12 sps:$4 sm:$0xff]  }
   0xc   :  { %691 = vmatprep.subr.bf16.mxu0 %v806_v9  ;;  %781 = vmatprep.mubr.bf16.mxu1 %v824_v24  ;;  %v828_v30 = vld [vmem:[%s1083_s0 + $0x18] ss:$12 sps:$4 sm:$0xff]   ;;  %v833_v32 = vld [vmem:[%s1083_s0 + $0x50] ss:$12 sps:$4 sm:$0xff]   ;;  %v840_v33 = vld [vmem:[%s1083_s0 + $0x68] ss:$12 sps:$4 sm:$0xff]  }
   0xd   :  { %770 = vmatpush3.bf16.msra.mxu1 %v805_v8  ;;  %v831_v34 = vld [vmem:[%s1083_s0 + $0x30] ss:$12 sps:$4 sm:$0xff]   ;;  %v848_v37 = vld [vmem:[%s1083_s0 + $0x98] ss:$12 sps:$4 sm:$0xff]   ;;  %v836_v38 = vld [vmem:[%s1083_s0 + $0x48] ss:$12 sps:$4 sm:$0xff]  }
   0xe   :  { %771 = vmatprep.subr.bf16.mxu1 %v808_v11  ;;  %v837_v39 = vld [vmem:[%s1083_s0 + $0x64] ss:$12 sps:$4 sm:$0xff]   ;;  %v839_v41 = vld [vmem:[%s1083_s0 + $0x60] ss:$12 sps:$4 sm:$0xff]   ;;  %v842_v42 = vld [vmem:[%s1083_s0 + $0x7c] ss:$12 sps:$4 sm:$0xff]  }
   0xf   :  { %692 = vmatpush3.bf16.msra.mxu0 %v807_v10  ;;  %v849_v40 = vld [vmem:[%s1083_s0 + $0xb0] ss:$12 sps:$4 sm:$0xff]   ;;  %v844_v43 = vld [vmem:[%s1083_s0 + $0x78] ss:$12 sps:$4 sm:$0xff]   ;;  %v845_v44 = vld [vmem:[%s1083_s0 + $0x94] ss:$12 sps:$4 sm:$0xff]  }
  0x10   :  { %693 = vmatprep.subr.bf16.mxu0 %v809_v12  ;;  %v847_v45 = vld [vmem:[%s1083_s0 + $0x90] ss:$12 sps:$4 sm:$0xff]   ;;  %v850_v46 = vld [vmem:[%s1083_s0 + $0xac] ss:$12 sps:$4 sm:$0xff]   ;;  %v852_v47 = vld [vmem:[%s1083_s0 + $0xa8] ss:$12 sps:$4 sm:$0xff]  }
  0x11   :  { %772 = vmatpush3.bf16.msra.mxu1 %v808_v11 }
  0x12   :  { %773 = vmatprep.subr.bf16.mxu1 %v811_v13 }
  0x13   :  { %694 = vmatpush3.bf16.msra.mxu0 %v810_v14 }
  0x14   :  { %695 = vmatprep.subr.bf16.mxu0 %v812_v15 }
  0x15   :  { %774 = vmatpush3.bf16.msra.mxu1 %v811_v13 }
  0x16   :  { %775 = vmatprep.subr.bf16.mxu1 %v814_v16 }
  0x17   :  { %696 = vmatpush3.bf16.msra.mxu0 %v813_v17 }
  0x18   :  { %697 = vmatprep.subr.bf16.mxu0 %v815_v18 }
  0x19   :  { %776 = vmatpush3.bf16.msra.mxu1 %v814_v16 }
  0x1a   :  { %777 = vmatprep.subr.bf16.mxu1 %v817_v20 }
  0x1b   :  { %698 = vmatpush3.bf16.msra.mxu0 %v816_v19 }
  0x1c   :  { %699 = vmatprep.subr.bf16.mxu0 %v818_v21 }
  0x1d   :  { %778 = vmatpush3.bf16.msra.mxu1 %v817_v20 }
  0x1e   :  { %779 = vmatprep.subr.bf16.mxu1 %v820_v22 }
  0x1f   :  { %700 = vmatpush3.bf16.msra.mxu0 %v819_v25 }
  0x21   :  { %780 = vmatpush3.bf16.msra.mxu1 %v820_v22 }
  0x22   :  { %400 = vmatmul.mubr.bf16.vlgmr.msra.gmra.mrb[0].mxu0 %v821_v26 }
  0x23   :  { %407 = vmatprep.mubr.bf16.mxu0 %v826_v27 }
  0x24   :  { %782 = vmatmul.mubr.bf16.vlgmr.msra.gmra.mrb[0].mxu1 %v825_v28 }
  0x25   :  { %785 = vmatprep.mubr.bf16.mxu1 %v832_v29 }
  0x2a   :  { %408 = vmatmul.mubr.bf16.gmra.mrb[4].mxu0 %v828_v30 }
  0x2b   :  { %415 = vmatprep.mubr.bf16.mxu0 %v829_v31 }
  0x2c   :  { %786 = vmatmul.mubr.bf16.gmra.mrb[4].mxu1 %v833_v32 }
  0x2d   :  { %789 = vmatprep.mubr.bf16.mxu1 %v840_v33 }
  0x32   :  { %416 = vmatmul.mubr.bf16.gmra.mrb[8].mxu0 %v831_v34 }
  0x33   :  { %423 = vmatprep.mubr.bf16.mxu0 %v834_v35 }
  0x34   :  { %790 = vmatmul.mubr.bf16.gmra.mrb[8].mxu1 %v841_v36 }
  0x35   :  { %793 = vmatprep.mubr.bf16.mxu1 %v848_v37 }
  0x3a   :  { %424 = vmatmul.mubr.bf16.gmra.mrb[12].mxu0 %v836_v38 }
  0x3b   :  { %431 = vmatprep.mubr.bf16.mxu0 %v837_v39 }
  0x3c   :  { %794 = vmatmul.mubr.bf16.gmra.mrb[12].mxu1 %v849_v40 }
  0x42   :  { %432 = vmatmul.mubr.bf16.gmra.mrb[16].mxu0 %v839_v41 }
  0x43   :  { %439 = vmatprep.mubr.bf16.mxu0 %v842_v42 }
  0x4a   :  { %440 = vmatmul.mubr.bf16.gmra.mrb[20].mxu0 %v844_v43 }
  0x4b   :  { %447 = vmatprep.mubr.bf16.mxu0 %v845_v44 }
  0x52   :  { %448 = vmatmul.mubr.bf16.gmra.mrb[24].mxu0 %v847_v45 }
  0x53   :  { %455 = vmatprep.mubr.bf16.mxu0 %v850_v46 }
  0x5a   :  { %456 = vmatmul.mubr.bf16.gmra.mrb[28].mxu0 %v852_v47 }
  0xf5   :  { %v701_v48 = vpop.f32.mrb[0].mxu0 }
  0xf6   :  { %v702_v49 = vpop.f32.mrb[1].mxu0 }
  0xf7   :  { %v703_v50 = vadd.f32 %v702_v49, %v701_v48  ;;  %v704_v51 = vpop.f32.mrb[2].mxu0  ;;  %v783_v52 = vpop.f32.mrb[0].mxu1 }
  0xf8   :  { %v705_v53 = vpop.f32.mrb[3].mxu0  ;;  %v498_v54 = vpop.f32.mrb[1].mxu1 }
  0xf9   :  { %v706_v55 = vadd.f32 %v705_v53, %v704_v51  ;;  %v499_v56 = vadd.f32 %v703_v50, %v498_v54  ;;  %v784_v57 = vpop.f32.mrb[2].mxu1 }
  0xfa   :  { %v501_v58 = vpop.f32.mrb[3].mxu1 }
  0xfb   :  { %561 = vst [vmem:[%s1084_s2] sm:$0xff] %v499_v56  ;;  %v502_v59 = vadd.f32 %v706_v55, %v501_v58  ;;  %v593_v60 = vmul.f32 %v499_v56, %v499_v56 }
  0xfd   :  { %562 = vst [vmem:[%s1084_s2 + $0x8] sm:$0xff] %v502_v59  ;;  %v577_v61 = vadd.f32 %v502_v59, %v499_v56  ;;  %v594_v62 = vmul.f32 %v502_v59, %v502_v59  ;;  %v707_v63 = vpop.f32.mrb[4].mxu0 }
  0xfe   :  { %v708_v0 = vpop.f32.mrb[5].mxu0 }
  0xff   :  { %v609_v1 = vadd.f32 %v594_v62, %v593_v60  ;;  %v709_v2 = vadd.f32 %v708_v0, %v707_v63  ;;  %v710_v3 = vpop.f32.mrb[6].mxu0  ;;  %v787_v4 = vpop.f32.mrb[4].mxu1 }
 0x100   :  { %v711_v5 = vpop.f32.mrb[7].mxu0  ;;  %v514_v6 = vpop.f32.mrb[5].mxu1 }
 0x101   :  { %v507_v7 = vadd.f32 %v783_v52, %v709_v2  ;;  %v712_v8 = vadd.f32 %v711_v5, %v710_v3  ;;  %v788_v9 = vpop.f32.mrb[6].mxu1 }
 0x102   :  { %v517_v10 = vpop.f32.mrb[7].mxu1 }
 0x103   :  { %563 = vst [vmem:[%s1084_s2 + $0x10] sm:$0xff] %v507_v7  ;;  %v578_v11 = vadd.f32 %v577_v61, %v507_v7  ;;  %v595_v12 = vmul.f32 %v507_v7, %v507_v7  ;;  %v510_v13 = vadd.f32 %v784_v57, %v712_v8 }
 0x105   :  { %v610_v14 = vadd.f32 %v609_v1, %v595_v12  ;;  %564 = vst [vmem:[%s1084_s2 + $0x18] sm:$0xff] %v510_v13  ;;  %v596_v15 = vmul.f32 %v510_v13, %v510_v13  ;;  %v713_v16 = vpop.f32.mrb[8].mxu0  ;;  %v579_v17 = vadd.f32 %v578_v11, %v510_v13 }
 0x106   :  { %v714_v18 = vpop.f32.mrb[9].mxu0 }
 0x107   :  { %v715_v19 = vadd.f32 %v714_v18, %v713_v16  ;;  %v716_v20 = vpop.f32.mrb[10].mxu0  ;;  %v611_v21 = vadd.f32 %v610_v14, %v596_v15  ;;  %v791_v22 = vpop.f32.mrb[8].mxu1 }
 0x108   :  { %v717_v23 = vpop.f32.mrb[11].mxu0  ;;  %v530_v24 = vpop.f32.mrb[9].mxu1 }
 0x109   :  { %v718_v25 = vadd.f32 %v717_v23, %v716_v20  ;;  %v515_v26 = vadd.f32 %v715_v19, %v514_v6  ;;  %v792_v27 = vpop.f32.mrb[10].mxu1 }
 0x10a   :  { %v533_v28 = vpop.f32.mrb[11].mxu1 }
 0x10b   :  { %565 = vst [vmem:[%s1084_s2 + $0x20] sm:$0xff] %v515_v26  ;;  %v580_v29 = vadd.f32 %v579_v17, %v515_v26  ;;  %v597_v30 = vmul.f32 %v515_v26, %v515_v26  ;;  %v518_v31 = vadd.f32 %v718_v25, %v517_v10 }
 0x10d   :  { %v612_v32 = vadd.f32 %v611_v21, %v597_v30  ;;  %566 = vst [vmem:[%s1084_s2 + $0x28] sm:$0xff] %v518_v31  ;;  %v581_v33 = vadd.f32 %v580_v29, %v518_v31  ;;  %v598_v34 = vmul.f32 %v518_v31, %v518_v31  ;;  %v719_v35 = vpop.f32.mrb[12].mxu0 }
 0x10e   :  { %v720_v36 = vpop.f32.mrb[13].mxu0 }
 0x10f   :  { %v613_v37 = vadd.f32 %v612_v32, %v598_v34  ;;  %v721_v38 = vadd.f32 %v720_v36, %v719_v35  ;;  %v722_v39 = vpop.f32.mrb[14].mxu0  ;;  %v1040_v40 = vpop.f32.mrb[12].mxu1 }
 0x110   :  { %v723_v41 = vpop.f32.mrb[15].mxu0  ;;  %v546_v42 = vpop.f32.mrb[13].mxu1 }
 0x111   :  { %v523_v43 = vadd.f32 %v787_v4, %v721_v38  ;;  %v724_v44 = vadd.f32 %v723_v41, %v722_v39  ;;  %v1042_v45 = vpop.f32.mrb[14].mxu1 }
 0x112   :  { %v549_v46 = vpop.f32.mrb[15].mxu1 }
 0x113   :  { %567 = vst [vmem:[%s1084_s2 + $0x30] sm:$0xff] %v523_v43  ;;  %v582_v47 = vadd.f32 %v581_v33, %v523_v43  ;;  %v599_v48 = vmul.f32 %v523_v43, %v523_v43  ;;  %v526_v49 = vadd.f32 %v788_v9, %v724_v44 }
 0x115   :  { %v614_v50 = vadd.f32 %v613_v37, %v599_v48  ;;  %568 = vst [vmem:[%s1084_s2 + $0x38] sm:$0xff] %v526_v49  ;;  %v600_v51 = vmul.f32 %v526_v49, %v526_v49  ;;  %v725_v52 = vpop.f32.mrb[16].mxu0  ;;  %v583_v53 = vadd.f32 %v582_v47, %v526_v49 }
 0x116   :  { %v726_v54 = vpop.f32.mrb[17].mxu0 }
 0x117   :  { %v727_v55 = vadd.f32 %v726_v54, %v725_v52  ;;  %v728_v56 = vpop.f32.mrb[18].mxu0  ;;  %v615_v57 = vadd.f32 %v614_v50, %v600_v51 }
 0x118   :  { %v729_v58 = vpop.f32.mrb[19].mxu0 }
 0x119   :  { %v730_v59 = vadd.f32 %v729_v58, %v728_v56  ;;  %v531_v60 = vadd.f32 %v727_v55, %v530_v24 }
 0x11b   :  { %569 = vst [vmem:[%s1084_s2 + $0x40] sm:$0xff] %v531_v60  ;;  %v584_v61 = vadd.f32 %v583_v53, %v531_v60  ;;  %v601_v62 = vmul.f32 %v531_v60, %v531_v60  ;;  %v534_v63 = vadd.f32 %v730_v59, %v533_v28 }
 0x11d   :  { %v616_v0 = vadd.f32 %v615_v57, %v601_v62  ;;  %570 = vst [vmem:[%s1084_s2 + $0x48] sm:$0xff] %v534_v63  ;;  %v585_v1 = vadd.f32 %v584_v61, %v534_v63  ;;  %v602_v2 = vmul.f32 %v534_v63, %v534_v63  ;;  %v731_v3 = vpop.f32.mrb[20].mxu0 }
 0x11e   :  { %v732_v4 = vpop.f32.mrb[21].mxu0 }
 0x11f   :  { %v617_v5 = vadd.f32 %v616_v0, %v602_v2  ;;  %v733_v6 = vadd.f32 %v732_v4, %v731_v3  ;;  %v734_v7 = vpop.f32.mrb[22].mxu0 }
 0x120   :  { %v735_v8 = vpop.f32.mrb[23].mxu0 }
 0x121   :  { %v539_v9 = vadd.f32 %v791_v22, %v733_v6  ;;  %v736_v10 = vadd.f32 %v735_v8, %v734_v7 }
 0x123   :  { %571 = vst [vmem:[%s1084_s2 + $0x50] sm:$0xff] %v539_v9  ;;  %v586_v11 = vadd.f32 %v585_v1, %v539_v9  ;;  %v603_v12 = vmul.f32 %v539_v9, %v539_v9  ;;  %v542_v13 = vadd.f32 %v792_v27, %v736_v10 }
 0x125   :  { %v618_v14 = vadd.f32 %v617_v5, %v603_v12  ;;  %572 = vst [vmem:[%s1084_s2 + $0x58] sm:$0xff] %v542_v13  ;;  %v604_v15 = vmul.f32 %v542_v13, %v542_v13  ;;  %v737_v16 = vpop.f32.mrb[24].mxu0  ;;  %v587_v17 = vadd.f32 %v586_v11, %v542_v13 }
 0x126   :  { %v738_v18 = vpop.f32.mrb[25].mxu0 }
 0x127   :  { %v739_v19 = vadd.f32 %v738_v18, %v737_v16  ;;  %v740_v20 = vpop.f32.mrb[26].mxu0  ;;  %v619_v21 = vadd.f32 %v618_v14, %v604_v15 }
 0x128   :  { %v741_v22 = vpop.f32.mrb[27].mxu0 }
 0x129   :  { %v742_v23 = vadd.f32 %v741_v22, %v740_v20  ;;  %v547_v24 = vadd.f32 %v739_v19, %v546_v42 }
 0x12b   :  { %573 = vst [vmem:[%s1084_s2 + $0x60] sm:$0xff] %v547_v24  ;;  %v588_v25 = vadd.f32 %v587_v17, %v547_v24  ;;  %v605_v26 = vmul.f32 %v547_v24, %v547_v24  ;;  %v550_v27 = vadd.f32 %v742_v23, %v549_v46 }
 0x12d   :  { %v620_v28 = vadd.f32 %v619_v21, %v605_v26  ;;  %574 = vst [vmem:[%s1084_s2 + $0x68] sm:$0xff] %v550_v27  ;;  %v589_v29 = vadd.f32 %v588_v25, %v550_v27  ;;  %v606_v30 = vmul.f32 %v550_v27, %v550_v27  ;;  %v743_v31 = vpop.f32.mrb[28].mxu0 }
 0x12e   :  { %v744_v32 = vpop.f32.mrb[29].mxu0 }
 0x12f   :  { %v621_v33 = vadd.f32 %v620_v28, %v606_v30  ;;  %v745_v34 = vadd.f32 %v744_v32, %v743_v31  ;;  %v746_v35 = vpop.f32.mrb[30].mxu0 }
 0x130   :  { %v747_v36 = vpop.f32.mrb[31].mxu0 }
 0x131   :  { %v555_v37 = vadd.f32 %v1040_v40, %v745_v34  ;;  %v748_v38 = vadd.f32 %v747_v36, %v746_v35 }
 0x133   :  { %575 = vst [vmem:[%s1084_s2 + $0x70] sm:$0xff] %v555_v37  ;;  %v590_v39 = vadd.f32 %v589_v29, %v555_v37  ;;  %v607_v41 = vmul.f32 %v555_v37, %v555_v37  ;;  %v558_v42 = vadd.f32 %v1042_v45, %v748_v38 }
 0x135   :  { %v622_v43 = vadd.f32 %v621_v33, %v607_v41  ;;  %576 = vst [vmem:[%s1084_s2 + $0x78] sm:$0xff] %v558_v42  ;;  %v591_v44 = vadd.f32 %v590_v39, %v558_v42  ;;  %v608_v46 = vmul.f32 %v558_v42, %v558_v42 }
 0x137   :  { %592 = vst [vmem:[%s1085_s3] sm:$0xff] %v591_v44  ;;  %v623_v40 = vadd.f32 %v622_v43, %v608_v46 }
 0x139   :  { %624 = vst [vmem:[%s1086_s4] sm:$0xff] %v623_v40 }

// kernel: tile.49
= control target key start
LH: loop header
LB: loop body
LE: loop exit
PB: predicated region body
PF: predicated region fallthrough
CT: control target
= control target key end

     0   :  { %vm7_vm0 = vcmask 130048   ;;  %s37_s8 = smov 16   ;;  %s38_s9 = smov 32   ;;  %vm13_vm1 = vcmask 523648   ;;  %vm19_vm2 = vcmask 392448   ;;  %vm25_vm3 = vcmask 261248   ;;  %s55_s0 = inlined_call_operand.vmem [shape: f32[4,16], index: 0, kind: input, shape index: {}]   ;;  %s56_s1 = inlined_call_operand.vmem [shape: f32[64], index: 1, kind: output, shape index: {}]  }
   0x1   :  { %v4_v0 = vld [vmem:[%s55_s0] sm:$0xf]  ;;  %s36_s0 = smov 48  }
   0x2   :  { %5 = vst [vmem:[#allocation1] sm:$0xf] %v4_v0 }
   0x9   :  { %v10_v1 = vld [vmem:[#allocation1 + $0x3] sm:$0x1]   ;;  %v22_v2 = vld [vmem:[#allocation1 + $0x1] sm:$0x1]   ;;  %v6_v3 = vld [vmem:[#allocation1] sm:$0x1]  }
   0xa   :  { %11 = vrot.lane.b32.xlu0 %v10_v1, %s36_s0  ;;  %23 = vrot.lane.b32.xlu1 %v22_v2, %s37_s8  ;;  %v16_v4 = vld [vmem:[#allocation1 + $0x2] sm:$0x1]   ;;  %8 = vst.msk [vmem:[#allocation0] sm:$0x1] %vm7_vm0, %v6_v3  }
   0xe   :  { %17 = vrot.lane.b32.xlu0 %v16_v4, %s38_s9 }
  0x7c   :  { %v12_v5 = vpop.permute.xlu0 %11   ;;  %v24_v6 = vpop.permute.xlu1 %23  }
  0x7d   :  { %14 = vst.msk [vmem:[#allocation0] sm:$0x1] %vm13_vm1, %v12_v5  }
  0x80   :  { %v18_v7 = vpop.permute.xlu0 %17  }
  0x81   :  { %20 = vst.msk [vmem:[#allocation0] sm:$0x1] %vm19_vm2, %v18_v7  }
  0x82   :  { %26 = vst.msk [vmem:[#allocation0] sm:$0x1] %vm25_vm3, %v24_v6  }
  0x89   :  { %v30_v8 = vld [vmem:[#allocation0] sm:$0x1] }
  0x8a   :  { %32 = vst [vmem:[%s56_s1] sm:$0x1] %v30_v8 }

// kernel: generator_forward.14
= control target key start
LH: loop header
LB: loop body
LE: loop exit
PB: predicated region body
PF: predicated region fallthrough
CT: control target
= control target key end

     0   :  { %s254_s0 = inlined_call_operand.vmem [shape: f32[128,128], index: 0, kind: input, shape index: {}]   ;;  %s255_s1 = inlined_call_operand.vmem [shape: f32[1,128], index: 1, kind: input, shape index: {}]   ;;  %s256_s2 = inlined_call_operand.vmem [shape: f32[1,128], index: 2, kind: input, shape index: {}]   ;;  %s257_s3 = inlined_call_operand.vmem [shape: f32[128,128], index: 3, kind: output, shape index: {}]  }
   0x1   :  { %v14_v0 = vld [vmem:[%s254_s0] sm:$0xff]  ;;  %v15_v4 = vld [vmem:[%s254_s0 + $0x8] sm:$0xff]  ;;  %v16_v5 = vld [vmem:[%s254_s0 + $0x10] sm:$0xff] }
   0x2   :  { %v112_v1 = vld [vmem:[%s255_s1] ss:$0 sm:$0xff]  ;;  %v17_v6 = vld [vmem:[%s254_s0 + $0x18] sm:$0xff]  ;;  %v19_v11 = vld [vmem:[%s254_s0 + $0x28] sm:$0xff] }
   0x3   :  { %v143_v2 = vld [vmem:[%s256_s2] ss:$0 sm:$0xff]  ;;  %v37_v3 = vmul.f32 %v112_v1, %v14_v0  ;;  %v38_v7 = vmul.f32 %v112_v1, %v15_v4  ;;  %v39_v8 = vmul.f32 %v112_v1, %v16_v5  ;;  %v40_v9 = vmul.f32 %v112_v1, %v17_v6  ;;  %v20_v12 = vld [vmem:[%s254_s0 + $0x30] sm:$0xff]  ;;  %v21_v17 = vld [vmem:[%s254_s0 + $0x38] sm:$0xff] }
   0x4   :  { %v18_v10 = vld [vmem:[%s254_s0 + $0x20] sm:$0xff]  ;;  %v42_v15 = vmul.f32 %v112_v1, %v19_v11  ;;  %v43_v16 = vmul.f32 %v112_v1, %v20_v12  ;;  %v44_v21 = vmul.f32 %v112_v1, %v21_v17  ;;  %v23_v27 = vld [vmem:[%s254_s0 + $0x48] sm:$0xff]  ;;  %v24_v28 = vld [vmem:[%s254_s0 + $0x50] sm:$0xff] }
   0x5   :  { %v60_v13 = vadd.f32 %v143_v2, %v37_v3  ;;  %v41_v14 = vmul.f32 %v112_v1, %v18_v10  ;;  %v61_v18 = vadd.f32 %v143_v2, %v38_v7  ;;  %v62_v19 = vadd.f32 %v143_v2, %v39_v8  ;;  %v22_v22 = vld [vmem:[%s254_s0 + $0x40] sm:$0xff]  ;;  %v25_v29 = vld [vmem:[%s254_s0 + $0x58] sm:$0xff]  ;;  %v27_v35 = vld [vmem:[%s254_s0 + $0x68] sm:$0xff] }
   0x6   :  { %v63_v20 = vadd.f32 %v143_v2, %v40_v9  ;;  %v65_v25 = vadd.f32 %v143_v2, %v42_v15  ;;  %v66_v26 = vadd.f32 %v143_v2, %v43_v16  ;;  %v67_v33 = vadd.f32 %v143_v2, %v44_v21  ;;  %v26_v34 = vld [vmem:[%s254_s0 + $0x60] sm:$0xff]  ;;  %v28_v36 = vld [vmem:[%s254_s0 + $0x70] sm:$0xff]  ;;  %v29_v41 = vld [vmem:[%s254_s0 + $0x78] sm:$0xff] }
   0x7   :  { %v76_v23 = vmax.f32 %v60_v13, 0.0  ;;  %v64_v24 = vadd.f32 %v143_v2, %v41_v14  ;;  %v77_v30 = vmax.f32 %v61_v18, 0.0  ;;  %v78_v31 = vmax.f32 %v62_v19, 0.0 }
   0x8   :  { %v79_v32 = vmax.f32 %v63_v20, 0.0  ;;  %v81_v38 = vmax.f32 %v65_v25, 0.0  ;;  %v82_v39 = vmax.f32 %v66_v26, 0.0  ;;  %v45_v40 = vmul.f32 %v112_v1, %v22_v22 }
   0x9   :  { %92 = vst [vmem:[%s257_s3] sm:$0xff] %v76_v23  ;;  %v80_v37 = vmax.f32 %v64_v24, 0.0  ;;  %93 = vst [vmem:[%s257_s3 + $0x8] sm:$0xff] %v77_v30  ;;  %v83_v42 = vmax.f32 %v67_v33, 0.0  ;;  %v46_v43 = vmul.f32 %v112_v1, %v23_v27  ;;  %v47_v44 = vmul.f32 %v112_v1, %v24_v28 }
   0xa   :  { %94 = vst [vmem:[%s257_s3 + $0x10] sm:$0xff] %v78_v31  ;;  %95 = vst [vmem:[%s257_s3 + $0x18] sm:$0xff] %v79_v32  ;;  %v48_v45 = vmul.f32 %v112_v1, %v25_v29  ;;  %v68_v46 = vadd.f32 %v143_v2, %v45_v40  ;;  %v49_v47 = vmul.f32 %v112_v1, %v26_v34 }
   0xb   :  { %96 = vst [vmem:[%s257_s3 + $0x20] sm:$0xff] %v80_v37  ;;  %97 = vst [vmem:[%s257_s3 + $0x28] sm:$0xff] %v81_v38  ;;  %v50_v48 = vmul.f32 %v112_v1, %v27_v35  ;;  %v51_v49 = vmul.f32 %v112_v1, %v28_v36  ;;  %v69_v50 = vadd.f32 %v143_v2, %v46_v43 }
   0xc   :  { %98 = vst [vmem:[%s257_s3 + $0x30] sm:$0xff] %v82_v39  ;;  %99 = vst [vmem:[%s257_s3 + $0x38] sm:$0xff] %v83_v42  ;;  %v70_v51 = vadd.f32 %v143_v2, %v47_v44  ;;  %v71_v52 = vadd.f32 %v143_v2, %v48_v45  ;;  %v52_v53 = vmul.f32 %v112_v1, %v29_v41  ;;  %v84_v54 = vmax.f32 %v68_v46, 0.0 }
   0xd   :  { %v72_v55 = vadd.f32 %v143_v2, %v49_v47  ;;  %v73_v56 = vadd.f32 %v143_v2, %v50_v48  ;;  %v74_v57 = vadd.f32 %v143_v2, %v51_v49  ;;  %v85_v58 = vmax.f32 %v69_v50, 0.0 }
   0xe   :  { %v86_v59 = vmax.f32 %v70_v51, 0.0  ;;  %v87_v60 = vmax.f32 %v71_v52, 0.0  ;;  %v75_v61 = vadd.f32 %v143_v2, %v52_v53  ;;  %100 = vst [vmem:[%s257_s3 + $0x40] sm:$0xff] %v84_v54 }
   0xf   :  { %v88_v62 = vmax.f32 %v72_v55, 0.0  ;;  %v89_v63 = vmax.f32 %v73_v56, 0.0  ;;  %v90_v0 = vmax.f32 %v74_v57, 0.0  ;;  %101 = vst [vmem:[%s257_s3 + $0x48] sm:$0xff] %v85_v58 }
  0x10   :  { %102 = vst [vmem:[%s257_s3 + $0x50] sm:$0xff] %v86_v59  ;;  %103 = vst [vmem:[%s257_s3 + $0x58] sm:$0xff] %v87_v60  ;;  %v91_v1 = vmax.f32 %v75_v61, 0.0 }
  0x11   :  { %104 = vst [vmem:[%s257_s3 + $0x60] sm:$0xff] %v88_v62  ;;  %105 = vst [vmem:[%s257_s3 + $0x68] sm:$0xff] %v89_v63 }
  0x12   :  { %106 = vst [vmem:[%s257_s3 + $0x70] sm:$0xff] %v90_v0  ;;  %107 = vst [vmem:[%s257_s3 + $0x78] sm:$0xff] %v91_v1 }

// kernel: generator_forward.15
= control target key start
LH: loop header
LB: loop body
LE: loop exit
PB: predicated region body
PF: predicated region fallthrough
CT: control target
= control target key end

     0   :  { %v1309_v0 = vmov 0   ;;  %s1997_s1 = inlined_call_operand.vmem [shape: bf16[256,128], index: 1, kind: input, shape index: {}]   ;;  %s1998_s0 = inlined_call_operand.vmem [shape: bf16[512,256], index: 0, kind: input, shape index: {}]   ;;  %s1999_s2 = inlined_call_operand.vmem [shape: f32[512,128], index: 2, kind: output, shape index: {0}]   ;;  %s2000_s3 = inlined_call_operand.vmem [shape: f32[8,128], index: 3, kind: output, shape index: {1}]   ;;  %s2001_s4 = inlined_call_operand.vmem [shape: f32[8,128], index: 4, kind: output, shape index: {2}]  }
   0x1   :  { %527 = vmatprep.subr.bf16.mxu0 %v1309_v0  ;;  %v1197_v1 = vld [vmem:[%s1997_s1] sm:$0xff]   ;;  %1164 = vmatprep.subr.bf16.mxu1 %v1309_v0  ;;  %v1198_v2 = vld [vmem:[%s1997_s1 + $0x8] sm:$0xff]   ;;  %v1199_v3 = vld [vmem:[%s1997_s1 + $0x10] sm:$0xff]  }
   0x2   :  { %528 = vmatpush1.bf16.msra.mxu0 %v1197_v1  ;;  %1180 = vmatpush1.bf16.msra.mxu1 %v1197_v1  ;;  %v1200_v4 = vld [vmem:[%s1997_s1 + $0x18] sm:$0xff]   ;;  %v1201_v5 = vld [vmem:[%s1997_s1 + $0x20] sm:$0xff]   ;;  %v1202_v7 = vld [vmem:[%s1997_s1 + $0x28] sm:$0xff]  }
   0x3   :  { %529 = vmatprep.subr.bf16.mxu0 %v1309_v0  ;;  %1165 = vmatprep.subr.bf16.mxu1 %v1309_v0  ;;  %v1215_v6 = vld [vmem:[%s1998_s0 + $0x4] ss:$8 sps:$4 sm:$0xff]   ;;  %v1203_v8 = vld [vmem:[%s1997_s1 + $0x30] sm:$0xff]   ;;  %v1204_v9 = vld [vmem:[%s1997_s1 + $0x38] sm:$0xff]  }
   0x4   :  { %559 = vmatprep.mubr.bf16.mxu0 %v1215_v6  ;;  %v1239_v10 = vld [vmem:[%s1998_s0 + $0x104] ss:$8 sps:$4 sm:$0xff]   ;;  %v1207_v13 = vld [vmem:[%s1997_s1 + $0x50] sm:$0xff]   ;;  %v1208_v14 = vld [vmem:[%s1997_s1 + $0x58] sm:$0xff]  }
   0x5   :  { %687 = vmatprep.mubr.bf16.mxu1 %v1239_v10  ;;  %v1205_v11 = vld [vmem:[%s1997_s1 + $0x40] sm:$0xff]   ;;  %v1206_v12 = vld [vmem:[%s1997_s1 + $0x48] sm:$0xff]   ;;  %v1211_v17 = vld [vmem:[%s1997_s1 + $0x70] sm:$0xff]  }
   0x6   :  { %530 = vmatpush1.bf16.msra.mxu0 %v1198_v2  ;;  %1181 = vmatpush1.bf16.msra.mxu1 %v1198_v2  ;;  %v1209_v15 = vld [vmem:[%s1997_s1 + $0x60] sm:$0xff]   ;;  %v1210_v16 = vld [vmem:[%s1997_s1 + $0x68] sm:$0xff]   ;;  %v1212_v18 = vld [vmem:[%s1997_s1 + $0x78] sm:$0xff]  }
   0x7   :  { %531 = vmatprep.subr.bf16.mxu0 %v1309_v0  ;;  %1166 = vmatprep.subr.bf16.mxu1 %v1309_v0  ;;  %v1213_v19 = vld [vmem:[%s1998_s0] ss:$8 sps:$4 sm:$0xff]   ;;  %v1216_v21 = vld [vmem:[%s1998_s0 + $0x14] ss:$8 sps:$4 sm:$0xff]   ;;  %v1218_v23 = vld [vmem:[%s1998_s0 + $0x10] ss:$8 sps:$4 sm:$0xff]  }
   0x8   :  { %v1237_v20 = vld [vmem:[%s1998_s0 + $0x100] ss:$8 sps:$4 sm:$0xff]   ;;  %v1243_v22 = vld [vmem:[%s1998_s0 + $0x114] ss:$8 sps:$4 sm:$0xff]   ;;  %v1245_v24 = vld [vmem:[%s1998_s0 + $0x110] ss:$8 sps:$4 sm:$0xff]  }
   0x9   :  { %v1219_v25 = vld [vmem:[%s1998_s0 + $0x24] ss:$8 sps:$4 sm:$0xff]   ;;  %v1221_v27 = vld [vmem:[%s1998_s0 + $0x20] ss:$8 sps:$4 sm:$0xff]   ;;  %v1222_v29 = vld [vmem:[%s1998_s0 + $0x34] ss:$8 sps:$4 sm:$0xff]  }
   0xa   :  { %532 = vmatpush1.bf16.msra.mxu0 %v1199_v3  ;;  %1182 = vmatpush1.bf16.msra.mxu1 %v1199_v3  ;;  %v1249_v26 = vld [vmem:[%s1998_s0 + $0x124] ss:$8 sps:$4 sm:$0xff]   ;;  %v1251_v28 = vld [vmem:[%s1998_s0 + $0x120] ss:$8 sps:$4 sm:$0xff]   ;;  %v1255_v30 = vld [vmem:[%s1998_s0 + $0x134] ss:$8 sps:$4 sm:$0xff]  }
   0xb   :  { %533 = vmatprep.subr.bf16.mxu0 %v1309_v0  ;;  %1167 = vmatprep.subr.bf16.mxu1 %v1309_v0  ;;  %v1224_v31 = vld [vmem:[%s1998_s0 + $0x30] ss:$8 sps:$4 sm:$0xff]   ;;  %v1225_v33 = vld [vmem:[%s1998_s0 + $0x44] ss:$8 sps:$4 sm:$0xff]   ;;  %v1227_v35 = vld [vmem:[%s1998_s0 + $0x40] ss:$8 sps:$4 sm:$0xff]  }
   0xc   :  { %v1257_v32 = vld [vmem:[%s1998_s0 + $0x130] ss:$8 sps:$4 sm:$0xff]   ;;  %v1261_v34 = vld [vmem:[%s1998_s0 + $0x144] ss:$8 sps:$4 sm:$0xff]   ;;  %v1263_v36 = vld [vmem:[%s1998_s0 + $0x140] ss:$8 sps:$4 sm:$0xff]  }
   0xd   :  { %v1228_v37 = vld [vmem:[%s1998_s0 + $0x54] ss:$8 sps:$4 sm:$0xff]   ;;  %v1230_v39 = vld [vmem:[%s1998_s0 + $0x50] ss:$8 sps:$4 sm:$0xff]   ;;  %v1231_v41 = vld [vmem:[%s1998_s0 + $0x64] ss:$8 sps:$4 sm:$0xff]  }
   0xe   :  { %534 = vmatpush1.bf16.msra.mxu0 %v1200_v4  ;;  %1183 = vmatpush1.bf16.msra.mxu1 %v1200_v4  ;;  %v1267_v38 = vld [vmem:[%s1998_s0 + $0x154] ss:$8 sps:$4 sm:$0xff]   ;;  %v1269_v40 = vld [vmem:[%s1998_s0 + $0x150] ss:$8 sps:$4 sm:$0xff]   ;;  %v1273_v42 = vld [vmem:[%s1998_s0 + $0x164] ss:$8 sps:$4 sm:$0xff]  }
   0xf   :  { %535 = vmatprep.subr.bf16.mxu0 %v1309_v0  ;;  %1168 = vmatprep.subr.bf16.mxu1 %v1309_v0  ;;  %v1233_v43 = vld [vmem:[%s1998_s0 + $0x60] ss:$8 sps:$4 sm:$0xff]   ;;  %v1234_v45 = vld [vmem:[%s1998_s0 + $0x74] ss:$8 sps:$4 sm:$0xff]   ;;  %v1236_v47 = vld [vmem:[%s1998_s0 + $0x70] ss:$8 sps:$4 sm:$0xff]  }
  0x10   :  { %v1275_v44 = vld [vmem:[%s1998_s0 + $0x160] ss:$8 sps:$4 sm:$0xff]   ;;  %v1279_v46 = vld [vmem:[%s1998_s0 + $0x174] ss:$8 sps:$4 sm:$0xff]   ;;  %v1281_v48 = vld [vmem:[%s1998_s0 + $0x170] ss:$8 sps:$4 sm:$0xff]  }
  0x11   :  { %v1240_v49 = vld [vmem:[%s1998_s0 + $0x84] ss:$8 sps:$4 sm:$0xff]   ;;  %v1242_v51 = vld [vmem:[%s1998_s0 + $0x80] ss:$8 sps:$4 sm:$0xff]   ;;  %v1246_v53 = vld [vmem:[%s1998_s0 + $0x94] ss:$8 sps:$4 sm:$0xff]  }
  0x12   :  { %536 = vmatpush1.bf16.msra.mxu0 %v1201_v5  ;;  %1184 = vmatpush1.bf16.msra.mxu1 %v1201_v5  ;;  %v1285_v50 = vld [vmem:[%s1998_s0 + $0x184] ss:$8 sps:$4 sm:$0xff]   ;;  %v1287_v52 = vld [vmem:[%s1998_s0 + $0x180] ss:$8 sps:$4 sm:$0xff]   ;;  %v1288_v54 = vld [vmem:[%s1998_s0 + $0x194] ss:$8 sps:$4 sm:$0xff]  }
  0x13   :  { %537 = vmatprep.subr.bf16.mxu0 %v1309_v0  ;;  %1169 = vmatprep.subr.bf16.mxu1 %v1309_v0  ;;  %v1248_v55 = vld [vmem:[%s1998_s0 + $0x90] ss:$8 sps:$4 sm:$0xff]   ;;  %v1252_v57 = vld [vmem:[%s1998_s0 + $0xa4] ss:$8 sps:$4 sm:$0xff]   ;;  %v1254_v59 = vld [vmem:[%s1998_s0 + $0xa0] ss:$8 sps:$4 sm:$0xff]  }
  0x14   :  { %v1290_v56 = vld [vmem:[%s1998_s0 + $0x190] ss:$8 sps:$4 sm:$0xff]   ;;  %v1291_v58 = vld [vmem:[%s1998_s0 + $0x1a4] ss:$8 sps:$4 sm:$0xff]   ;;  %v1293_v60 = vld [vmem:[%s1998_s0 + $0x1a0] ss:$8 sps:$4 sm:$0xff]  }
  0x15   :  { %v1258_v61 = vld [vmem:[%s1998_s0 + $0xb4] ss:$8 sps:$4 sm:$0xff]   ;;  %v1260_v63 = vld [vmem:[%s1998_s0 + $0xb0] ss:$8 sps:$4 sm:$0xff]   ;;  %v1264_v1 = vld [vmem:[%s1998_s0 + $0xc4] ss:$8 sps:$4 sm:$0xff]  }
  0x16   :  { %538 = vmatpush1.bf16.msra.mxu0 %v1202_v7  ;;  %1185 = vmatpush1.bf16.msra.mxu1 %v1202_v7  ;;  %v1294_v62 = vld [vmem:[%s1998_s0 + $0x1b4] ss:$8 sps:$4 sm:$0xff]   ;;  %v1297_v2 = vld [vmem:[%s1998_s0 + $0x1c4] ss:$8 sps:$4 sm:$0xff]   ;;  %v1266_v3 = vld [vmem:[%s1998_s0 + $0xc0] ss:$8 sps:$4 sm:$0xff]  }
  0x17   :  { %539 = vmatprep.subr.bf16.mxu0 %v1309_v0  ;;  %1170 = vmatprep.subr.bf16.mxu1 %v1309_v0  ;;  %v1299_v4 = vld [vmem:[%s1998_s0 + $0x1c0] ss:$8 sps:$4 sm:$0xff]   ;;  %v1270_v5 = vld [vmem:[%s1998_s0 + $0xd4] ss:$8 sps:$4 sm:$0xff]   ;;  %v1272_v7 = vld [vmem:[%s1998_s0 + $0xd0] ss:$8 sps:$4 sm:$0xff]  }
  0x18   :  { %v1300_v6 = vld [vmem:[%s1998_s0 + $0x1d4] ss:$8 sps:$4 sm:$0xff]   ;;  %v1303_v10 = vld [vmem:[%s1998_s0 + $0x1e4] ss:$8 sps:$4 sm:$0xff]  }
  0x1a   :  { %540 = vmatpush1.bf16.msra.mxu0 %v1203_v8  ;;  %1186 = vmatpush1.bf16.msra.mxu1 %v1203_v8  ;;  %v1302_v8 = vld [vmem:[%s1998_s0 + $0x1d0] ss:$8 sps:$4 sm:$0xff]  }
  0x1b   :  { %541 = vmatprep.subr.bf16.mxu0 %v1309_v0  ;;  %1171 = vmatprep.subr.bf16.mxu1 %v1309_v0 }
  0x1e   :  { %542 = vmatpush1.bf16.msra.mxu0 %v1204_v9  ;;  %1187 = vmatpush1.bf16.msra.mxu1 %v1204_v9  ;;  %v1276_v9 = vld [vmem:[%s1998_s0 + $0xe4] ss:$8 sps:$4 sm:$0xff]  }
  0x1f   :  { %543 = vmatprep.subr.bf16.mxu0 %v1309_v0  ;;  %1172 = vmatprep.subr.bf16.mxu1 %v1309_v0 }
  0x22   :  { %544 = vmatpush1.bf16.msra.mxu0 %v1205_v11  ;;  %1188 = vmatpush1.bf16.msra.mxu1 %v1205_v11  ;;  %v1278_v11 = vld [vmem:[%s1998_s0 + $0xe0] ss:$8 sps:$4 sm:$0xff]  }
  0x23   :  { %545 = vmatprep.subr.bf16.mxu0 %v1309_v0  ;;  %1173 = vmatprep.subr.bf16.mxu1 %v1309_v0 }
  0x26   :  { %546 = vmatpush1.bf16.msra.mxu0 %v1206_v12  ;;  %1189 = vmatpush1.bf16.msra.mxu1 %v1206_v12  ;;  %v1305_v12 = vld [vmem:[%s1998_s0 + $0x1e0] ss:$8 sps:$4 sm:$0xff]  }
  0x27   :  { %547 = vmatprep.subr.bf16.mxu0 %v1309_v0  ;;  %1174 = vmatprep.subr.bf16.mxu1 %v1309_v0 }
  0x2a   :  { %548 = vmatpush1.bf16.msra.mxu0 %v1207_v13  ;;  %1190 = vmatpush1.bf16.msra.mxu1 %v1207_v13  ;;  %v1282_v13 = vld [vmem:[%s1998_s0 + $0xf4] ss:$8 sps:$4 sm:$0xff]  }
  0x2b   :  { %549 = vmatprep.subr.bf16.mxu0 %v1309_v0  ;;  %1175 = vmatprep.subr.bf16.mxu1 %v1309_v0 }
  0x2e   :  { %550 = vmatpush1.bf16.msra.mxu0 %v1208_v14  ;;  %1191 = vmatpush1.bf16.msra.mxu1 %v1208_v14  ;;  %v1306_v14 = vld [vmem:[%s1998_s0 + $0x1f4] ss:$8 sps:$4 sm:$0xff]  }
  0x2f   :  { %551 = vmatprep.subr.bf16.mxu0 %v1309_v0  ;;  %1176 = vmatprep.subr.bf16.mxu1 %v1309_v0 }
  0x32   :  { %552 = vmatpush1.bf16.msra.mxu0 %v1209_v15  ;;  %1192 = vmatpush1.bf16.msra.mxu1 %v1209_v15  ;;  %v1284_v15 = vld [vmem:[%s1998_s0 + $0xf0] ss:$8 sps:$4 sm:$0xff]  }
  0x33   :  { %553 = vmatprep.subr.bf16.mxu0 %v1309_v0  ;;  %1177 = vmatprep.subr.bf16.mxu1 %v1309_v0 }
  0x36   :  { %554 = vmatpush1.bf16.msra.mxu0 %v1210_v16  ;;  %1193 = vmatpush1.bf16.msra.mxu1 %v1210_v16  ;;  %v1308_v16 = vld [vmem:[%s1998_s0 + $0x1f0] ss:$8 sps:$4 sm:$0xff]  }
  0x37   :  { %555 = vmatprep.subr.bf16.mxu0 %v1309_v0  ;;  %1178 = vmatprep.subr.bf16.mxu1 %v1309_v0 }
  0x3a   :  { %556 = vmatpush1.bf16.msra.mxu0 %v1211_v17  ;;  %1194 = vmatpush1.bf16.msra.mxu1 %v1211_v17 }
  0x3b   :  { %557 = vmatprep.subr.bf16.mxu0 %v1309_v0  ;;  %1179 = vmatprep.subr.bf16.mxu1 %v1309_v0  ;;  %v1296_v0 = vld [vmem:[%s1998_s0 + $0x1b0] ss:$8 sps:$4 sm:$0xff]  }
  0x3e   :  { %558 = vmatpush1.bf16.msra.mxu0 %v1212_v18  ;;  %1195 = vmatpush1.bf16.msra.mxu1 %v1212_v18 }
  0x41   :  { %560 = vmatmul.mubr.bf16.vlgmr.msra.gmra.mrb[0].mxu0 %v1213_v19  ;;  %688 = vmatmul.mubr.bf16.vlgmr.msra.gmra.mrb[0].mxu1 %v1237_v20 }
  0x42   :  { %567 = vmatprep.mubr.bf16.mxu0 %v1216_v21  ;;  %695 = vmatprep.mubr.bf16.mxu1 %v1243_v22 }
  0x49   :  { %568 = vmatmul.mubr.bf16.gmra.mrb[4].mxu0 %v1218_v23  ;;  %696 = vmatmul.mubr.bf16.gmra.mrb[4].mxu1 %v1245_v24 }
  0x4a   :  { %575 = vmatprep.mubr.bf16.mxu0 %v1219_v25  ;;  %703 = vmatprep.mubr.bf16.mxu1 %v1249_v26 }
  0x51   :  { %576 = vmatmul.mubr.bf16.gmra.mrb[8].mxu0 %v1221_v27  ;;  %704 = vmatmul.mubr.bf16.gmra.mrb[8].mxu1 %v1251_v28 }
  0x52   :  { %583 = vmatprep.mubr.bf16.mxu0 %v1222_v29  ;;  %711 = vmatprep.mubr.bf16.mxu1 %v1255_v30 }
  0x59   :  { %584 = vmatmul.mubr.bf16.gmra.mrb[12].mxu0 %v1224_v31  ;;  %712 = vmatmul.mubr.bf16.gmra.mrb[12].mxu1 %v1257_v32 }
  0x5a   :  { %591 = vmatprep.mubr.bf16.mxu0 %v1225_v33  ;;  %719 = vmatprep.mubr.bf16.mxu1 %v1261_v34 }
  0x61   :  { %592 = vmatmul.mubr.bf16.gmra.mrb[16].mxu0 %v1227_v35  ;;  %720 = vmatmul.mubr.bf16.gmra.mrb[16].mxu1 %v1263_v36 }
  0x62   :  { %599 = vmatprep.mubr.bf16.mxu0 %v1228_v37  ;;  %727 = vmatprep.mubr.bf16.mxu1 %v1267_v38 }
  0x69   :  { %600 = vmatmul.mubr.bf16.gmra.mrb[20].mxu0 %v1230_v39  ;;  %728 = vmatmul.mubr.bf16.gmra.mrb[20].mxu1 %v1269_v40 }
  0x6a   :  { %607 = vmatprep.mubr.bf16.mxu0 %v1231_v41  ;;  %735 = vmatprep.mubr.bf16.mxu1 %v1273_v42 }
  0x71   :  { %608 = vmatmul.mubr.bf16.gmra.mrb[24].mxu0 %v1233_v43  ;;  %736 = vmatmul.mubr.bf16.gmra.mrb[24].mxu1 %v1275_v44 }
  0x72   :  { %615 = vmatprep.mubr.bf16.mxu0 %v1234_v45  ;;  %743 = vmatprep.mubr.bf16.mxu1 %v1279_v46 }
  0x79   :  { %616 = vmatmul.mubr.bf16.gmra.mrb[28].mxu0 %v1236_v47  ;;  %744 = vmatmul.mubr.bf16.gmra.mrb[28].mxu1 %v1281_v48 }
  0x7a   :  { %623 = vmatprep.mubr.bf16.mxu0 %v1240_v49  ;;  %751 = vmatprep.mubr.bf16.mxu1 %v1285_v50 }
  0x81   :  { %624 = vmatmul.mubr.bf16.gmra.mrb[32].mxu0 %v1242_v51  ;;  %752 = vmatmul.mubr.bf16.gmra.mrb[32].mxu1 %v1287_v52 }
  0x82   :  { %631 = vmatprep.mubr.bf16.mxu0 %v1246_v53  ;;  %759 = vmatprep.mubr.bf16.mxu1 %v1288_v54 }
  0x89   :  { %632 = vmatmul.mubr.bf16.gmra.mrb[36].mxu0 %v1248_v55  ;;  %760 = vmatmul.mubr.bf16.gmra.mrb[36].mxu1 %v1290_v56 }
  0x8a   :  { %639 = vmatprep.mubr.bf16.mxu0 %v1252_v57  ;;  %767 = vmatprep.mubr.bf16.mxu1 %v1291_v58 }
  0x91   :  { %640 = vmatmul.mubr.bf16.gmra.mrb[40].mxu0 %v1254_v59  ;;  %768 = vmatmul.mubr.bf16.gmra.mrb[40].mxu1 %v1293_v60 }
  0x92   :  { %647 = vmatprep.mubr.bf16.mxu0 %v1258_v61  ;;  %775 = vmatprep.mubr.bf16.mxu1 %v1294_v62 }
  0x99   :  { %648 = vmatmul.mubr.bf16.gmra.mrb[44].mxu0 %v1260_v63  ;;  %776 = vmatmul.mubr.bf16.gmra.mrb[44].mxu1 %v1296_v0 }
  0x9a   :  { %655 = vmatprep.mubr.bf16.mxu0 %v1264_v1  ;;  %783 = vmatprep.mubr.bf16.mxu1 %v1297_v2 }
  0xa1   :  { %656 = vmatmul.mubr.bf16.gmra.mrb[48].mxu0 %v1266_v3  ;;  %784 = vmatmul.mubr.bf16.gmra.mrb[48].mxu1 %v1299_v4 }
  0xa2   :  { %663 = vmatprep.mubr.bf16.mxu0 %v1270_v5  ;;  %791 = vmatprep.mubr.bf16.mxu1 %v1300_v6 }
  0xa9   :  { %664 = vmatmul.mubr.bf16.gmra.mrb[52].mxu0 %v1272_v7  ;;  %792 = vmatmul.mubr.bf16.gmra.mrb[52].mxu1 %v1302_v8 }
  0xaa   :  { %671 = vmatprep.mubr.bf16.mxu0 %v1276_v9  ;;  %799 = vmatprep.mubr.bf16.mxu1 %v1303_v10 }
  0xb1   :  { %672 = vmatmul.mubr.bf16.gmra.mrb[56].mxu0 %v1278_v11  ;;  %800 = vmatmul.mubr.bf16.gmra.mrb[56].mxu1 %v1305_v12 }
  0xb2   :  { %679 = vmatprep.mubr.bf16.mxu0 %v1282_v13  ;;  %807 = vmatprep.mubr.bf16.mxu1 %v1306_v14 }
  0xb9   :  { %680 = vmatmul.mubr.bf16.gmra.mrb[60].mxu0 %v1284_v15  ;;  %808 = vmatmul.mubr.bf16.gmra.mrb[60].mxu1 %v1308_v16 }
 0x114   :  { %v561_v17 = vpop.f32.mrb[0].mxu0  ;;  %v1607_v18 = vpop.f32.mrb[0].mxu1 }
 0x115   :  { %816 = vst [vmem:[%s1999_s2] sm:$0xff] %v561_v17  ;;  %v563_v19 = vpop.f32.mrb[1].mxu0  ;;  %848 = vst [vmem:[%s1999_s2 + $0x100] sm:$0xff] %v1607_v18  ;;  %v691_v20 = vpop.f32.mrb[1].mxu1  ;;  %v944_v23 = vmul.f32 %v561_v17, %v561_v17 }
 0x116   :  { %v564_v21 = vpop.f32.mrb[2].mxu0  ;;  %v1616_v22 = vpop.f32.mrb[2].mxu1 }
 0x117   :  { %817 = vst [vmem:[%s1999_s2 + $0x8] sm:$0xff] %v564_v21  ;;  %v880_v24 = vadd.f32 %v564_v21, %v561_v17  ;;  %v945_v25 = vmul.f32 %v564_v21, %v564_v21  ;;  %v566_v26 = vpop.f32.mrb[3].mxu0  ;;  %849 = vst [vmem:[%s1999_s2 + $0x108] sm:$0xff] %v1616_v22  ;;  %v694_v27 = vpop.f32.mrb[3].mxu1 }
 0x119   :  { %v1008_v28 = vadd.f32 %v945_v25, %v944_v23 }
 0x11c   :  { %v569_v29 = vpop.f32.mrb[4].mxu0  ;;  %v1625_v30 = vpop.f32.mrb[4].mxu1 }
 0x11d   :  { %818 = vst [vmem:[%s1999_s2 + $0x10] sm:$0xff] %v569_v29  ;;  %v881_v31 = vadd.f32 %v880_v24, %v569_v29  ;;  %v946_v32 = vmul.f32 %v569_v29, %v569_v29  ;;  %v571_v33 = vpop.f32.mrb[5].mxu0  ;;  %850 = vst [vmem:[%s1999_s2 + $0x110] sm:$0xff] %v1625_v30  ;;  %v699_v34 = vpop.f32.mrb[5].mxu1 }
 0x11e   :  { %v572_v35 = vpop.f32.mrb[6].mxu0  ;;  %v1634_v36 = vpop.f32.mrb[6].mxu1 }
 0x11f   :  { %v1009_v37 = vadd.f32 %v1008_v28, %v946_v32  ;;  %819 = vst [vmem:[%s1999_s2 + $0x18] sm:$0xff] %v572_v35  ;;  %v882_v38 = vadd.f32 %v881_v31, %v572_v35  ;;  %v947_v39 = vmul.f32 %v572_v35, %v572_v35  ;;  %v574_v40 = vpop.f32.mrb[7].mxu0  ;;  %851 = vst [vmem:[%s1999_s2 + $0x118] sm:$0xff] %v1634_v36  ;;  %v702_v41 = vpop.f32.mrb[7].mxu1 }
 0x121   :  { %v1010_v42 = vadd.f32 %v1009_v37, %v947_v39 }
 0x124   :  { %v577_v43 = vpop.f32.mrb[8].mxu0  ;;  %v1643_v44 = vpop.f32.mrb[8].mxu1 }
 0x125   :  { %820 = vst [vmem:[%s1999_s2 + $0x20] sm:$0xff] %v577_v43  ;;  %v883_v45 = vadd.f32 %v882_v38, %v577_v43  ;;  %v948_v46 = vmul.f32 %v577_v43, %v577_v43  ;;  %v579_v47 = vpop.f32.mrb[9].mxu0  ;;  %852 = vst [vmem:[%s1999_s2 + $0x120] sm:$0xff] %v1643_v44  ;;  %v707_v48 = vpop.f32.mrb[9].mxu1 }
 0x126   :  { %v580_v49 = vpop.f32.mrb[10].mxu0  ;;  %v1652_v50 = vpop.f32.mrb[10].mxu1 }
 0x127   :  { %v1011_v51 = vadd.f32 %v1010_v42, %v948_v46  ;;  %821 = vst [vmem:[%s1999_s2 + $0x28] sm:$0xff] %v580_v49  ;;  %v884_v52 = vadd.f32 %v883_v45, %v580_v49  ;;  %v949_v53 = vmul.f32 %v580_v49, %v580_v49  ;;  %v582_v54 = vpop.f32.mrb[11].mxu0  ;;  %853 = vst [vmem:[%s1999_s2 + $0x128] sm:$0xff] %v1652_v50  ;;  %v710_v55 = vpop.f32.mrb[11].mxu1 }
 0x129   :  { %v1012_v56 = vadd.f32 %v1011_v51, %v949_v53 }
 0x12c   :  { %v585_v57 = vpop.f32.mrb[12].mxu0  ;;  %v1661_v58 = vpop.f32.mrb[12].mxu1 }
 0x12d   :  { %822 = vst [vmem:[%s1999_s2 + $0x30] sm:$0xff] %v585_v57  ;;  %v885_v59 = vadd.f32 %v884_v52, %v585_v57  ;;  %v950_v60 = vmul.f32 %v585_v57, %v585_v57  ;;  %v587_v61 = vpop.f32.mrb[13].mxu0  ;;  %854 = vst [vmem:[%s1999_s2 + $0x130] sm:$0xff] %v1661_v58  ;;  %v715_v62 = vpop.f32.mrb[13].mxu1 }
 0x12e   :  { %v588_v63 = vpop.f32.mrb[14].mxu0  ;;  %v1670_v0 = vpop.f32.mrb[14].mxu1 }
 0x12f   :  { %v1013_v1 = vadd.f32 %v1012_v56, %v950_v60  ;;  %823 = vst [vmem:[%s1999_s2 + $0x38] sm:$0xff] %v588_v63  ;;  %v886_v2 = vadd.f32 %v885_v59, %v588_v63  ;;  %v951_v3 = vmul.f32 %v588_v63, %v588_v63  ;;  %v590_v4 = vpop.f32.mrb[15].mxu0  ;;  %855 = vst [vmem:[%s1999_s2 + $0x138] sm:$0xff] %v1670_v0  ;;  %v718_v5 = vpop.f32.mrb[15].mxu1 }
 0x131   :  { %v1014_v6 = vadd.f32 %v1013_v1, %v951_v3 }
 0x134   :  { %v593_v7 = vpop.f32.mrb[16].mxu0  ;;  %v1679_v8 = vpop.f32.mrb[16].mxu1 }
 0x135   :  { %824 = vst [vmem:[%s1999_s2 + $0x40] sm:$0xff] %v593_v7  ;;  %v887_v9 = vadd.f32 %v886_v2, %v593_v7  ;;  %v952_v10 = vmul.f32 %v593_v7, %v593_v7  ;;  %v595_v11 = vpop.f32.mrb[17].mxu0  ;;  %856 = vst [vmem:[%s1999_s2 + $0x140] sm:$0xff] %v1679_v8  ;;  %v723_v12 = vpop.f32.mrb[17].mxu1 }
 0x136   :  { %v596_v13 = vpop.f32.mrb[18].mxu0  ;;  %v1688_v14 = vpop.f32.mrb[18].mxu1 }
 0x137   :  { %v1015_v15 = vadd.f32 %v1014_v6, %v952_v10  ;;  %825 = vst [vmem:[%s1999_s2 + $0x48] sm:$0xff] %v596_v13  ;;  %v888_v16 = vadd.f32 %v887_v9, %v596_v13  ;;  %v953_v17 = vmul.f32 %v596_v13, %v596_v13  ;;  %v598_v19 = vpop.f32.mrb[19].mxu0  ;;  %857 = vst [vmem:[%s1999_s2 + $0x148] sm:$0xff] %v1688_v14  ;;  %v726_v20 = vpop.f32.mrb[19].mxu1 }
 0x139   :  { %v1016_v21 = vadd.f32 %v1015_v15, %v953_v17 }
 0x13c   :  { %v601_v23 = vpop.f32.mrb[20].mxu0  ;;  %v1697_v24 = vpop.f32.mrb[20].mxu1 }
 0x13d   :  { %826 = vst [vmem:[%s1999_s2 + $0x50] sm:$0xff] %v601_v23  ;;  %v889_v25 = vadd.f32 %v888_v16, %v601_v23  ;;  %v954_v26 = vmul.f32 %v601_v23, %v601_v23  ;;  %v603_v27 = vpop.f32.mrb[21].mxu0  ;;  %858 = vst [vmem:[%s1999_s2 + $0x150] sm:$0xff] %v1697_v24  ;;  %v731_v28 = vpop.f32.mrb[21].mxu1 }
 0x13e   :  { %v604_v29 = vpop.f32.mrb[22].mxu0  ;;  %v1706_v31 = vpop.f32.mrb[22].mxu1 }
 0x13f   :  { %v1017_v32 = vadd.f32 %v1016_v21, %v954_v26  ;;  %827 = vst [vmem:[%s1999_s2 + $0x58] sm:$0xff] %v604_v29  ;;  %v890_v33 = vadd.f32 %v889_v25, %v604_v29  ;;  %v955_v34 = vmul.f32 %v604_v29, %v604_v29  ;;  %v606_v35 = vpop.f32.mrb[23].mxu0  ;;  %859 = vst [vmem:[%s1999_s2 + $0x158] sm:$0xff] %v1706_v31  ;;  %v734_v37 = vpop.f32.mrb[23].mxu1 }
 0x141   :  { %v1018_v38 = vadd.f32 %v1017_v32, %v955_v34 }
 0x144   :  { %v609_v39 = vpop.f32.mrb[24].mxu0  ;;  %v1715_v40 = vpop.f32.mrb[24].mxu1 }
 0x145   :  { %828 = vst [vmem:[%s1999_s2 + $0x60] sm:$0xff] %v609_v39  ;;  %v891_v41 = vadd.f32 %v890_v33, %v609_v39  ;;  %v956_v42 = vmul.f32 %v609_v39, %v609_v39  ;;  %v611_v43 = vpop.f32.mrb[25].mxu0  ;;  %860 = vst [vmem:[%s1999_s2 + $0x160] sm:$0xff] %v1715_v40  ;;  %v739_v45 = vpop.f32.mrb[25].mxu1 }
 0x146   :  { %v612_v46 = vpop.f32.mrb[26].mxu0  ;;  %v1724_v47 = vpop.f32.mrb[26].mxu1 }
 0x147   :  { %v1019_v48 = vadd.f32 %v1018_v38, %v956_v42  ;;  %829 = vst [vmem:[%s1999_s2 + $0x68] sm:$0xff] %v612_v46  ;;  %v892_v49 = vadd.f32 %v891_v41, %v612_v46  ;;  %v957_v51 = vmul.f32 %v612_v46, %v612_v46  ;;  %v614_v52 = vpop.f32.mrb[27].mxu0  ;;  %861 = vst [vmem:[%s1999_s2 + $0x168] sm:$0xff] %v1724_v47  ;;  %v742_v53 = vpop.f32.mrb[27].mxu1 }
 0x149   :  { %v1020_v54 = vadd.f32 %v1019_v48, %v957_v51 }
 0x14c   :  { %v617_v55 = vpop.f32.mrb[28].mxu0  ;;  %v1733_v56 = vpop.f32.mrb[28].mxu1 }
 0x14d   :  { %830 = vst [vmem:[%s1999_s2 + $0x70] sm:$0xff] %v617_v55  ;;  %v893_v57 = vadd.f32 %v892_v49, %v617_v55  ;;  %v958_v59 = vmul.f32 %v617_v55, %v617_v55  ;;  %v619_v60 = vpop.f32.mrb[29].mxu0  ;;  %862 = vst [vmem:[%s1999_s2 + $0x170] sm:$0xff] %v1733_v56  ;;  %v747_v61 = vpop.f32.mrb[29].mxu1 }
 0x14e   :  { %v620_v62 = vpop.f32.mrb[30].mxu0  ;;  %v1742_v63 = vpop.f32.mrb[30].mxu1 }
 0x14f   :  { %v1021_v1 = vadd.f32 %v1020_v54, %v958_v59  ;;  %831 = vst [vmem:[%s1999_s2 + $0x78] sm:$0xff] %v620_v62  ;;  %v894_v2 = vadd.f32 %v893_v57, %v620_v62  ;;  %v959_v3 = vmul.f32 %v620_v62, %v620_v62  ;;  %v622_v4 = vpop.f32.mrb[31].mxu0  ;;  %863 = vst [vmem:[%s1999_s2 + $0x178] sm:$0xff] %v1742_v63  ;;  %v750_v5 = vpop.f32.mrb[31].mxu1 }
 0x151   :  { %v1022_v6 = vadd.f32 %v1021_v1, %v959_v3 }
 0x154   :  { %v625_v7 = vpop.f32.mrb[32].mxu0  ;;  %v1751_v9 = vpop.f32.mrb[32].mxu1 }
 0x155   :  { %832 = vst [vmem:[%s1999_s2 + $0x80] sm:$0xff] %v625_v7  ;;  %v895_v10 = vadd.f32 %v894_v2, %v625_v7  ;;  %v960_v11 = vmul.f32 %v625_v7, %v625_v7  ;;  %v627_v12 = vpop.f32.mrb[33].mxu0  ;;  %864 = vst [vmem:[%s1999_s2 + $0x180] sm:$0xff] %v1751_v9  ;;  %v755_v13 = vpop.f32.mrb[33].mxu1 }
 0x156   :  { %v628_v15 = vpop.f32.mrb[34].mxu0  ;;  %v1760_v16 = vpop.f32.mrb[34].mxu1 }
 0x157   :  { %v1023_v17 = vadd.f32 %v1022_v6, %v960_v11  ;;  %833 = vst [vmem:[%s1999_s2 + $0x88] sm:$0xff] %v628_v15  ;;  %v896_v19 = vadd.f32 %v895_v10, %v628_v15  ;;  %v961_v20 = vmul.f32 %v628_v15, %v628_v15  ;;  %v630_v21 = vpop.f32.mrb[35].mxu0  ;;  %865 = vst [vmem:[%s1999_s2 + $0x188] sm:$0xff] %v1760_v16  ;;  %v758_v23 = vpop.f32.mrb[35].mxu1 }
 0x159   :  { %v1024_v25 = vadd.f32 %v1023_v17, %v961_v20 }
 0x15c   :  { %v633_v26 = vpop.f32.mrb[36].mxu0  ;;  %v1769_v27 = vpop.f32.mrb[36].mxu1 }
 0x15d   :  { %834 = vst [vmem:[%s1999_s2 + $0x90] sm:$0xff] %v633_v26  ;;  %v897_v28 = vadd.f32 %v896_v19, %v633_v26  ;;  %v962_v29 = vmul.f32 %v633_v26, %v633_v26  ;;  %v635_v32 = vpop.f32.mrb[37].mxu0  ;;  %866 = vst [vmem:[%s1999_s2 + $0x190] sm:$0xff] %v1769_v27  ;;  %v763_v33 = vpop.f32.mrb[37].mxu1 }
 0x15e   :  { %v636_v34 = vpop.f32.mrb[38].mxu0  ;;  %v1778_v35 = vpop.f32.mrb[38].mxu1 }
 0x15f   :  { %v1025_v37 = vadd.f32 %v1024_v25, %v962_v29  ;;  %835 = vst [vmem:[%s1999_s2 + $0x98] sm:$0xff] %v636_v34  ;;  %v898_v38 = vadd.f32 %v897_v28, %v636_v34  ;;  %v963_v39 = vmul.f32 %v636_v34, %v636_v34  ;;  %v638_v41 = vpop.f32.mrb[39].mxu0  ;;  %867 = vst [vmem:[%s1999_s2 + $0x198] sm:$0xff] %v1778_v35  ;;  %v766_v42 = vpop.f32.mrb[39].mxu1 }
 0x161   :  { %v1026_v43 = vadd.f32 %v1025_v37, %v963_v39 }
 0x164   :  { %v641_v45 = vpop.f32.mrb[40].mxu0  ;;  %v1787_v46 = vpop.f32.mrb[40].mxu1 }
 0x165   :  { %836 = vst [vmem:[%s1999_s2 + $0xa0] sm:$0xff] %v641_v45  ;;  %v899_v48 = vadd.f32 %v898_v38, %v641_v45  ;;  %v964_v49 = vmul.f32 %v641_v45, %v641_v45  ;;  %v643_v51 = vpop.f32.mrb[41].mxu0  ;;  %868 = vst [vmem:[%s1999_s2 + $0x1a0] sm:$0xff] %v1787_v46  ;;  %v771_v52 = vpop.f32.mrb[41].mxu1 }
 0x166   :  { %v644_v53 = vpop.f32.mrb[42].mxu0  ;;  %v1796_v54 = vpop.f32.mrb[42].mxu1 }
 0x167   :  { %v1027_v55 = vadd.f32 %v1026_v43, %v964_v49  ;;  %837 = vst [vmem:[%s1999_s2 + $0xa8] sm:$0xff] %v644_v53  ;;  %v900_v57 = vadd.f32 %v899_v48, %v644_v53  ;;  %v965_v59 = vmul.f32 %v644_v53, %v644_v53  ;;  %v646_v60 = vpop.f32.mrb[43].mxu0  ;;  %869 = vst [vmem:[%s1999_s2 + $0x1a8] sm:$0xff] %v1796_v54  ;;  %v774_v61 = vpop.f32.mrb[43].mxu1 }
 0x169   :  { %v1028_v62 = vadd.f32 %v1027_v55, %v965_v59 }
 0x16c   :  { %v649_v1 = vpop.f32.mrb[44].mxu0  ;;  %v1805_v2 = vpop.f32.mrb[44].mxu1 }
 0x16d   :  { %838 = vst [vmem:[%s1999_s2 + $0xb0] sm:$0xff] %v649_v1  ;;  %v901_v3 = vadd.f32 %v900_v57, %v649_v1  ;;  %v966_v4 = vmul.f32 %v649_v1, %v649_v1  ;;  %v651_v5 = vpop.f32.mrb[45].mxu0  ;;  %870 = vst [vmem:[%s1999_s2 + $0x1b0] sm:$0xff] %v1805_v2  ;;  %v779_v6 = vpop.f32.mrb[45].mxu1 }
 0x16e   :  { %v652_v7 = vpop.f32.mrb[46].mxu0  ;;  %v1814_v10 = vpop.f32.mrb[46].mxu1 }
 0x16f   :  { %v1029_v11 = vadd.f32 %v1028_v62, %v966_v4  ;;  %839 = vst [vmem:[%s1999_s2 + $0xb8] sm:$0xff] %v652_v7  ;;  %v902_v12 = vadd.f32 %v901_v3, %v652_v7  ;;  %v967_v13 = vmul.f32 %v652_v7, %v652_v7  ;;  %v654_v15 = vpop.f32.mrb[47].mxu0  ;;  %871 = vst [vmem:[%s1999_s2 + $0x1b8] sm:$0xff] %v1814_v10  ;;  %v782_v17 = vpop.f32.mrb[47].mxu1 }
 0x171   :  { %v1030_v19 = vadd.f32 %v1029_v11, %v967_v13 }
 0x174   :  { %v657_v20 = vpop.f32.mrb[48].mxu0  ;;  %v1823_v21 = vpop.f32.mrb[48].mxu1 }
 0x175   :  { %840 = vst [vmem:[%s1999_s2 + $0xc0] sm:$0xff] %v657_v20  ;;  %v903_v23 = vadd.f32 %v902_v12, %v657_v20  ;;  %v968_v25 = vmul.f32 %v657_v20, %v657_v20  ;;  %v659_v26 = vpop.f32.mrb[49].mxu0  ;;  %872 = vst [vmem:[%s1999_s2 + $0x1c0] sm:$0xff] %v1823_v21  ;;  %v787_v28 = vpop.f32.mrb[49].mxu1 }
 0x176   :  { %v660_v29 = vpop.f32.mrb[50].mxu0  ;;  %v1832_v32 = vpop.f32.mrb[50].mxu1 }
 0x177   :  { %v1031_v33 = vadd.f32 %v1030_v19, %v968_v25  ;;  %841 = vst [vmem:[%s1999_s2 + $0xc8] sm:$0xff] %v660_v29  ;;  %v904_v34 = vadd.f32 %v903_v23, %v660_v29  ;;  %v969_v37 = vmul.f32 %v660_v29, %v660_v29  ;;  %v662_v38 = vpop.f32.mrb[51].mxu0  ;;  %873 = vst [vmem:[%s1999_s2 + $0x1c8] sm:$0xff] %v1832_v32  ;;  %v790_v39 = vpop.f32.mrb[51].mxu1 }
 0x179   :  { %v1032_v41 = vadd.f32 %v1031_v33, %v969_v37 }
 0x17c   :  { %v665_v42 = vpop.f32.mrb[52].mxu0  ;;  %v1841_v43 = vpop.f32.mrb[52].mxu1 }
 0x17d   :  { %842 = vst [vmem:[%s1999_s2 + $0xd0] sm:$0xff] %v665_v42  ;;  %v905_v45 = vadd.f32 %v904_v34, %v665_v42  ;;  %v970_v48 = vmul.f32 %v665_v42, %v665_v42  ;;  %v667_v49 = vpop.f32.mrb[53].mxu0  ;;  %874 = vst [vmem:[%s1999_s2 + $0x1d0] sm:$0xff] %v1841_v43  ;;  %v795_v51 = vpop.f32.mrb[53].mxu1 }
 0x17e   :  { %v668_v52 = vpop.f32.mrb[54].mxu0  ;;  %v1850_v53 = vpop.f32.mrb[54].mxu1  ;;  %v976_v49 = vmul.f32 %v1607_v18, %v1607_v18 }
 0x17f   :  { %v1033_v55 = vadd.f32 %v1032_v41, %v970_v48  ;;  %843 = vst [vmem:[%s1999_s2 + $0xd8] sm:$0xff] %v668_v52  ;;  %v906_v57 = vadd.f32 %v905_v45, %v668_v52  ;;  %v971_v59 = vmul.f32 %v668_v52, %v668_v52  ;;  %v670_v60 = vpop.f32.mrb[55].mxu0  ;;  %875 = vst [vmem:[%s1999_s2 + $0x1d8] sm:$0xff] %v1850_v53  ;;  %v798_v61 = vpop.f32.mrb[55].mxu1 }
 0x180   :  { %v978_v60 = vmul.f32 %v1625_v30, %v1625_v30 }
 0x181   :  { %v1034_v62 = vadd.f32 %v1033_v55, %v971_v59  ;;  %v977_v55 = vmul.f32 %v1616_v22, %v1616_v22 }
 0x184   :  { %v673_v1 = vpop.f32.mrb[56].mxu0  ;;  %v1859_v3 = vpop.f32.mrb[56].mxu1 }
 0x185   :  { %844 = vst [vmem:[%s1999_s2 + $0xe0] sm:$0xff] %v673_v1  ;;  %v907_v4 = vadd.f32 %v906_v57, %v673_v1  ;;  %v972_v5 = vmul.f32 %v673_v1, %v673_v1  ;;  %v675_v6 = vpop.f32.mrb[57].mxu0  ;;  %876 = vst [vmem:[%s1999_s2 + $0x1e0] sm:$0xff] %v1859_v3  ;;  %v803_v7 = vpop.f32.mrb[57].mxu1  ;;  %v979_v1 = vmul.f32 %v1634_v36, %v1634_v36 }
 0x186   :  { %v676_v11 = vpop.f32.mrb[58].mxu0  ;;  %v1868_v12 = vpop.f32.mrb[58].mxu1 }
 0x187   :  { %v1035_v13 = vadd.f32 %v1034_v62, %v972_v5  ;;  %845 = vst [vmem:[%s1999_s2 + $0xe8] sm:$0xff] %v676_v11  ;;  %v908_v15 = vadd.f32 %v907_v4, %v676_v11  ;;  %v973_v17 = vmul.f32 %v676_v11, %v676_v11  ;;  %v678_v19 = vpop.f32.mrb[59].mxu0  ;;  %877 = vst [vmem:[%s1999_s2 + $0x1e8] sm:$0xff] %v1868_v12  ;;  %v806_v20 = vpop.f32.mrb[59].mxu1 }
 0x189   :  { %v1036_v23 = vadd.f32 %v1035_v13, %v973_v17 }
 0x18c   :  { %v681_v25 = vpop.f32.mrb[60].mxu0  ;;  %v1877_v26 = vpop.f32.mrb[60].mxu1 }
 0x18d   :  { %846 = vst [vmem:[%s1999_s2 + $0xf0] sm:$0xff] %v681_v25  ;;  %v909_v28 = vadd.f32 %v908_v15, %v681_v25  ;;  %v974_v29 = vmul.f32 %v681_v25, %v681_v25  ;;  %v683_v33 = vpop.f32.mrb[61].mxu0  ;;  %878 = vst [vmem:[%s1999_s2 + $0x1f0] sm:$0xff] %v1877_v26  ;;  %v811_v34 = vpop.f32.mrb[61].mxu1 }
 0x18e   :  { %v684_v37 = vpop.f32.mrb[62].mxu0  ;;  %v1886_v38 = vpop.f32.mrb[62].mxu1 }
 0x18f   :  { %v1037_v39 = vadd.f32 %v1036_v23, %v974_v29  ;;  %847 = vst [vmem:[%s1999_s2 + $0xf8] sm:$0xff] %v684_v37  ;;  %v910_v41 = vadd.f32 %v909_v28, %v684_v37  ;;  %v975_v42 = vmul.f32 %v684_v37, %v684_v37  ;;  %v686_v45 = vpop.f32.mrb[63].mxu0  ;;  %879 = vst [vmem:[%s1999_s2 + $0x1f8] sm:$0xff] %v1886_v38  ;;  %v814_v48 = vpop.f32.mrb[63].mxu1 }
 0x191   :  { %v911_v51 = vadd.f32 %v910_v41, %v1607_v18  ;;  %v1038_v52 = vadd.f32 %v1037_v39, %v975_v42  ;;  %v980_v18 = vmul.f32 %v1643_v44, %v1643_v44 }
 0x193   :  { %v912_v57 = vadd.f32 %v911_v51, %v1616_v22  ;;  %v1039_v59 = vadd.f32 %v1038_v52, %v976_v49  ;;  %v981_v22 = vmul.f32 %v1652_v50, %v1652_v50 }
 0x195   :  { %v913_v61 = vadd.f32 %v912_v57, %v1625_v30  ;;  %v1040_v62 = vadd.f32 %v1039_v59, %v977_v55  ;;  %v982_v30 = vmul.f32 %v1661_v58, %v1661_v58  ;;  %v992_v57 = vmul.f32 %v1751_v9, %v1751_v9 }
 0x197   :  { %v914_v4 = vadd.f32 %v913_v61, %v1634_v36  ;;  %v1041_v5 = vadd.f32 %v1040_v62, %v978_v60  ;;  %v983_v36 = vmul.f32 %v1670_v0, %v1670_v0  ;;  %v993_v61 = vmul.f32 %v1760_v16, %v1760_v16 }
 0x199   :  { %v915_v6 = vadd.f32 %v914_v4, %v1643_v44  ;;  %v1042_v7 = vadd.f32 %v1041_v5, %v979_v1  ;;  %v984_v44 = vmul.f32 %v1679_v8, %v1679_v8  ;;  %v994_v1 = vmul.f32 %v1769_v27, %v1769_v27 }
 0x19a   :  { %v995_v5 = vmul.f32 %v1778_v35, %v1778_v35 }
 0x19b   :  { %v916_v11 = vadd.f32 %v915_v6, %v1652_v50  ;;  %v1043_v13 = vadd.f32 %v1042_v7, %v980_v18  ;;  %v985_v50 = vmul.f32 %v1688_v14, %v1688_v14  ;;  %v996_v6 = vmul.f32 %v1787_v46, %v1787_v46 }
 0x19d   :  { %v917_v15 = vadd.f32 %v916_v11, %v1661_v58  ;;  %v1044_v17 = vadd.f32 %v1043_v13, %v981_v22  ;;  %v986_v58 = vmul.f32 %v1697_v24, %v1697_v24  ;;  %v997_v22 = vmul.f32 %v1796_v54, %v1796_v54 }
 0x19e   :  { %v998_v13 = vmul.f32 %v1805_v2, %v1805_v2 }
 0x19f   :  { %v918_v19 = vadd.f32 %v917_v15, %v1670_v0  ;;  %v1045_v20 = vadd.f32 %v1044_v17, %v982_v30  ;;  %v987_v0 = vmul.f32 %v1706_v31, %v1706_v31  ;;  %v999_v15 = vmul.f32 %v1814_v10, %v1814_v10 }
 0x1a1   :  { %v1046_v23 = vadd.f32 %v1045_v20, %v983_v36  ;;  %v919_v25 = vadd.f32 %v918_v19, %v1679_v8  ;;  %v988_v8 = vmul.f32 %v1715_v40, %v1715_v40  ;;  %v1000_v36 = vmul.f32 %v1823_v21, %v1823_v21 }
 0x1a2   :  { %v1001_v20 = vmul.f32 %v1832_v32, %v1832_v32 }
 0x1a3   :  { %v920_v28 = vadd.f32 %v919_v25, %v1688_v14  ;;  %v1047_v29 = vadd.f32 %v1046_v23, %v984_v44  ;;  %v989_v14 = vmul.f32 %v1724_v47, %v1724_v47  ;;  %v1002_v23 = vmul.f32 %v1841_v43, %v1841_v43 }
 0x1a5   :  { %v921_v33 = vadd.f32 %v920_v28, %v1697_v24  ;;  %v1048_v34 = vadd.f32 %v1047_v29, %v985_v50  ;;  %v990_v24 = vmul.f32 %v1733_v56, %v1733_v56  ;;  %v1003_v50 = vmul.f32 %v1850_v53, %v1850_v53 }
 0x1a6   :  { %v1004_v29 = vmul.f32 %v1859_v3, %v1859_v3 }
 0x1a7   :  { %v922_v37 = vadd.f32 %v921_v33, %v1706_v31  ;;  %v1049_v39 = vadd.f32 %v1048_v34, %v986_v58  ;;  %v991_v31 = vmul.f32 %v1742_v63, %v1742_v63  ;;  %v1005_v33 = vmul.f32 %v1868_v12, %v1868_v12 }
 0x1a9   :  { %v923_v41 = vadd.f32 %v922_v37, %v1715_v40  ;;  %v1050_v42 = vadd.f32 %v1049_v39, %v987_v0  ;;  %v1007_v39 = vmul.f32 %v1886_v38, %v1886_v38 }
 0x1ab   :  { %v924_v45 = vadd.f32 %v923_v41, %v1724_v47  ;;  %v1051_v48 = vadd.f32 %v1050_v42, %v988_v8 }
 0x1ad   :  { %v925_v49 = vadd.f32 %v924_v45, %v1733_v56  ;;  %v1052_v51 = vadd.f32 %v1051_v48, %v989_v14 }
 0x1af   :  { %v926_v52 = vadd.f32 %v925_v49, %v1742_v63  ;;  %v1053_v55 = vadd.f32 %v1052_v51, %v990_v24 }
 0x1b1   :  { %v927_v40 = vadd.f32 %v926_v52, %v1751_v9  ;;  %v1054_v59 = vadd.f32 %v1053_v55, %v991_v31 }
 0x1b3   :  { %v1055_v47 = vadd.f32 %v1054_v59, %v992_v57  ;;  %v928_v60 = vadd.f32 %v927_v40, %v1760_v16 }
 0x1b5   :  { %v1056_v56 = vadd.f32 %v1055_v47, %v993_v61  ;;  %v929_v62 = vadd.f32 %v928_v60, %v1769_v27 }
 0x1b7   :  { %v1057_v63 = vadd.f32 %v1056_v56, %v994_v1  ;;  %v930_v4 = vadd.f32 %v929_v62, %v1778_v35 }
 0x1b9   :  { %v1058_v9 = vadd.f32 %v1057_v63, %v995_v5  ;;  %v931_v18 = vadd.f32 %v930_v4, %v1787_v46 }
 0x1bb   :  { %v1059_v7 = vadd.f32 %v1058_v9, %v996_v6  ;;  %v932_v16 = vadd.f32 %v931_v18, %v1796_v54 }
 0x1bd   :  { %v1060_v11 = vadd.f32 %v1059_v7, %v997_v22  ;;  %v933_v27 = vadd.f32 %v932_v16, %v1805_v2 }
 0x1bf   :  { %v1061_v30 = vadd.f32 %v1060_v11, %v998_v13  ;;  %v934_v35 = vadd.f32 %v933_v27, %v1814_v10 }
 0x1c1   :  { %v1062_v17 = vadd.f32 %v1061_v30, %v999_v15  ;;  %v935_v46 = vadd.f32 %v934_v35, %v1823_v21 }
 0x1c3   :  { %v1063_v19 = vadd.f32 %v1062_v17, %v1000_v36  ;;  %v936_v54 = vadd.f32 %v935_v46, %v1832_v32 }
 0x1c5   :  { %v1064_v44 = vadd.f32 %v1063_v19, %v1001_v20  ;;  %v937_v2 = vadd.f32 %v936_v54, %v1841_v43  ;;  %v1006_v43 = vmul.f32 %v1877_v26, %v1877_v26 }
 0x1c7   :  { %v1065_v25 = vadd.f32 %v1064_v44, %v1002_v23  ;;  %v938_v10 = vadd.f32 %v937_v2, %v1850_v53 }
 0x1c9   :  { %v1066_v28 = vadd.f32 %v1065_v25, %v1003_v50  ;;  %v939_v21 = vadd.f32 %v938_v10, %v1859_v3 }
 0x1cb   :  { %v1067_v58 = vadd.f32 %v1066_v28, %v1004_v29  ;;  %v940_v32 = vadd.f32 %v939_v21, %v1868_v12 }
 0x1cd   :  { %v1068_v34 = vadd.f32 %v1067_v58, %v1005_v33  ;;  %v941_v0 = vadd.f32 %v940_v32, %v1877_v26 }
 0x1cf   :  { %v1069_v37 = vadd.f32 %v1068_v34, %v1006_v43  ;;  %v942_v53 = vadd.f32 %v941_v0, %v1886_v38 }
 0x1d1   :  { %943 = vst [vmem:[%s2000_s3] sm:$0xff] %v942_v53  ;;  %v1070_v3 = vadd.f32 %v1069_v37, %v1007_v39 }
 0x1d3   :  { %1071 = vst [vmem:[%s2001_s4] sm:$0xff] %v1070_v3 }

// kernel: tile.58
= control target key start
LH: loop header
LB: loop body
LE: loop exit
PB: predicated region body
PF: predicated region fallthrough
CT: control target
= control target key end

     0   :  { %s22_s0 = inlined_call_operand.vmem [shape: f32[8], index: 0, kind: input, shape index: {}]   ;;  %s23_s1 = inlined_call_operand.vmem [shape: f32[4,8], index: 1, kind: output, shape index: {}]  }
   0x1   :  { %v4_v0 = vld [vmem:[%s22_s0] ss:$0 sm:$0xff] }
   0x2   :  { %5 = vst [vmem:[%s23_s1] sm:$0xf] %v4_v0 }

// kernel: tile.59
= control target key start
LH: loop header
LB: loop body
LE: loop exit
PB: predicated region body
PF: predicated region fallthrough
CT: control target
= control target key end

     0   :  { %vm7_vm0 = vcmask 64512   ;;  %s37_s8 = smov 8   ;;  %s38_s9 = smov 16   ;;  %vm13_vm1 = vcmask 261312   ;;  %vm19_vm2 = vcmask 195712   ;;  %vm25_vm3 = vcmask 130112   ;;  %s55_s0 = inlined_call_operand.vmem [shape: f32[4,8], index: 0, kind: input, shape index: {}]   ;;  %s56_s1 = inlined_call_operand.vmem [shape: f32[32], index: 1, kind: output, shape index: {}]  }
   0x1   :  { %v4_v0 = vld [vmem:[%s55_s0] sm:$0xf]  ;;  %s36_s0 = smov 24  }
   0x2   :  { %5 = vst [vmem:[#allocation1] sm:$0xf] %v4_v0 }
   0x9   :  { %v10_v1 = vld [vmem:[#allocation1 + $0x3] sm:$0x1]   ;;  %v22_v2 = vld [vmem:[#allocation1 + $0x1] sm:$0x1]   ;;  %v6_v3 = vld [vmem:[#allocation1] sm:$0x1]  }
   0xa   :  { %11 = vrot.lane.b32.xlu0 %v10_v1, %s36_s0  ;;  %23 = vrot.lane.b32.xlu1 %v22_v2, %s37_s8  ;;  %v16_v4 = vld [vmem:[#allocation1 + $0x2] sm:$0x1]   ;;  %8 = vst.msk [vmem:[#allocation0] sm:$0x1] %vm7_vm0, %v6_v3  }
   0xe   :  { %17 = vrot.lane.b32.xlu0 %v16_v4, %s38_s9 }
  0x7c   :  { %v12_v5 = vpop.permute.xlu0 %11   ;;  %v24_v6 = vpop.permute.xlu1 %23  }
  0x7d   :  { %14 = vst.msk [vmem:[#allocation0] sm:$0x1] %vm13_vm1, %v12_v5  }
  0x80   :  { %v18_v7 = vpop.permute.xlu0 %17  }
  0x81   :  { %20 = vst.msk [vmem:[#allocation0] sm:$0x1] %vm19_vm2, %v18_v7  }
  0x82   :  { %26 = vst.msk [vmem:[#allocation0] sm:$0x1] %vm25_vm3, %v24_v6  }
  0x89   :  { %v30_v8 = vld [vmem:[#allocation0] sm:$0x1] }
  0x8a   :  { %32 = vst [vmem:[%s56_s1] sm:$0x1] %v30_v8 }

// kernel: generator_forward.16
= control target key start
LH: loop header
LB: loop body
LE: loop exit
PB: predicated region body
PF: predicated region fallthrough
CT: control target
= control target key end

     0   :  { %s896_s0 = inlined_call_operand.vmem [shape: f32[512,128], index: 0, kind: input, shape index: {}]   ;;  %s897_s1 = inlined_call_operand.vmem [shape: f32[1,128], index: 1, kind: input, shape index: {}]   ;;  %s898_s2 = inlined_call_operand.vmem [shape: f32[1,128], index: 2, kind: input, shape index: {}]   ;;  %s899_s3 = inlined_call_operand.vmem [shape: f32[512,128], index: 3, kind: output, shape index: {}]  }
   0x1   :  { %v14_v0 = vld [vmem:[%s896_s0] sm:$0xff]  ;;  %v15_v4 = vld [vmem:[%s896_s0 + $0x8] sm:$0xff]  ;;  %v16_v5 = vld [vmem:[%s896_s0 + $0x10] sm:$0xff] }
   0x2   :  { %v380_v1 = vld [vmem:[%s897_s1] ss:$0 sm:$0xff]  ;;  %v17_v6 = vld [vmem:[%s896_s0 + $0x18] sm:$0xff]  ;;  %v19_v11 = vld [vmem:[%s896_s0 + $0x28] sm:$0xff] }
   0x3   :  { %v385_v2 = vld [vmem:[%s898_s2] ss:$0 sm:$0xff]  ;;  %v85_v3 = vmul.f32 %v380_v1, %v14_v0  ;;  %v86_v7 = vmul.f32 %v380_v1, %v15_v4  ;;  %v87_v8 = vmul.f32 %v380_v1, %v16_v5  ;;  %v88_v9 = vmul.f32 %v380_v1, %v17_v6  ;;  %v20_v12 = vld [vmem:[%s896_s0 + $0x30] sm:$0xff]  ;;  %v21_v17 = vld [vmem:[%s896_s0 + $0x38] sm:$0xff] }
   0x4   :  { %v18_v10 = vld [vmem:[%s896_s0 + $0x20] sm:$0xff]  ;;  %v90_v15 = vmul.f32 %v380_v1, %v19_v11  ;;  %v91_v16 = vmul.f32 %v380_v1, %v20_v12  ;;  %v92_v21 = vmul.f32 %v380_v1, %v21_v17  ;;  %v23_v27 = vld [vmem:[%s896_s0 + $0x48] sm:$0xff]  ;;  %v24_v28 = vld [vmem:[%s896_s0 + $0x50] sm:$0xff] }
   0x5   :  { %v156_v13 = vadd.f32 %v385_v2, %v85_v3  ;;  %v89_v14 = vmul.f32 %v380_v1, %v18_v10  ;;  %v157_v18 = vadd.f32 %v385_v2, %v86_v7  ;;  %v158_v19 = vadd.f32 %v385_v2, %v87_v8  ;;  %v22_v22 = vld [vmem:[%s896_s0 + $0x40] sm:$0xff]  ;;  %v25_v29 = vld [vmem:[%s896_s0 + $0x58] sm:$0xff]  ;;  %v27_v35 = vld [vmem:[%s896_s0 + $0x68] sm:$0xff] }
   0x6   :  { %v159_v20 = vadd.f32 %v385_v2, %v88_v9  ;;  %v161_v25 = vadd.f32 %v385_v2, %v90_v15  ;;  %v162_v26 = vadd.f32 %v385_v2, %v91_v16  ;;  %v163_v33 = vadd.f32 %v385_v2, %v92_v21  ;;  %v26_v34 = vld [vmem:[%s896_s0 + $0x60] sm:$0xff]  ;;  %v28_v36 = vld [vmem:[%s896_s0 + $0x70] sm:$0xff]  ;;  %v29_v41 = vld [vmem:[%s896_s0 + $0x78] sm:$0xff] }
   0x7   :  { %v220_v23 = vmax.f32 %v156_v13, 0.0  ;;  %v160_v24 = vadd.f32 %v385_v2, %v89_v14  ;;  %v221_v30 = vmax.f32 %v157_v18, 0.0  ;;  %v222_v31 = vmax.f32 %v158_v19, 0.0  ;;  %v30_v54 = vld [vmem:[%s896_s0 + $0x80] sm:$0xff]  ;;  %v31_v59 = vld [vmem:[%s896_s0 + $0x88] sm:$0xff]  ;;  %v32_v60 = vld [vmem:[%s896_s0 + $0x90] sm:$0xff] }
   0x8   :  { %v223_v32 = vmax.f32 %v159_v20, 0.0  ;;  %v225_v38 = vmax.f32 %v161_v25, 0.0  ;;  %v226_v39 = vmax.f32 %v162_v26, 0.0  ;;  %v93_v40 = vmul.f32 %v380_v1, %v22_v22  ;;  %v33_v61 = vld [vmem:[%s896_s0 + $0x98] sm:$0xff]  ;;  %v34_v4 = vld [vmem:[%s896_s0 + $0xa0] sm:$0xff]  ;;  %v35_v5 = vld [vmem:[%s896_s0 + $0xa8] sm:$0xff] }
   0x9   :  { %284 = vst [vmem:[%s899_s3] sm:$0xff] %v220_v23  ;;  %v224_v37 = vmax.f32 %v160_v24, 0.0  ;;  %285 = vst [vmem:[%s899_s3 + $0x8] sm:$0xff] %v221_v30  ;;  %v227_v42 = vmax.f32 %v163_v33, 0.0  ;;  %v94_v43 = vmul.f32 %v380_v1, %v23_v27  ;;  %v95_v44 = vmul.f32 %v380_v1, %v24_v28  ;;  %v36_v6 = vld [vmem:[%s896_s0 + $0xb0] sm:$0xff]  ;;  %v37_v11 = vld [vmem:[%s896_s0 + $0xb8] sm:$0xff] }
   0xa   :  { %286 = vst [vmem:[%s899_s3 + $0x10] sm:$0xff] %v222_v31  ;;  %287 = vst [vmem:[%s899_s3 + $0x18] sm:$0xff] %v223_v32  ;;  %v96_v45 = vmul.f32 %v380_v1, %v25_v29  ;;  %v164_v46 = vadd.f32 %v385_v2, %v93_v40  ;;  %v97_v47 = vmul.f32 %v380_v1, %v26_v34  ;;  %v38_v24 = vld [vmem:[%s896_s0 + $0xc0] sm:$0xff]  ;;  %v39_v29 = vld [vmem:[%s896_s0 + $0xc8] sm:$0xff] }
   0xb   :  { %288 = vst [vmem:[%s899_s3 + $0x20] sm:$0xff] %v224_v37  ;;  %289 = vst [vmem:[%s899_s3 + $0x28] sm:$0xff] %v225_v38  ;;  %v98_v48 = vmul.f32 %v380_v1, %v27_v35  ;;  %v99_v49 = vmul.f32 %v380_v1, %v28_v36  ;;  %v165_v50 = vadd.f32 %v385_v2, %v94_v43  ;;  %v40_v30 = vld [vmem:[%s896_s0 + $0xd0] sm:$0xff]  ;;  %v41_v31 = vld [vmem:[%s896_s0 + $0xd8] sm:$0xff] }
   0xc   :  { %290 = vst [vmem:[%s899_s3 + $0x30] sm:$0xff] %v226_v39  ;;  %291 = vst [vmem:[%s899_s3 + $0x38] sm:$0xff] %v227_v42  ;;  %v166_v51 = vadd.f32 %v385_v2, %v95_v44  ;;  %v167_v52 = vadd.f32 %v385_v2, %v96_v45  ;;  %v100_v53 = vmul.f32 %v380_v1, %v29_v41  ;;  %v228_v55 = vmax.f32 %v164_v46, 0.0  ;;  %v42_v36 = vld [vmem:[%s896_s0 + $0xe0] sm:$0xff]  ;;  %v43_v37 = vld [vmem:[%s896_s0 + $0xe8] sm:$0xff] }
   0xd   :  { %v168_v56 = vadd.f32 %v385_v2, %v97_v47  ;;  %v169_v57 = vadd.f32 %v385_v2, %v98_v48  ;;  %v170_v58 = vadd.f32 %v385_v2, %v99_v49  ;;  %v229_v62 = vmax.f32 %v165_v50, 0.0  ;;  %v44_v38 = vld [vmem:[%s896_s0 + $0xf0] sm:$0xff]  ;;  %v45_v43 = vld [vmem:[%s896_s0 + $0xf8] sm:$0xff] }
   0xe   :  { %v230_v63 = vmax.f32 %v166_v51, 0.0  ;;  %v231_v0 = vmax.f32 %v167_v52, 0.0  ;;  %v171_v3 = vadd.f32 %v385_v2, %v100_v53  ;;  %292 = vst [vmem:[%s899_s3 + $0x40] sm:$0xff] %v228_v55  ;;  %v101_v10 = vmul.f32 %v380_v1, %v30_v54 }
   0xf   :  { %v232_v7 = vmax.f32 %v168_v56, 0.0  ;;  %v233_v8 = vmax.f32 %v169_v57, 0.0  ;;  %v234_v9 = vmax.f32 %v170_v58, 0.0  ;;  %293 = vst [vmem:[%s899_s3 + $0x48] sm:$0xff] %v229_v62  ;;  %v102_v13 = vmul.f32 %v380_v1, %v31_v59  ;;  %v46_v56 = vld [vmem:[%s896_s0 + $0x100] sm:$0xff]  ;;  %v48_v62 = vld [vmem:[%s896_s0 + $0x110] sm:$0xff] }
  0x10   :  { %294 = vst [vmem:[%s899_s3 + $0x50] sm:$0xff] %v230_v63  ;;  %295 = vst [vmem:[%s899_s3 + $0x58] sm:$0xff] %v231_v0  ;;  %v235_v12 = vmax.f32 %v171_v3, 0.0  ;;  %v103_v14 = vmul.f32 %v380_v1, %v32_v60  ;;  %v104_v15 = vmul.f32 %v380_v1, %v33_v61  ;;  %v172_v16 = vadd.f32 %v385_v2, %v101_v10  ;;  %v47_v61 = vld [vmem:[%s896_s0 + $0x108] sm:$0xff]  ;;  %v49_v63 = vld [vmem:[%s896_s0 + $0x118] sm:$0xff] }
  0x11   :  { %296 = vst [vmem:[%s899_s3 + $0x60] sm:$0xff] %v232_v7  ;;  %297 = vst [vmem:[%s899_s3 + $0x68] sm:$0xff] %v233_v8  ;;  %v105_v17 = vmul.f32 %v380_v1, %v34_v4  ;;  %v106_v18 = vmul.f32 %v380_v1, %v35_v5  ;;  %v107_v19 = vmul.f32 %v380_v1, %v36_v6  ;;  %v50_v6 = vld [vmem:[%s896_s0 + $0x120] sm:$0xff]  ;;  %v51_v7 = vld [vmem:[%s896_s0 + $0x128] sm:$0xff] }
  0x12   :  { %298 = vst [vmem:[%s899_s3 + $0x70] sm:$0xff] %v234_v9  ;;  %299 = vst [vmem:[%s899_s3 + $0x78] sm:$0xff] %v235_v12  ;;  %v173_v20 = vadd.f32 %v385_v2, %v102_v13  ;;  %v174_v21 = vadd.f32 %v385_v2, %v103_v14  ;;  %v175_v22 = vadd.f32 %v385_v2, %v104_v15  ;;  %v236_v25 = vmax.f32 %v172_v16, 0.0  ;;  %v52_v8 = vld [vmem:[%s896_s0 + $0x130] sm:$0xff]  ;;  %v53_v13 = vld [vmem:[%s896_s0 + $0x138] sm:$0xff] }
  0x13   :  { %v108_v23 = vmul.f32 %v380_v1, %v37_v11  ;;  %v176_v26 = vadd.f32 %v385_v2, %v105_v17  ;;  %v177_v27 = vadd.f32 %v385_v2, %v106_v18  ;;  %v178_v28 = vadd.f32 %v385_v2, %v107_v19 }
  0x14   :  { %v237_v32 = vmax.f32 %v173_v20, 0.0  ;;  %v238_v33 = vmax.f32 %v174_v21, 0.0  ;;  %v239_v34 = vmax.f32 %v175_v22, 0.0  ;;  %300 = vst [vmem:[%s899_s3 + $0x80] sm:$0xff] %v236_v25  ;;  %v109_v42 = vmul.f32 %v380_v1, %v38_v24 }
  0x15   :  { %v179_v35 = vadd.f32 %v385_v2, %v108_v23  ;;  %v240_v39 = vmax.f32 %v176_v26, 0.0  ;;  %v241_v40 = vmax.f32 %v177_v27, 0.0  ;;  %v242_v41 = vmax.f32 %v178_v28, 0.0  ;;  %v54_v26 = vld [vmem:[%s896_s0 + $0x140] sm:$0xff] }
  0x16   :  { %301 = vst [vmem:[%s899_s3 + $0x88] sm:$0xff] %v237_v32  ;;  %302 = vst [vmem:[%s899_s3 + $0x90] sm:$0xff] %v238_v33  ;;  %v110_v45 = vmul.f32 %v380_v1, %v39_v29  ;;  %v111_v46 = vmul.f32 %v380_v1, %v40_v30  ;;  %v112_v47 = vmul.f32 %v380_v1, %v41_v31  ;;  %v55_v31 = vld [vmem:[%s896_s0 + $0x148] sm:$0xff]  ;;  %v56_v32 = vld [vmem:[%s896_s0 + $0x150] sm:$0xff] }
  0x17   :  { %303 = vst [vmem:[%s899_s3 + $0x98] sm:$0xff] %v239_v34  ;;  %v243_v44 = vmax.f32 %v179_v35, 0.0  ;;  %304 = vst [vmem:[%s899_s3 + $0xa0] sm:$0xff] %v240_v39  ;;  %v180_v48 = vadd.f32 %v385_v2, %v109_v42  ;;  %v113_v49 = vmul.f32 %v380_v1, %v42_v36  ;;  %v114_v50 = vmul.f32 %v380_v1, %v43_v37  ;;  %v57_v33 = vld [vmem:[%s896_s0 + $0x158] sm:$0xff]  ;;  %v59_v39 = vld [vmem:[%s896_s0 + $0x168] sm:$0xff] }
  0x18   :  { %305 = vst [vmem:[%s899_s3 + $0xa8] sm:$0xff] %v241_v40  ;;  %306 = vst [vmem:[%s899_s3 + $0xb0] sm:$0xff] %v242_v41  ;;  %v115_v51 = vmul.f32 %v380_v1, %v44_v38  ;;  %v181_v52 = vadd.f32 %v385_v2, %v110_v45  ;;  %v182_v53 = vadd.f32 %v385_v2, %v111_v46  ;;  %v58_v38 = vld [vmem:[%s896_s0 + $0x160] sm:$0xff]  ;;  %v60_v40 = vld [vmem:[%s896_s0 + $0x170] sm:$0xff] }
  0x19   :  { %307 = vst [vmem:[%s899_s3 + $0xb8] sm:$0xff] %v243_v44  ;;  %v183_v54 = vadd.f32 %v385_v2, %v112_v47  ;;  %v116_v55 = vmul.f32 %v380_v1, %v45_v43  ;;  %v244_v57 = vmax.f32 %v180_v48, 0.0  ;;  %v184_v58 = vadd.f32 %v385_v2, %v113_v49  ;;  %v61_v45 = vld [vmem:[%s896_s0 + $0x178] sm:$0xff] }
  0x1a   :  { %v185_v59 = vadd.f32 %v385_v2, %v114_v50  ;;  %v186_v60 = vadd.f32 %v385_v2, %v115_v51  ;;  %v245_v0 = vmax.f32 %v181_v52, 0.0  ;;  %v246_v3 = vmax.f32 %v182_v53, 0.0 }
  0x1b   :  { %v247_v4 = vmax.f32 %v183_v54, 0.0  ;;  %v187_v5 = vadd.f32 %v385_v2, %v116_v55  ;;  %308 = vst [vmem:[%s899_s3 + $0xc0] sm:$0xff] %v244_v57  ;;  %v248_v9 = vmax.f32 %v184_v58, 0.0  ;;  %v117_v12 = vmul.f32 %v380_v1, %v46_v56  ;;  %v62_v58 = vld [vmem:[%s896_s0 + $0x180] sm:$0xff] }
  0x1c   :  { %v249_v10 = vmax.f32 %v185_v59, 0.0  ;;  %v250_v11 = vmax.f32 %v186_v60, 0.0  ;;  %309 = vst [vmem:[%s899_s3 + $0xc8] sm:$0xff] %v245_v0  ;;  %310 = vst [vmem:[%s899_s3 + $0xd0] sm:$0xff] %v246_v3  ;;  %v118_v15 = vmul.f32 %v380_v1, %v47_v61  ;;  %v119_v16 = vmul.f32 %v380_v1, %v48_v62  ;;  %v64_v0 = vld [vmem:[%s896_s0 + $0x190] sm:$0xff]  ;;  %v65_v3 = vld [vmem:[%s896_s0 + $0x198] sm:$0xff] }
  0x1d   :  { %311 = vst [vmem:[%s899_s3 + $0xd8] sm:$0xff] %v247_v4  ;;  %v251_v14 = vmax.f32 %v187_v5, 0.0  ;;  %v120_v17 = vmul.f32 %v380_v1, %v49_v63  ;;  %312 = vst [vmem:[%s899_s3 + $0xe0] sm:$0xff] %v248_v9  ;;  %v188_v18 = vadd.f32 %v385_v2, %v117_v12  ;;  %v121_v19 = vmul.f32 %v380_v1, %v50_v6  ;;  %v63_v63 = vld [vmem:[%s896_s0 + $0x188] sm:$0xff] }
  0x1e   :  { %313 = vst [vmem:[%s899_s3 + $0xe8] sm:$0xff] %v249_v10  ;;  %314 = vst [vmem:[%s899_s3 + $0xf0] sm:$0xff] %v250_v11  ;;  %v122_v20 = vmul.f32 %v380_v1, %v51_v7  ;;  %v123_v21 = vmul.f32 %v380_v1, %v52_v8  ;;  %v189_v22 = vadd.f32 %v385_v2, %v118_v15  ;;  %v66_v8 = vld [vmem:[%s896_s0 + $0x1a0] sm:$0xff]  ;;  %v67_v9 = vld [vmem:[%s896_s0 + $0x1a8] sm:$0xff] }
  0x1f   :  { %315 = vst [vmem:[%s899_s3 + $0xf8] sm:$0xff] %v251_v14  ;;  %v190_v23 = vadd.f32 %v385_v2, %v119_v16  ;;  %v191_v24 = vadd.f32 %v385_v2, %v120_v17  ;;  %v124_v25 = vmul.f32 %v380_v1, %v53_v13  ;;  %v252_v27 = vmax.f32 %v188_v18, 0.0  ;;  %v68_v10 = vld [vmem:[%s896_s0 + $0x1b0] sm:$0xff]  ;;  %v69_v15 = vld [vmem:[%s896_s0 + $0x1b8] sm:$0xff] }
  0x20   :  { %v192_v28 = vadd.f32 %v385_v2, %v121_v19  ;;  %v193_v29 = vadd.f32 %v385_v2, %v122_v20  ;;  %v194_v30 = vadd.f32 %v385_v2, %v123_v21  ;;  %v253_v34 = vmax.f32 %v189_v22, 0.0 }
  0x21   :  { %v254_v35 = vmax.f32 %v190_v23, 0.0  ;;  %v255_v36 = vmax.f32 %v191_v24, 0.0  ;;  %v195_v37 = vadd.f32 %v385_v2, %v124_v25  ;;  %316 = vst [vmem:[%s899_s3 + $0x100] sm:$0xff] %v252_v27  ;;  %v125_v44 = vmul.f32 %v380_v1, %v54_v26 }
  0x22   :  { %v256_v41 = vmax.f32 %v192_v28, 0.0  ;;  %v257_v42 = vmax.f32 %v193_v29, 0.0  ;;  %v258_v43 = vmax.f32 %v194_v30, 0.0  ;;  %317 = vst [vmem:[%s899_s3 + $0x108] sm:$0xff] %v253_v34  ;;  %v126_v47 = vmul.f32 %v380_v1, %v55_v31  ;;  %v70_v28 = vld [vmem:[%s896_s0 + $0x1c0] sm:$0xff]  ;;  %v72_v34 = vld [vmem:[%s896_s0 + $0x1d0] sm:$0xff] }
  0x23   :  { %318 = vst [vmem:[%s899_s3 + $0x110] sm:$0xff] %v254_v35  ;;  %319 = vst [vmem:[%s899_s3 + $0x118] sm:$0xff] %v255_v36  ;;  %v259_v46 = vmax.f32 %v195_v37, 0.0  ;;  %v127_v48 = vmul.f32 %v380_v1, %v56_v32  ;;  %v128_v49 = vmul.f32 %v380_v1, %v57_v33  ;;  %v196_v50 = vadd.f32 %v385_v2, %v125_v44  ;;  %v71_v33 = vld [vmem:[%s896_s0 + $0x1c8] sm:$0xff]  ;;  %v73_v35 = vld [vmem:[%s896_s0 + $0x1d8] sm:$0xff] }
  0x24   :  { %320 = vst [vmem:[%s899_s3 + $0x120] sm:$0xff] %v256_v41  ;;  %321 = vst [vmem:[%s899_s3 + $0x128] sm:$0xff] %v257_v42  ;;  %v129_v51 = vmul.f32 %v380_v1, %v58_v38  ;;  %v130_v52 = vmul.f32 %v380_v1, %v59_v39  ;;  %v131_v53 = vmul.f32 %v380_v1, %v60_v40  ;;  %v74_v40 = vld [vmem:[%s896_s0 + $0x1e0] sm:$0xff]  ;;  %v75_v41 = vld [vmem:[%s896_s0 + $0x1e8] sm:$0xff] }
  0x25   :  { %322 = vst [vmem:[%s899_s3 + $0x130] sm:$0xff] %v258_v43  ;;  %323 = vst [vmem:[%s899_s3 + $0x138] sm:$0xff] %v259_v46  ;;  %v197_v54 = vadd.f32 %v385_v2, %v126_v47  ;;  %v198_v55 = vadd.f32 %v385_v2, %v127_v48  ;;  %v199_v56 = vadd.f32 %v385_v2, %v128_v49  ;;  %v260_v59 = vmax.f32 %v196_v50, 0.0  ;;  %v76_v42 = vld [vmem:[%s896_s0 + $0x1f0] sm:$0xff]  ;;  %v77_v47 = vld [vmem:[%s896_s0 + $0x1f8] sm:$0xff] }
  0x26   :  { %v132_v57 = vmul.f32 %v380_v1, %v61_v45  ;;  %v200_v60 = vadd.f32 %v385_v2, %v129_v51  ;;  %v201_v61 = vadd.f32 %v385_v2, %v130_v52  ;;  %v202_v62 = vadd.f32 %v385_v2, %v131_v53 }
  0x27   :  { %v261_v4 = vmax.f32 %v197_v54, 0.0  ;;  %v262_v5 = vmax.f32 %v198_v55, 0.0  ;;  %v263_v6 = vmax.f32 %v199_v56, 0.0  ;;  %324 = vst [vmem:[%s899_s3 + $0x140] sm:$0xff] %v260_v59  ;;  %v133_v14 = vmul.f32 %v380_v1, %v62_v58 }
  0x28   :  { %v203_v7 = vadd.f32 %v385_v2, %v132_v57  ;;  %v264_v11 = vmax.f32 %v200_v60, 0.0  ;;  %v265_v12 = vmax.f32 %v201_v61, 0.0  ;;  %v266_v13 = vmax.f32 %v202_v62, 0.0 }
  0x29   :  { %325 = vst [vmem:[%s899_s3 + $0x148] sm:$0xff] %v261_v4  ;;  %326 = vst [vmem:[%s899_s3 + $0x150] sm:$0xff] %v262_v5  ;;  %v134_v17 = vmul.f32 %v380_v1, %v63_v63  ;;  %v135_v18 = vmul.f32 %v380_v1, %v64_v0  ;;  %v136_v19 = vmul.f32 %v380_v1, %v65_v3 }
  0x2a   :  { %327 = vst [vmem:[%s899_s3 + $0x158] sm:$0xff] %v263_v6  ;;  %v267_v16 = vmax.f32 %v203_v7, 0.0  ;;  %328 = vst [vmem:[%s899_s3 + $0x160] sm:$0xff] %v264_v11  ;;  %v204_v20 = vadd.f32 %v385_v2, %v133_v14  ;;  %v137_v21 = vmul.f32 %v380_v1, %v66_v8  ;;  %v138_v22 = vmul.f32 %v380_v1, %v67_v9 }
  0x2b   :  { %329 = vst [vmem:[%s899_s3 + $0x168] sm:$0xff] %v265_v12  ;;  %330 = vst [vmem:[%s899_s3 + $0x170] sm:$0xff] %v266_v13  ;;  %v139_v23 = vmul.f32 %v380_v1, %v68_v10  ;;  %v205_v24 = vadd.f32 %v385_v2, %v134_v17  ;;  %v206_v25 = vadd.f32 %v385_v2, %v135_v18 }
  0x2c   :  { %331 = vst [vmem:[%s899_s3 + $0x178] sm:$0xff] %v267_v16  ;;  %v207_v26 = vadd.f32 %v385_v2, %v136_v19  ;;  %v140_v27 = vmul.f32 %v380_v1, %v69_v15  ;;  %v268_v29 = vmax.f32 %v204_v20, 0.0  ;;  %v208_v30 = vadd.f32 %v385_v2, %v137_v21 }
  0x2d   :  { %v209_v31 = vadd.f32 %v385_v2, %v138_v22  ;;  %v210_v32 = vadd.f32 %v385_v2, %v139_v23  ;;  %v269_v36 = vmax.f32 %v205_v24, 0.0  ;;  %v270_v37 = vmax.f32 %v206_v25, 0.0 }
  0x2e   :  { %v271_v38 = vmax.f32 %v207_v26, 0.0  ;;  %v211_v39 = vadd.f32 %v385_v2, %v140_v27  ;;  %332 = vst [vmem:[%s899_s3 + $0x180] sm:$0xff] %v268_v29  ;;  %v272_v43 = vmax.f32 %v208_v30, 0.0  ;;  %v141_v46 = vmul.f32 %v380_v1, %v70_v28 }
  0x2f   :  { %v273_v44 = vmax.f32 %v209_v31, 0.0  ;;  %v274_v45 = vmax.f32 %v210_v32, 0.0  ;;  %333 = vst [vmem:[%s899_s3 + $0x188] sm:$0xff] %v269_v36  ;;  %334 = vst [vmem:[%s899_s3 + $0x190] sm:$0xff] %v270_v37  ;;  %v142_v49 = vmul.f32 %v380_v1, %v71_v33  ;;  %v143_v50 = vmul.f32 %v380_v1, %v72_v34 }
  0x30   :  { %335 = vst [vmem:[%s899_s3 + $0x198] sm:$0xff] %v271_v38  ;;  %v275_v48 = vmax.f32 %v211_v39, 0.0  ;;  %v144_v51 = vmul.f32 %v380_v1, %v73_v35  ;;  %336 = vst [vmem:[%s899_s3 + $0x1a0] sm:$0xff] %v272_v43  ;;  %v212_v52 = vadd.f32 %v385_v2, %v141_v46  ;;  %v145_v53 = vmul.f32 %v380_v1, %v74_v40 }
  0x31   :  { %337 = vst [vmem:[%s899_s3 + $0x1a8] sm:$0xff] %v273_v44  ;;  %338 = vst [vmem:[%s899_s3 + $0x1b0] sm:$0xff] %v274_v45  ;;  %v146_v54 = vmul.f32 %v380_v1, %v75_v41  ;;  %v147_v55 = vmul.f32 %v380_v1, %v76_v42  ;;  %v213_v56 = vadd.f32 %v385_v2, %v142_v49 }
  0x32   :  { %339 = vst [vmem:[%s899_s3 + $0x1b8] sm:$0xff] %v275_v48  ;;  %v214_v57 = vadd.f32 %v385_v2, %v143_v50  ;;  %v215_v58 = vadd.f32 %v385_v2, %v144_v51  ;;  %v148_v59 = vmul.f32 %v380_v1, %v77_v47  ;;  %v276_v60 = vmax.f32 %v212_v52, 0.0 }
  0x33   :  { %v216_v61 = vadd.f32 %v385_v2, %v145_v53  ;;  %v217_v62 = vadd.f32 %v385_v2, %v146_v54  ;;  %v218_v63 = vadd.f32 %v385_v2, %v147_v55  ;;  %v277_v0 = vmax.f32 %v213_v56, 0.0 }
  0x34   :  { %v278_v3 = vmax.f32 %v214_v57, 0.0  ;;  %v279_v4 = vmax.f32 %v215_v58, 0.0  ;;  %v219_v5 = vadd.f32 %v385_v2, %v148_v59  ;;  %340 = vst [vmem:[%s899_s3 + $0x1c0] sm:$0xff] %v276_v60 }
  0x35   :  { %v280_v6 = vmax.f32 %v216_v61, 0.0  ;;  %v281_v7 = vmax.f32 %v217_v62, 0.0  ;;  %v282_v8 = vmax.f32 %v218_v63, 0.0  ;;  %341 = vst [vmem:[%s899_s3 + $0x1c8] sm:$0xff] %v277_v0 }
  0x36   :  { %342 = vst [vmem:[%s899_s3 + $0x1d0] sm:$0xff] %v278_v3  ;;  %343 = vst [vmem:[%s899_s3 + $0x1d8] sm:$0xff] %v279_v4  ;;  %v283_v1 = vmax.f32 %v219_v5, 0.0 }
  0x37   :  { %344 = vst [vmem:[%s899_s3 + $0x1e0] sm:$0xff] %v280_v6  ;;  %345 = vst [vmem:[%s899_s3 + $0x1e8] sm:$0xff] %v281_v7 }
  0x38   :  { %346 = vst [vmem:[%s899_s3 + $0x1f0] sm:$0xff] %v282_v8  ;;  %347 = vst [vmem:[%s899_s3 + $0x1f8] sm:$0xff] %v283_v1 }

// kernel: generator_forward.17
= control target key start
LH: loop header
LB: loop body
LE: loop exit
PB: predicated region body
PF: predicated region fallthrough
CT: control target
= control target key end

     0   :  { %s1327_s9 = smov 0   ;;  %s1472_s0 = inlined_call_operand.vmem [shape: bf16[2048,128], index: 0, kind: input, shape index: {}]   ;;  %s1473_s1 = inlined_call_operand.vmem [shape: bf16[128,128], index: 1, kind: input, shape index: {}]   ;;  %s1474_s2 = inlined_call_operand.vmem [shape: f32[2048,128], index: 2, kind: output, shape index: {}]  }
   0x1 LB: > { %s941_s10 = sadd.s32 4294967295, %s1310_s9   ;;  %p945_p0 = scmp.ge.s32.totalorder %s1310_s9, 1  ;;  %s1310_s9 = sphi %s1327_s9, %s12_s9  }
   0x2   : > { %p113_p1 = scmp.lt.s32.totalorder %s1310_s9, 5 }
   0x4   : > { %p114_p2 = pnand %p945_p0, %p113_p1 }
   0x5   : > { %v1136_v0 = vld [vmem:[%s1473_s1] sm:$0xff] (!%p114_p2)   ;;  %s946_s13 = sshll.u32 (!%p114_p2), %s941_s10, 6  ;;  %v1137_v1 = vld [vmem:[%s1473_s1 + $0x8] sm:$0xff] (!%p114_p2)   ;;  %v1138_v2 = vld [vmem:[%s1473_s1 + $0x10] sm:$0xff] (!%p114_p2)  }
   0x6   : > { %117 = sbr.rel (%p114_p2) target bundleno = 328 (0x148), region = 28  ;;  %p136_p3 = scmp.lt.s32.totalorder (!%p114_p2), %s946_s13, 255  ;;  %1032 = vmatprep.subr.bf16.mxu0 (!%p114_p2), %v1136_v0  ;;  %1112 = vmatprep.subr.bf16.mxu1 (!%p114_p2), %v1136_v0  ;;  %v1139_v3 = vld [vmem:[%s1473_s1 + $0x18] sm:$0xff] (!%p114_p2)   ;;  %v1140_v6 = vld [vmem:[%s1473_s1 + $0x20] sm:$0xff] (!%p114_p2)   ;;  %v1141_v7 = vld [vmem:[%s1473_s1 + $0x28] sm:$0xff] (!%p114_p2)  }
   0x7   : > { %1033 = vmatpush3.bf16.msra.mxu0 (!%p114_p2), %v1136_v0  ;;  %1120 = vmatpush3.bf16.msra.mxu1 (!%p114_p2), %v1136_v0  ;;  %v1142_v8 = vld [vmem:[%s1473_s1 + $0x30] sm:$0xff] (!%p114_p2)   ;;  %v1143_v9 = vld [vmem:[%s1473_s1 + $0x38] sm:$0xff] (!%p114_p2)  }
   0x8   : > { %1034 = vmatprep.subr.bf16.mxu0 (!%p114_p2), %v1137_v1  ;;  %1113 = vmatprep.subr.bf16.mxu1 (!%p114_p2), %v1137_v1 }
   0xb   : > { %1035 = vmatpush3.bf16.msra.mxu0 (!%p114_p2), %v1137_v1  ;;  %1121 = vmatpush3.bf16.msra.mxu1 (!%p114_p2), %v1137_v1 }
   0xc   : > { %1036 = vmatprep.subr.bf16.mxu0 (!%p114_p2), %v1138_v2  ;;  %1114 = vmatprep.subr.bf16.mxu1 (!%p114_p2), %v1138_v2 }
   0xd   : > { %s1476_s13 = smov (!%p136_p3, %s946_s13), 255 }
   0xe   : > { %s947_s18 = sshll.u32 %s1476_s13, 2  ;;  %s949_s4 = sshll.u32 %s1476_s13, 3 }
   0xf   : > { %s1350_s21 = scalar_lea.vmem %s1472_s0, %s947_s18  ;;  %1037 = vmatpush3.bf16.msra.mxu0 %v1138_v2  ;;  %1122 = vmatpush3.bf16.msra.mxu1 %v1138_v2  ;;  %s1403_s7 = scalar_lea.vmem %s1474_s2, %s949_s4 }
  0x10   : > { %v1144_v4 = vld [vmem:[%s1350_s21] sm:$0xff]   ;;  %1038 = vmatprep.subr.bf16.mxu0 %v1139_v3  ;;  %1115 = vmatprep.subr.bf16.mxu1 %v1139_v3  ;;  %v1146_v10 = vld [vmem:[%s1350_s21 + $0x8] sm:$0xff]   ;;  %v1148_v12 = vld [vmem:[%s1350_s21 + $0x10] sm:$0xff]  }
  0x11   : > { %v1145_v5 = vld [vmem:[%s1350_s21 + $0x80] sm:$0xff]   ;;  %1048 = vmatprep.mubr.bf16.mxu0 %v1144_v4  ;;  %v1147_v11 = vld [vmem:[%s1350_s21 + $0x88] sm:$0xff]   ;;  %v1149_v13 = vld [vmem:[%s1350_s21 + $0x90] sm:$0xff]  }
  0x12   : > { %1080 = vmatprep.mubr.bf16.mxu1 %v1145_v5  ;;  %v1150_v14 = vld [vmem:[%s1350_s21 + $0x18] sm:$0xff]   ;;  %v1152_v16 = vld [vmem:[%s1350_s21 + $0x20] sm:$0xff]   ;;  %v1154_v18 = vld [vmem:[%s1350_s21 + $0x28] sm:$0xff]  }
  0x13   : > { %1039 = vmatpush3.bf16.msra.mxu0 %v1139_v3  ;;  %1123 = vmatpush3.bf16.msra.mxu1 %v1139_v3  ;;  %v1151_v15 = vld [vmem:[%s1350_s21 + $0x98] sm:$0xff]   ;;  %v1153_v17 = vld [vmem:[%s1350_s21 + $0xa0] sm:$0xff]   ;;  %v1155_v19 = vld [vmem:[%s1350_s21 + $0xa8] sm:$0xff]  }
  0x14   : > { %1040 = vmatprep.subr.bf16.mxu0 %v1140_v6  ;;  %1116 = vmatprep.subr.bf16.mxu1 %v1140_v6  ;;  %v1156_v20 = vld [vmem:[%s1350_s21 + $0x30] sm:$0xff]   ;;  %v1158_v22 = vld [vmem:[%s1350_s21 + $0x38] sm:$0xff]   ;;  %v1160_v24 = vld [vmem:[%s1350_s21 + $0x40] sm:$0xff]  }
  0x15   : > { %v1157_v21 = vld [vmem:[%s1350_s21 + $0xb0] sm:$0xff]   ;;  %v1159_v23 = vld [vmem:[%s1350_s21 + $0xb8] sm:$0xff]   ;;  %v1161_v25 = vld [vmem:[%s1350_s21 + $0xc0] sm:$0xff]  }
  0x16   : > { %v1162_v26 = vld [vmem:[%s1350_s21 + $0x48] sm:$0xff]   ;;  %v1164_v28 = vld [vmem:[%s1350_s21 + $0x50] sm:$0xff]   ;;  %v1166_v30 = vld [vmem:[%s1350_s21 + $0x58] sm:$0xff]  }
  0x17   : > { %1041 = vmatpush3.bf16.msra.mxu0 %v1140_v6  ;;  %1124 = vmatpush3.bf16.msra.mxu1 %v1140_v6  ;;  %v1163_v27 = vld [vmem:[%s1350_s21 + $0xc8] sm:$0xff]   ;;  %v1165_v29 = vld [vmem:[%s1350_s21 + $0xd0] sm:$0xff]   ;;  %v1167_v31 = vld [vmem:[%s1350_s21 + $0xd8] sm:$0xff]  }
  0x18   : > { %1042 = vmatprep.subr.bf16.mxu0 %v1141_v7  ;;  %1117 = vmatprep.subr.bf16.mxu1 %v1141_v7  ;;  %v1168_v32 = vld [vmem:[%s1350_s21 + $0x60] sm:$0xff]   ;;  %v1170_v34 = vld [vmem:[%s1350_s21 + $0x68] sm:$0xff]   ;;  %v1172_v36 = vld [vmem:[%s1350_s21 + $0x70] sm:$0xff]  }
  0x19   : > { %v1169_v33 = vld [vmem:[%s1350_s21 + $0xe0] sm:$0xff]   ;;  %v1171_v35 = vld [vmem:[%s1350_s21 + $0xe8] sm:$0xff]   ;;  %v1173_v37 = vld [vmem:[%s1350_s21 + $0xf0] sm:$0xff]  }
  0x1a   : > { %v1174_v38 = vld [vmem:[%s1350_s21 + $0x78] sm:$0xff]  }
  0x1b   : > { %1043 = vmatpush3.bf16.msra.mxu0 %v1141_v7  ;;  %1125 = vmatpush3.bf16.msra.mxu1 %v1141_v7  ;;  %v1175_v39 = vld [vmem:[%s1350_s21 + $0xf8] sm:$0xff]  }
  0x1c   : > { %1044 = vmatprep.subr.bf16.mxu0 %v1142_v8  ;;  %1118 = vmatprep.subr.bf16.mxu1 %v1142_v8 }
  0x1f   : > { %1045 = vmatpush3.bf16.msra.mxu0 %v1142_v8  ;;  %1126 = vmatpush3.bf16.msra.mxu1 %v1142_v8 }
  0x20   : > { %1046 = vmatprep.subr.bf16.mxu0 %v1143_v9  ;;  %1119 = vmatprep.subr.bf16.mxu1 %v1143_v9 }
  0x23   : > { %1047 = vmatpush3.bf16.msra.mxu0 %v1143_v9  ;;  %1127 = vmatpush3.bf16.msra.mxu1 %v1143_v9 }
  0x26   : > { %1049 = vmatmul.mubr.bf16.vlgmr.msra.gmra.mrb[0].mxu0 %v1146_v10  ;;  %1081 = vmatmul.mubr.bf16.vlgmr.msra.gmra.mrb[0].mxu1 %v1147_v11 }
  0x27   : > { %1052 = vmatprep.mubr.bf16.mxu0 %v1148_v12  ;;  %1084 = vmatprep.mubr.bf16.mxu1 %v1149_v13 }
  0x2e   : > { %1053 = vmatmul.mubr.bf16.gmra.mrb[4].mxu0 %v1150_v14  ;;  %1085 = vmatmul.mubr.bf16.gmra.mrb[4].mxu1 %v1151_v15 }
  0x2f   : > { %1056 = vmatprep.mubr.bf16.mxu0 %v1152_v16  ;;  %1088 = vmatprep.mubr.bf16.mxu1 %v1153_v17 }
  0x36   : > { %1057 = vmatmul.mubr.bf16.gmra.mrb[8].mxu0 %v1154_v18  ;;  %1089 = vmatmul.mubr.bf16.gmra.mrb[8].mxu1 %v1155_v19 }
  0x37   : > { %1060 = vmatprep.mubr.bf16.mxu0 %v1156_v20  ;;  %1092 = vmatprep.mubr.bf16.mxu1 %v1157_v21 }
  0x3e   : > { %1061 = vmatmul.mubr.bf16.gmra.mrb[12].mxu0 %v1158_v22  ;;  %1093 = vmatmul.mubr.bf16.gmra.mrb[12].mxu1 %v1159_v23 }
  0x3f   : > { %1064 = vmatprep.mubr.bf16.mxu0 %v1160_v24  ;;  %1096 = vmatprep.mubr.bf16.mxu1 %v1161_v25 }
  0x46   : > { %1065 = vmatmul.mubr.bf16.gmra.mrb[16].mxu0 %v1162_v26  ;;  %1097 = vmatmul.mubr.bf16.gmra.mrb[16].mxu1 %v1163_v27 }
  0x47   : > { %1068 = vmatprep.mubr.bf16.mxu0 %v1164_v28  ;;  %1100 = vmatprep.mubr.bf16.mxu1 %v1165_v29 }
  0x4e   : > { %1069 = vmatmul.mubr.bf16.gmra.mrb[20].mxu0 %v1166_v30  ;;  %1101 = vmatmul.mubr.bf16.gmra.mrb[20].mxu1 %v1167_v31 }
  0x4f   : > { %1072 = vmatprep.mubr.bf16.mxu0 %v1168_v32  ;;  %1104 = vmatprep.mubr.bf16.mxu1 %v1169_v33 }
  0x56   : > { %1073 = vmatmul.mubr.bf16.gmra.mrb[24].mxu0 %v1170_v34  ;;  %1105 = vmatmul.mubr.bf16.gmra.mrb[24].mxu1 %v1171_v35 }
  0x57   : > { %1076 = vmatprep.mubr.bf16.mxu0 %v1172_v36  ;;  %1108 = vmatprep.mubr.bf16.mxu1 %v1173_v37 }
  0x5e   : > { %1077 = vmatmul.mubr.bf16.gmra.mrb[28].mxu0 %v1174_v38  ;;  %1109 = vmatmul.mubr.bf16.gmra.mrb[28].mxu1 %v1175_v39 }
  0xf9   : > { %v1050_v40 = vpop.f32.mrb[0].mxu0  ;;  %v1082_v41 = vpop.f32.mrb[0].mxu1 }
  0xfa   : > { %1176 = vtanh.f32 %v1050_v40  ;;  %v502_v42 = vpop.f32.mrb[1].mxu0  ;;  %v630_v43 = vpop.f32.mrb[1].mxu1 }
  0xfb   : > { %1178 = vtanh.f32 %v1082_v41  ;;  %v1051_v44 = vpop.f32.mrb[2].mxu0  ;;  %v1083_v45 = vpop.f32.mrb[2].mxu1 }
  0xfc   : > { %1180 = vtanh.f32 %v502_v42  ;;  %v505_v46 = vpop.f32.mrb[3].mxu0  ;;  %v633_v47 = vpop.f32.mrb[3].mxu1 }
  0xfd   : > { %1182 = vtanh.f32 %v630_v43 }
  0xfe   : > { %1184 = vtanh.f32 %v1051_v44 }
  0xff   : > { %1186 = vtanh.f32 %v1083_v45 }
 0x100   : > { %1188 = vtanh.f32 %v505_v46 }
 0x101   : > { %1190 = vtanh.f32 %v633_v47  ;;  %v1054_v48 = vpop.f32.mrb[4].mxu0  ;;  %v1086_v49 = vpop.f32.mrb[4].mxu1 }
 0x102   : > { %1192 = vtanh.f32 %v1054_v48  ;;  %v518_v50 = vpop.f32.mrb[5].mxu0  ;;  %v646_v51 = vpop.f32.mrb[5].mxu1 }
 0x103   : > { %1194 = vtanh.f32 %v1086_v49  ;;  %v1055_v52 = vpop.f32.mrb[6].mxu0  ;;  %v1087_v53 = vpop.f32.mrb[6].mxu1 }
 0x104   : > { %v1177_v54 = vpop.eup %1176  ;;  %1196 = vtanh.f32 %v518_v50  ;;  %v521_v55 = vpop.f32.mrb[7].mxu0 }
 0x105   : > { %v649_v56 = vpop.f32.mrb[7].mxu1  ;;  %v1179_v57 = vpop.eup %1178  ;;  %823 = vst [vmem:[%s1403_s7 + $0x10] sm:$0xff] %v1177_v54  ;;  %1198 = vtanh.f32 %v646_v51 }
 0x106   : > { %v1181_v58 = vpop.eup %1180  ;;  %855 = vst [vmem:[%s1403_s7 + $0x110] sm:$0xff] %v1179_v57  ;;  %1200 = vtanh.f32 %v1055_v52 }
 0x107   : > { %v1183_v59 = vpop.eup %1182  ;;  %821 = vst [vmem:[%s1403_s7] sm:$0xff] %v1181_v58  ;;  %1202 = vtanh.f32 %v1087_v53 }
 0x108   : > { %v1185_v60 = vpop.eup %1184  ;;  %853 = vst [vmem:[%s1403_s7 + $0x100] sm:$0xff] %v1183_v59  ;;  %1204 = vtanh.f32 %v521_v55 }
 0x109   : > { %v1187_v61 = vpop.eup %1186  ;;  %824 = vst [vmem:[%s1403_s7 + $0x18] sm:$0xff] %v1185_v60  ;;  %1206 = vtanh.f32 %v649_v56  ;;  %v1058_v62 = vpop.f32.mrb[8].mxu0 }
 0x10a   : > { %v1090_v63 = vpop.f32.mrb[8].mxu1  ;;  %v1189_v0 = vpop.eup %1188  ;;  %856 = vst [vmem:[%s1403_s7 + $0x118] sm:$0xff] %v1187_v61  ;;  %1208 = vtanh.f32 %v1058_v62 }
 0x10b   : > { %v534_v1 = vpop.f32.mrb[9].mxu0  ;;  %v662_v2 = vpop.f32.mrb[9].mxu1  ;;  %822 = vst [vmem:[%s1403_s7 + $0x8] sm:$0xff] %v1189_v0  ;;  %1210 = vtanh.f32 %v1090_v63 }
 0x10c   : > { %v1191_v3 = vpop.eup %1190  ;;  %v1059_v4 = vpop.f32.mrb[10].mxu0  ;;  %1212 = vtanh.f32 %v534_v1 }
 0x10d   : > { %v1091_v5 = vpop.f32.mrb[10].mxu1  ;;  %v1193_v6 = vpop.eup %1192  ;;  %854 = vst [vmem:[%s1403_s7 + $0x108] sm:$0xff] %v1191_v3  ;;  %1214 = vtanh.f32 %v662_v2 }
 0x10e   : > { %v537_v7 = vpop.f32.mrb[11].mxu0  ;;  %v665_v8 = vpop.f32.mrb[11].mxu1  ;;  %827 = vst [vmem:[%s1403_s7 + $0x30] sm:$0xff] %v1193_v6  ;;  %1216 = vtanh.f32 %v1059_v4 }
 0x10f   : > { %v1195_v9 = vpop.eup %1194  ;;  %1218 = vtanh.f32 %v1091_v5 }
 0x110   : > { %v1197_v10 = vpop.eup %1196  ;;  %859 = vst [vmem:[%s1403_s7 + $0x130] sm:$0xff] %v1195_v9  ;;  %1220 = vtanh.f32 %v537_v7 }
 0x111   : > { %v1199_v11 = vpop.eup %1198  ;;  %825 = vst [vmem:[%s1403_s7 + $0x20] sm:$0xff] %v1197_v10  ;;  %1222 = vtanh.f32 %v665_v8  ;;  %v1062_v14 = vpop.f32.mrb[12].mxu0 }
 0x112   : > { %v1201_v12 = vpop.eup %1200  ;;  %857 = vst [vmem:[%s1403_s7 + $0x120] sm:$0xff] %v1199_v11  ;;  %v1094_v15 = vpop.f32.mrb[12].mxu1  ;;  %1224 = vtanh.f32 %v1062_v14 }
 0x113   : > { %v1203_v13 = vpop.eup %1202  ;;  %828 = vst [vmem:[%s1403_s7 + $0x38] sm:$0xff] %v1201_v12  ;;  %v550_v17 = vpop.f32.mrb[13].mxu0  ;;  %1226 = vtanh.f32 %v1094_v15 }
 0x114   : > { %v1205_v16 = vpop.eup %1204  ;;  %860 = vst [vmem:[%s1403_s7 + $0x138] sm:$0xff] %v1203_v13  ;;  %v678_v18 = vpop.f32.mrb[13].mxu1  ;;  %1228 = vtanh.f32 %v550_v17 }
 0x115   : > { %v1207_v19 = vpop.eup %1206  ;;  %826 = vst [vmem:[%s1403_s7 + $0x28] sm:$0xff] %v1205_v16  ;;  %v1063_v20 = vpop.f32.mrb[14].mxu0  ;;  %1230 = vtanh.f32 %v678_v18 }
 0x116   : > { %v1095_v21 = vpop.f32.mrb[14].mxu1  ;;  %v1209_v22 = vpop.eup %1208  ;;  %858 = vst [vmem:[%s1403_s7 + $0x128] sm:$0xff] %v1207_v19  ;;  %1232 = vtanh.f32 %v1063_v20 }
 0x117   : > { %v553_v23 = vpop.f32.mrb[15].mxu0  ;;  %v681_v24 = vpop.f32.mrb[15].mxu1  ;;  %831 = vst [vmem:[%s1403_s7 + $0x50] sm:$0xff] %v1209_v22  ;;  %1234 = vtanh.f32 %v1095_v21 }
 0x118   : > { %v1211_v25 = vpop.eup %1210  ;;  %1236 = vtanh.f32 %v553_v23 }
 0x119   : > { %v1213_v26 = vpop.eup %1212  ;;  %863 = vst [vmem:[%s1403_s7 + $0x150] sm:$0xff] %v1211_v25  ;;  %1238 = vtanh.f32 %v681_v24  ;;  %v1066_v30 = vpop.f32.mrb[16].mxu0 }
 0x11a   : > { %v1215_v27 = vpop.eup %1214  ;;  %829 = vst [vmem:[%s1403_s7 + $0x40] sm:$0xff] %v1213_v26  ;;  %v1098_v31 = vpop.f32.mrb[16].mxu1  ;;  %1240 = vtanh.f32 %v1066_v30 }
 0x11b   : > { %v1217_v28 = vpop.eup %1216  ;;  %861 = vst [vmem:[%s1403_s7 + $0x140] sm:$0xff] %v1215_v27  ;;  %v566_v33 = vpop.f32.mrb[17].mxu0  ;;  %1242 = vtanh.f32 %v1098_v31 }
 0x11c   : > { %v1219_v29 = vpop.eup %1218  ;;  %832 = vst [vmem:[%s1403_s7 + $0x58] sm:$0xff] %v1217_v28  ;;  %v694_v34 = vpop.f32.mrb[17].mxu1  ;;  %1244 = vtanh.f32 %v566_v33 }
 0x11d   : > { %v1221_v32 = vpop.eup %1220  ;;  %864 = vst [vmem:[%s1403_s7 + $0x158] sm:$0xff] %v1219_v29  ;;  %v1067_v36 = vpop.f32.mrb[18].mxu0  ;;  %1246 = vtanh.f32 %v694_v34 }
 0x11e   : > { %v1223_v35 = vpop.eup %1222  ;;  %830 = vst [vmem:[%s1403_s7 + $0x48] sm:$0xff] %v1221_v32  ;;  %v1099_v37 = vpop.f32.mrb[18].mxu1  ;;  %1248 = vtanh.f32 %v1067_v36 }
 0x11f   : > { %v1225_v38 = vpop.eup %1224  ;;  %862 = vst [vmem:[%s1403_s7 + $0x148] sm:$0xff] %v1223_v35  ;;  %v569_v39 = vpop.f32.mrb[19].mxu0  ;;  %1250 = vtanh.f32 %v1099_v37 }
 0x120   : > { %v697_v40 = vpop.f32.mrb[19].mxu1  ;;  %v1227_v41 = vpop.eup %1226  ;;  %835 = vst [vmem:[%s1403_s7 + $0x70] sm:$0xff] %v1225_v38  ;;  %1252 = vtanh.f32 %v569_v39 }
 0x121   : > { %v1229_v42 = vpop.eup %1228  ;;  %867 = vst [vmem:[%s1403_s7 + $0x170] sm:$0xff] %v1227_v41  ;;  %1254 = vtanh.f32 %v697_v40  ;;  %v1070_v46 = vpop.f32.mrb[20].mxu0 }
 0x122   : > { %v1231_v43 = vpop.eup %1230  ;;  %833 = vst [vmem:[%s1403_s7 + $0x60] sm:$0xff] %v1229_v42  ;;  %v1102_v47 = vpop.f32.mrb[20].mxu1  ;;  %1256 = vtanh.f32 %v1070_v46 }
 0x123   : > { %v1233_v44 = vpop.eup %1232  ;;  %865 = vst [vmem:[%s1403_s7 + $0x160] sm:$0xff] %v1231_v43  ;;  %v582_v49 = vpop.f32.mrb[21].mxu0  ;;  %1258 = vtanh.f32 %v1102_v47 }
 0x124   : > { %v1235_v45 = vpop.eup %1234  ;;  %836 = vst [vmem:[%s1403_s7 + $0x78] sm:$0xff] %v1233_v44  ;;  %v710_v50 = vpop.f32.mrb[21].mxu1  ;;  %1260 = vtanh.f32 %v582_v49 }
 0x125   : > { %v1237_v48 = vpop.eup %1236  ;;  %868 = vst [vmem:[%s1403_s7 + $0x178] sm:$0xff] %v1235_v45  ;;  %v1071_v52 = vpop.f32.mrb[22].mxu0  ;;  %1262 = vtanh.f32 %v710_v50 }
 0x126   : > { %v1239_v51 = vpop.eup %1238  ;;  %834 = vst [vmem:[%s1403_s7 + $0x68] sm:$0xff] %v1237_v48  ;;  %v1103_v53 = vpop.f32.mrb[22].mxu1  ;;  %1264 = vtanh.f32 %v1071_v52 }
 0x127   : > { %v1241_v54 = vpop.eup %1240  ;;  %866 = vst [vmem:[%s1403_s7 + $0x168] sm:$0xff] %v1239_v51  ;;  %v585_v55 = vpop.f32.mrb[23].mxu0  ;;  %1266 = vtanh.f32 %v1103_v53 }
 0x128   : > { %v713_v56 = vpop.f32.mrb[23].mxu1  ;;  %v1243_v57 = vpop.eup %1242  ;;  %839 = vst [vmem:[%s1403_s7 + $0x90] sm:$0xff] %v1241_v54  ;;  %1268 = vtanh.f32 %v585_v55 }
 0x129   : > { %v1245_v58 = vpop.eup %1244  ;;  %871 = vst [vmem:[%s1403_s7 + $0x190] sm:$0xff] %v1243_v57  ;;  %1270 = vtanh.f32 %v713_v56  ;;  %v1074_v62 = vpop.f32.mrb[24].mxu0 }
 0x12a   : > { %v1247_v59 = vpop.eup %1246  ;;  %837 = vst [vmem:[%s1403_s7 + $0x80] sm:$0xff] %v1245_v58  ;;  %v1106_v63 = vpop.f32.mrb[24].mxu1  ;;  %1272 = vtanh.f32 %v1074_v62 }
 0x12b   : > { %v1249_v60 = vpop.eup %1248  ;;  %869 = vst [vmem:[%s1403_s7 + $0x180] sm:$0xff] %v1247_v59  ;;  %v598_v1 = vpop.f32.mrb[25].mxu0  ;;  %1274 = vtanh.f32 %v1106_v63 }
 0x12c   : > { %v1251_v61 = vpop.eup %1250  ;;  %840 = vst [vmem:[%s1403_s7 + $0x98] sm:$0xff] %v1249_v60  ;;  %v726_v2 = vpop.f32.mrb[25].mxu1  ;;  %1276 = vtanh.f32 %v598_v1 }
 0x12d   : > { %v1253_v0 = vpop.eup %1252  ;;  %872 = vst [vmem:[%s1403_s7 + $0x198] sm:$0xff] %v1251_v61  ;;  %v1075_v4 = vpop.f32.mrb[26].mxu0  ;;  %1278 = vtanh.f32 %v726_v2 }
 0x12e   : > { %v1255_v3 = vpop.eup %1254  ;;  %838 = vst [vmem:[%s1403_s7 + $0x88] sm:$0xff] %v1253_v0  ;;  %v1107_v5 = vpop.f32.mrb[26].mxu1  ;;  %1280 = vtanh.f32 %v1075_v4 }
 0x12f   : > { %v1257_v6 = vpop.eup %1256  ;;  %870 = vst [vmem:[%s1403_s7 + $0x188] sm:$0xff] %v1255_v3  ;;  %v601_v7 = vpop.f32.mrb[27].mxu0  ;;  %1282 = vtanh.f32 %v1107_v5 }
 0x130   : > { %v729_v8 = vpop.f32.mrb[27].mxu1  ;;  %v1259_v9 = vpop.eup %1258  ;;  %843 = vst [vmem:[%s1403_s7 + $0xb0] sm:$0xff] %v1257_v6  ;;  %1284 = vtanh.f32 %v601_v7 }
 0x131   : > { %v1261_v10 = vpop.eup %1260  ;;  %875 = vst [vmem:[%s1403_s7 + $0x1b0] sm:$0xff] %v1259_v9  ;;  %1286 = vtanh.f32 %v729_v8  ;;  %v1078_v14 = vpop.f32.mrb[28].mxu0 }
 0x132   : > { %v1263_v11 = vpop.eup %1262  ;;  %841 = vst [vmem:[%s1403_s7 + $0xa0] sm:$0xff] %v1261_v10  ;;  %v1110_v15 = vpop.f32.mrb[28].mxu1  ;;  %1288 = vtanh.f32 %v1078_v14 }
 0x133   : > { %v1265_v12 = vpop.eup %1264  ;;  %873 = vst [vmem:[%s1403_s7 + $0x1a0] sm:$0xff] %v1263_v11  ;;  %v614_v17 = vpop.f32.mrb[29].mxu0  ;;  %1290 = vtanh.f32 %v1110_v15 }
 0x134   : > { %v1267_v13 = vpop.eup %1266  ;;  %844 = vst [vmem:[%s1403_s7 + $0xb8] sm:$0xff] %v1265_v12  ;;  %v742_v18 = vpop.f32.mrb[29].mxu1  ;;  %1292 = vtanh.f32 %v614_v17 }
 0x135   : > { %v1269_v16 = vpop.eup %1268  ;;  %876 = vst [vmem:[%s1403_s7 + $0x1b8] sm:$0xff] %v1267_v13  ;;  %v1079_v20 = vpop.f32.mrb[30].mxu0  ;;  %1294 = vtanh.f32 %v742_v18 }
 0x136   : > { %v1271_v19 = vpop.eup %1270  ;;  %842 = vst [vmem:[%s1403_s7 + $0xa8] sm:$0xff] %v1269_v16  ;;  %v1111_v21 = vpop.f32.mrb[30].mxu1  ;;  %1296 = vtanh.f32 %v1079_v20 }
 0x137   : > { %v1273_v22 = vpop.eup %1272  ;;  %874 = vst [vmem:[%s1403_s7 + $0x1a8] sm:$0xff] %v1271_v19  ;;  %v617_v23 = vpop.f32.mrb[31].mxu0  ;;  %1298 = vtanh.f32 %v1111_v21 }
 0x138   : > { %v745_v24 = vpop.f32.mrb[31].mxu1  ;;  %v1275_v25 = vpop.eup %1274  ;;  %847 = vst [vmem:[%s1403_s7 + $0xd0] sm:$0xff] %v1273_v22  ;;  %1300 = vtanh.f32 %v617_v23 }
 0x139   : > { %v1277_v26 = vpop.eup %1276  ;;  %879 = vst [vmem:[%s1403_s7 + $0x1d0] sm:$0xff] %v1275_v25  ;;  %1302 = vtanh.f32 %v745_v24 }
 0x13a   : > { %v1279_v27 = vpop.eup %1278  ;;  %845 = vst [vmem:[%s1403_s7 + $0xc0] sm:$0xff] %v1277_v26 }
 0x13b   : > { %v1281_v28 = vpop.eup %1280  ;;  %877 = vst [vmem:[%s1403_s7 + $0x1c0] sm:$0xff] %v1279_v27 }
 0x13c   : > { %v1283_v29 = vpop.eup %1282  ;;  %848 = vst [vmem:[%s1403_s7 + $0xd8] sm:$0xff] %v1281_v28 }
 0x13d   : > { %v1285_v30 = vpop.eup %1284  ;;  %880 = vst [vmem:[%s1403_s7 + $0x1d8] sm:$0xff] %v1283_v29 }
 0x13e   : > { %v1287_v31 = vpop.eup %1286  ;;  %846 = vst [vmem:[%s1403_s7 + $0xc8] sm:$0xff] %v1285_v30 }
 0x13f   : > { %v1289_v32 = vpop.eup %1288  ;;  %878 = vst [vmem:[%s1403_s7 + $0x1c8] sm:$0xff] %v1287_v31 }
 0x140   : > { %v1291_v33 = vpop.eup %1290  ;;  %851 = vst [vmem:[%s1403_s7 + $0xf0] sm:$0xff] %v1289_v32 }
 0x141   : > { %v1293_v34 = vpop.eup %1292  ;;  %883 = vst [vmem:[%s1403_s7 + $0x1f0] sm:$0xff] %v1291_v33 }
 0x142   : > { %v1295_v35 = vpop.eup %1294  ;;  %849 = vst [vmem:[%s1403_s7 + $0xe0] sm:$0xff] %v1293_v34 }
 0x143   : > { %v1297_v36 = vpop.eup %1296  ;;  %881 = vst [vmem:[%s1403_s7 + $0x1e0] sm:$0xff] %v1295_v35 }
 0x144   : > { %v1299_v37 = vpop.eup %1298  ;;  %852 = vst [vmem:[%s1403_s7 + $0xf8] sm:$0xff] %v1297_v36 }
 0x145   : > { %v1301_v38 = vpop.eup %1300  ;;  %884 = vst [vmem:[%s1403_s7 + $0x1f8] sm:$0xff] %v1299_v37 }
 0x146   : > { %v1303_v39 = vpop.eup %1302  ;;  %850 = vst [vmem:[%s1403_s7 + $0xe8] sm:$0xff] %v1301_v38 }
 0x147   : > { %882 = vst [vmem:[%s1403_s7 + $0x1e8] sm:$0xff] %v1303_v39 }
 0x148 PF: > { %s12_s9 = sadd.s32 1, %s1310_s9  }
 0x149   : > { %p9_p4 = scmp.ge.s32.totalorder %s12_s9, 6  }
 0x14b   :  { %11 = sbr.rel (!%p9_p4) target bundleno = 1 (0x1), region = 58 }

</bundles_post_ra>
